<compile_context>
chip_gen: v6e
topology: v6e:2x2x1
jax: 0.10.0
libtpu: 0.0.40
codegen_flags: <defaults>
</compile_context>

<pallas_src>
import functools

import jax
import jax.numpy as jnp
from jax import lax
from jax.experimental import pallas as pl
from jax.experimental.pallas import tpu as pltpu


def _convgru_fused_kernel(
    x_ref, h0_ref, wx_ref, w1h_ref, w2h_ref,
    b1_ref, g1_ref, be1_ref, m1_ref,
    b2_ref, g2_ref, be2_ref, m2_ref,
    wmask_ref,
    out_ref,
    hcol_ref, h_ref,
    *, H, W, K, P, Cin, F, n1, n2, eps,
):
    """Grid = (batch, time). Whole recurrence runs with h resident in VMEM."""
    HW = H * W
    t = pl.program_id(1)

    # ---- recurrent state: init from h0 at the first time step of each b ----
    @pl.when(t == 0)
    def _():
        h_ref[...] = h0_ref[0]

    h = h_ref[...]                         # (F, HW)   lane-dense
    x = x_ref[0, 0]                        # (Cin, HW)

    pad = P * W + P                        # max |spatial shift| in lane units

    def make_taps(v):
        # Zero-extend along lanes once, then every conv tap is a plain slice.
        C = v.shape[0]
        z = jnp.zeros((C, pad), v.dtype)
        vpad = jnp.concatenate([z, v, z], axis=1)          # (C, HW + 2*pad)

        def tap(dy, dx):
            off = (dy - P) * W + (dx - P)
            s = vpad[:, pad + off:pad + off + HW]           # (C, HW)
            if dx != P:                                     # mask w+dx-P OOB
                s = s * wmask_ref[dx:dx + 1, :]
            return s
        return tap

    # ---- x contribution (shared by conv1 & conv2): one im2col matmul -------
    xtap = make_taps(x)
    xcol = jnp.concatenate(
        [xtap(dy, dx) for dy in range(K) for dx in range(K)], axis=0)
    x_contrib = jnp.dot(wx_ref[...], xcol,
                        preferred_element_type=jnp.float32)   # (3F, HW)

    def build_hcol(v):
        # im2col column matrix (K*K*F, HW) for the h-side convolution.
        vtap = make_taps(v)
        for dy in range(K):
            for dx in range(K):
                ti = dy * K + dx
                hcol_ref[ti * F:(ti + 1) * F, :] = vtap(dy, dx)

    def group_norm(y, m_ref, g_ref, be_ref, n):
        # Per-group stats: (C, C) group-membership matmul, then lane reduce.
        gy = jnp.dot(m_ref[...], y, preferred_element_type=jnp.float32)
        gy2 = jnp.dot(m_ref[...], y * y, preferred_element_type=jnp.float32)
        mean = jnp.sum(gy, axis=1, keepdims=True) / n       # (C, 1)
        ex2 = jnp.sum(gy2, axis=1, keepdims=True) / n
        var = ex2 - mean * mean                             # biased (PyTorch GN)
        inv = lax.rsqrt(var + eps)
        return (y - mean) * inv * g_ref[...] + be_ref[...]

    # ---- gates = GN(conv1(cat(x, h)));  z, r = sigmoid(split) --------------
    build_hcol(h)
    gates = (x_contrib[:2 * F, :]
             + jnp.dot(w1h_ref[...], hcol_ref[...],
                       preferred_element_type=jnp.float32)
             + b1_ref[...])
    gates = group_norm(gates, m1_ref, g1_ref, be1_ref, n1)
    z = jax.nn.sigmoid(gates[:F, :])
    r = jax.nn.sigmoid(gates[F:, :])

    # ---- candidate = tanh(GN(conv2(cat(x, r * h)))) -------------------------
    build_hcol(r * h)
    cand = (x_contrib[2 * F:, :]
            + jnp.dot(w2h_ref[...], hcol_ref[...],
                      preferred_element_type=jnp.float32)
            + b2_ref[...])
    ht = jnp.tanh(group_norm(cand, m2_ref, g2_ref, be2_ref, n2))

    hy = (1.0 - z) * h + z * ht
    h_ref[...] = hy                         # carry recurrence in VMEM
    out_ref[0, 0] = hy                      # lane-dense (F, HW) store


def _make_fused_call(B, T, H, W, Cin, F, K):
    P = (K - 1) // 2
    HW = H * W
    G1 = (2 * F) // 16
    G2 = F // 16
    n1 = float(((2 * F) // G1) * HW)
    n2 = float((F // G2) * HW)

    kernel = functools.partial(
        _convgru_fused_kernel, H=H, W=W, K=K, P=P, Cin=Cin, F=F,
        n1=n1, n2=n2, eps=1e-5)

    def const_spec(shape):
        nd = len(shape)
        return pl.BlockSpec(shape, lambda b, t, nd=nd: (0,) * nd)

    in_specs = [
        pl.BlockSpec((1, 1, Cin, HW), lambda b, t: (b, t, 0, 0)),   # x
        pl.BlockSpec((1, F, HW), lambda b, t: (b, 0, 0)),           # h0
        const_spec((3 * F, K * K * Cin)),                           # wx (merged)
        const_spec((2 * F, K * K * F)),                             # w1h
        const_spec((F, K * K * F)),                                 # w2h
        const_spec((2 * F, 1)),                                     # b1
        const_spec((2 * F, 1)),                                     # gamma1
        const_spec((2 * F, 1)),                                     # beta1
        const_spec((2 * F, 2 * F)),                                 # group mask 1
        const_spec((F, 1)),                                         # b2
        const_spec((F, 1)),                                         # gamma2
        const_spec((F, 1)),                                         # beta2
        const_spec((F, F)),                                         # group mask 2
        const_spec((K, HW)),                                        # border masks
    ]
    out_spec = pl.BlockSpec((1, 1, F, HW), lambda b, t: (b, t, 0, 0))

    return pl.pallas_call(
        kernel,
        out_shape=jax.ShapeDtypeStruct((B, T, F, HW), jnp.float32),
        grid=(B, T),
        in_specs=in_specs,
        out_specs=out_spec,
        scratch_shapes=[
            pltpu.VMEM((K * K * F, HW), jnp.float32),   # im2col column buffer
            pltpu.VMEM((F, HW), jnp.float32),           # recurrent hidden state
        ],
        compiler_params=pltpu.CompilerParams(
            dimension_semantics=("parallel", "arbitrary")),
    )


def convgru_forward(inputs, h0, params, K):
    """inputs: (B, Cin, T, H, W), h0: (B, F, H, W) -> (B, F, T, H, W), (B, F, H, W)."""
    B, Cin, T, H, W = inputs.shape
    F = h0.shape[1]
    P = (K - 1) // 2
    HW = H * W

    # Channels-first, flattened-spatial (lane-dense) layout for the kernel.
    x = jnp.transpose(inputs, (0, 2, 1, 3, 4)).reshape(B, T, Cin, HW)
    h = h0.reshape(B, F, HW)

    # Kernel weight layouts. im2col column order is (tap dy-major, dx, channel
    # fastest), so HWIO -> (Cout, K, K, Cin_part) -> (Cout, K*K*Cin_part).
    wx = jnp.concatenate([params["w1x"], params["w2x"]], axis=3)    # (K,K,Cin,3F)
    wx = jnp.transpose(wx, (3, 0, 1, 2)).reshape(3 * F, K * K * Cin)
    w1h = jnp.transpose(params["w1h"], (3, 0, 1, 2)).reshape(2 * F, K * K * F)
    w2h = jnp.transpose(params["w2h"], (3, 0, 1, 2)).reshape(F, K * K * F)

    col = lambda a: a.reshape(-1, 1)        # (1, C) -> (C, 1) lane broadcast

    # Horizontal border validity masks per kernel column offset dx: valid iff
    # 0 <= w + dx - P < W  (vertical OOB is handled by the zero-padded shift).
    wpos = jnp.arange(HW, dtype=jnp.int32) % W
    dxs = jnp.arange(K, dtype=jnp.int32)[:, None] - P
    wmask = ((wpos[None, :] + dxs >= 0)
             & (wpos[None, :] + dxs < W)).astype(jnp.float32)       # (K, HW)

    call = _make_fused_call(B, T, H, W, Cin, F, K)
    out = call(x, h, wx, w1h, w2h,
               col(params["b1"]), col(params["g1"]), col(params["be1"]),
               params["m1"],
               col(params["b2"]), col(params["g2"]), col(params["be2"]),
               params["m2"],
               wmask)                                               # (B,T,F,HW)

    outputs = jnp.transpose(out.reshape(B, T, F, H, W), (0, 2, 1, 3, 4))
    h_last = out[:, T - 1].reshape(B, F, H, W)
    return outputs, h_last


# ------------------------- pure-JAX reference ------------------------------ #

def _group_norm_ref(y, groups, gamma, beta, eps=1e-5):
    Bn, Hn, Wn, C = y.shape
    cs = C // groups
    yg = y.reshape(Bn, Hn, Wn, groups, cs)
    n = Hn * Wn * cs
    s1 = jnp.sum(yg, axis=(1, 2, 4), keepdims=True)
    s2 = jnp.sum(yg * yg, axis=(1, 2, 4), keepdims=True)
    mean = s1 / n
    var = s2 / n - mean * mean
    yn = (yg - mean) * lax.rsqrt(var + eps)
    return yn.reshape(Bn, Hn, Wn, C) * gamma.reshape(1, 1, 1, C) \
        + beta.reshape(1, 1, 1, C)


def convgru_forward_ref(inputs, h0, params, K):
    B, Cin, T, H, W = inputs.shape
    F = h0.shape[1]
    P = (K - 1) // 2
    x_seq = jnp.transpose(inputs, (2, 0, 3, 4, 1))
    h = jnp.transpose(h0, (0, 2, 3, 1))
    w1 = jnp.concatenate([params["w1x"], params["w1h"]], axis=2)
    w2 = jnp.concatenate([params["w2x"], params["w2h"]], axis=2)
    dn = ("NHWC", "HWIO", "NHWC")
    G1 = (2 * F) // 16
    G2 = F // 16

    def conv(inp, w, b):
        y = lax.conv_general_dilated(inp, w, (1, 1), [(P, P), (P, P)],
                                     dimension_numbers=dn,
                                     precision=lax.Precision.HIGHEST)
        return y + b.reshape(1, 1, 1, -1)

    def step(hc, x):
        gates = _group_norm_ref(conv(jnp.concatenate([x, hc], -1), w1, params["b1"]),
                                G1, params["g1"], params["be1"])
        z = jax.nn.sigmoid(gates[..., :F])
        r = jax.nn.sigmoid(gates[..., F:])
        cand = _group_norm_ref(conv(jnp.concatenate([x, r * hc], -1), w2, params["b2"]),
                               G2, params["g2"], params["be2"])
        hy = (1.0 - z) * hc + z * jnp.tanh(cand)
        return hy, hy

    h_last, hs = lax.scan(step, h, x_seq)
    return jnp.transpose(hs, (1, 4, 0, 2, 3)), jnp.transpose(h_last, (0, 3, 1, 2))


def _group_mask(C, cs):
    gid = jnp.arange(C) // cs
    return (gid[:, None] == gid[None, :]).astype(jnp.float32)


if __name__ == "__main__":
    B, Cin, F, H, W, T, K = 2, 4, 32, 16, 16, 8, 3

    key = jax.random.PRNGKey(0)
    ks = jax.random.split(key, 12)
    s = 0.1
    params = {
        "w1x": s * jax.random.normal(ks[0], (K, K, Cin, 2 * F), jnp.float32),
        "w1h": s * jax.random.normal(ks[1], (K, K, F, 2 * F), jnp.float32),
        "b1":  s * jax.random.normal(ks[2], (1, 2 * F), jnp.float32),
        "g1":  1.0 + s * jax.random.normal(ks[3], (1, 2 * F), jnp.float32),
        "be1": s * jax.random.normal(ks[4], (1, 2 * F), jnp.float32),
        "m1":  _group_mask(2 * F, 16),      # GroupNorm(2F//16, 2F): 16 ch / group
        "w2x": s * jax.random.normal(ks[5], (K, K, Cin, F), jnp.float32),
        "w2h": s * jax.random.normal(ks[6], (K, K, F, F), jnp.float32),
        "b2":  s * jax.random.normal(ks[7], (1, F), jnp.float32),
        "g2":  1.0 + s * jax.random.normal(ks[8], (1, F), jnp.float32),
        "be2": s * jax.random.normal(ks[9], (1, F), jnp.float32),
        "m2":  _group_mask(F, 16),          # GroupNorm(F//16, F): 16 ch / group
    }

    inputs = jax.random.normal(ks[10], (B, Cin, T, H, W), jnp.float32)
    h0 = jax.random.normal(ks[11], (B, F, H, W), jnp.float32)

    fwd = jax.jit(lambda a, b: convgru_forward(a, b, params, K))
    out, h_last = fwd(inputs, h0)
    jax.block_until_ready((out, h_last))

    assert out.shape == (B, F, T, H, W) and h_last.shape == (B, F, H, W)

    out_ref, h_ref = convgru_forward_ref(inputs, h0, params, K)
    err_o = float(jnp.max(jnp.abs(out - out_ref)))
    err_h = float(jnp.max(jnp.abs(h_last - h_ref)))
    assert err_o < 5e-3 and err_h < 5e-3, (err_o, err_h)

    print("KERNEL_OK")
</pallas_src>

<mosaic_0001>
module attributes {stable_mosaic.version = 11 : i64} {
  func.func @_convgru_fused_kernel(%arg0: i32, %arg1: i32, %arg2: memref<1x1x4x256xf32, #tpu.memory_space<vmem>>, %arg3: memref<1x32x256xf32, #tpu.memory_space<vmem>>, %arg4: memref<96x36xf32, #tpu.memory_space<vmem>>, %arg5: memref<64x288xf32, #tpu.memory_space<vmem>>, %arg6: memref<32x288xf32, #tpu.memory_space<vmem>>, %arg7: memref<64x1xf32, #tpu.memory_space<vmem>>, %arg8: memref<64x1xf32, #tpu.memory_space<vmem>>, %arg9: memref<64x1xf32, #tpu.memory_space<vmem>>, %arg10: memref<64x64xf32, #tpu.memory_space<vmem>>, %arg11: memref<32x1xf32, #tpu.memory_space<vmem>>, %arg12: memref<32x1xf32, #tpu.memory_space<vmem>>, %arg13: memref<32x1xf32, #tpu.memory_space<vmem>>, %arg14: memref<32x32xf32, #tpu.memory_space<vmem>>, %arg15: memref<3x256xf32, #tpu.memory_space<vmem>>, %arg16: memref<1x1x32x256xf32, #tpu.memory_space<vmem>>, %arg17: memref<288x256xf32, #tpu.memory_space<vmem>>, %arg18: memref<32x256xf32, #tpu.memory_space<vmem>>) attributes {dimension_semantics = [#tpu.dimension_semantics<parallel>, #tpu.dimension_semantics<arbitrary>], iteration_bounds = array<i64: 2, 8>, scalar_prefetch = 0 : i64, scratch_operands = 2 : i64, tpu.core_type = #tpu.core_type<tc>, window_params = [{transform_indices = @transform_0, window_bounds = array<i64: 1, 1, 4, 256>}, {transform_indices = @transform_1, window_bounds = array<i64: 1, 32, 256>}, {pipeline_mode = #tpu.pipeline_mode<synchronous>, transform_indices = @transform_2, window_bounds = array<i64: 96, 36>}, {pipeline_mode = #tpu.pipeline_mode<synchronous>, transform_indices = @transform_3, window_bounds = array<i64: 64, 288>}, {pipeline_mode = #tpu.pipeline_mode<synchronous>, transform_indices = @transform_4, window_bounds = array<i64: 32, 288>}, {pipeline_mode = #tpu.pipeline_mode<synchronous>, transform_indices = @transform_5, window_bounds = array<i64: 64, 1>}, {pipeline_mode = #tpu.pipeline_mode<synchronous>, transform_indices = @transform_6, window_bounds = array<i64: 64, 1>}, {pipeline_mode = #tpu.pipeline_mode<synchronous>, transform_indices = @transform_7, window_bounds = array<i64: 64, 1>}, {pipeline_mode = #tpu.pipeline_mode<synchronous>, transform_indices = @transform_8, window_bounds = array<i64: 64, 64>}, {pipeline_mode = #tpu.pipeline_mode<synchronous>, transform_indices = @transform_9, window_bounds = array<i64: 32, 1>}, {pipeline_mode = #tpu.pipeline_mode<synchronous>, transform_indices = @transform_10, window_bounds = array<i64: 32, 1>}, {pipeline_mode = #tpu.pipeline_mode<synchronous>, transform_indices = @transform_11, window_bounds = array<i64: 32, 1>}, {pipeline_mode = #tpu.pipeline_mode<synchronous>, transform_indices = @transform_12, window_bounds = array<i64: 32, 32>}, {pipeline_mode = #tpu.pipeline_mode<synchronous>, transform_indices = @transform_13, window_bounds = array<i64: 3, 256>}, {transform_indices = @transform_14, window_bounds = array<i64: 1, 1, 32, 256>}]} {
    %c0_i32 = arith.constant 0 : i32
    %0 = arith.cmpi eq, %arg1, %c0_i32 : i32
    %1 = arith.extui %0 : i1 to i32
    %c0_i32_0 = arith.constant 0 : i32
    %2 = arith.cmpi ne, %1, %c0_i32_0 : i32
    scf.if %2 {
      %c0_127 = arith.constant 0 : index
      %c0_128 = arith.constant 0 : index
      %c0_129 = arith.constant 0 : index
      %209 = vector.load %arg3[%c0_127, %c0_128, %c0_129] : memref<1x32x256xf32, #tpu.memory_space<vmem>>, vector<1x32x256xf32>
      %210 = vector.shape_cast %209 : vector<1x32x256xf32> to vector<32x256xf32>
      %c0_130 = arith.constant 0 : index
      %c0_131 = arith.constant 0 : index
      %211 = vector.load %arg18[%c0_130, %c0_131] : memref<32x256xf32, #tpu.memory_space<vmem>>, vector<32x256xf32>
      tpu.vector_store %arg18[%c0_130, %c0_131], %210 {strides = array<i32>} : memref<32x256xf32, #tpu.memory_space<vmem>>, vector<32x256xf32>,
    } else {
    }
    %c0 = arith.constant 0 : index
    %c0_1 = arith.constant 0 : index
    %3 = vector.load %arg18[%c0, %c0_1] : memref<32x256xf32, #tpu.memory_space<vmem>>, vector<32x256xf32>
    %c0_2 = arith.constant 0 : index
    %c0_3 = arith.constant 0 : index
    %c0_4 = arith.constant 0 : index
    %c0_5 = arith.constant 0 : index
    %4 = vector.load %arg2[%c0_2, %c0_3, %c0_4, %c0_5] : memref<1x1x4x256xf32, #tpu.memory_space<vmem>>, vector<1x1x4x256xf32>
    %5 = vector.shape_cast %4 : vector<1x1x4x256xf32> to vector<4x256xf32>
    %cst = arith.constant 0.000000e+00 : f32
    %6 = vector.broadcast %cst : f32 to vector<4x17xf32>
    %7 = tpu.concatenate %6, %5, %6 in 1 : vector<4x17xf32>, vector<4x256xf32>, vector<4x17xf32> -> vector<4x290xf32>
    %8 = vector.extract_strided_slice %7 {offsets = [0, 0], sizes = [4, 256], strides = [1, 1]} : vector<4x290xf32> to vector<4x256xf32>
    %c0_6 = arith.constant 0 : index
    %c0_7 = arith.constant 0 : index
    %9 = vector.load %arg15[%c0_6, %c0_7] : memref<3x256xf32, #tpu.memory_space<vmem>>, vector<1x256xf32>
    %10 = vector.broadcast %9 : vector<1x256xf32> to vector<4x256xf32>
    %11 = arith.mulf %8, %10 : vector<4x256xf32>
    %12 = vector.extract_strided_slice %7 {offsets = [0, 1], sizes = [4, 256], strides = [1, 1]} : vector<4x290xf32> to vector<4x256xf32>
    %13 = vector.extract_strided_slice %7 {offsets = [0, 2], sizes = [4, 256], strides = [1, 1]} : vector<4x290xf32> to vector<4x256xf32>
    %c2 = arith.constant 2 : index
    %c0_8 = arith.constant 0 : index
    %14 = vector.load %arg15[%c2, %c0_8] : memref<3x256xf32, #tpu.memory_space<vmem>>, vector<1x256xf32>
    %15 = vector.broadcast %14 : vector<1x256xf32> to vector<4x256xf32>
    %16 = arith.mulf %13, %15 : vector<4x256xf32>
    %17 = vector.extract_strided_slice %7 {offsets = [0, 16], sizes = [4, 256], strides = [1, 1]} : vector<4x290xf32> to vector<4x256xf32>
    %c0_9 = arith.constant 0 : index
    %c0_10 = arith.constant 0 : index
    %18 = vector.load %arg15[%c0_9, %c0_10] : memref<3x256xf32, #tpu.memory_space<vmem>>, vector<1x256xf32>
    %19 = vector.broadcast %18 : vector<1x256xf32> to vector<4x256xf32>
    %20 = arith.mulf %17, %19 : vector<4x256xf32>
    %21 = vector.extract_strided_slice %7 {offsets = [0, 17], sizes = [4, 256], strides = [1, 1]} : vector<4x290xf32> to vector<4x256xf32>
    %22 = vector.extract_strided_slice %7 {offsets = [0, 18], sizes = [4, 256], strides = [1, 1]} : vector<4x290xf32> to vector<4x256xf32>
    %c2_11 = arith.constant 2 : index
    %c0_12 = arith.constant 0 : index
    %23 = vector.load %arg15[%c2_11, %c0_12] : memref<3x256xf32, #tpu.memory_space<vmem>>, vector<1x256xf32>
    %24 = vector.broadcast %23 : vector<1x256xf32> to vector<4x256xf32>
    %25 = arith.mulf %22, %24 : vector<4x256xf32>
    %26 = vector.extract_strided_slice %7 {offsets = [0, 32], sizes = [4, 256], strides = [1, 1]} : vector<4x290xf32> to vector<4x256xf32>
    %c0_13 = arith.constant 0 : index
    %c0_14 = arith.constant 0 : index
    %27 = vector.load %arg15[%c0_13, %c0_14] : memref<3x256xf32, #tpu.memory_space<vmem>>, vector<1x256xf32>
    %28 = vector.broadcast %27 : vector<1x256xf32> to vector<4x256xf32>
    %29 = arith.mulf %26, %28 : vector<4x256xf32>
    %30 = vector.extract_strided_slice %7 {offsets = [0, 33], sizes = [4, 256], strides = [1, 1]} : vector<4x290xf32> to vector<4x256xf32>
    %31 = vector.extract_strided_slice %7 {offsets = [0, 34], sizes = [4, 256], strides = [1, 1]} : vector<4x290xf32> to vector<4x256xf32>
    %c2_15 = arith.constant 2 : index
    %c0_16 = arith.constant 0 : index
    %32 = vector.load %arg15[%c2_15, %c0_16] : memref<3x256xf32, #tpu.memory_space<vmem>>, vector<1x256xf32>
    %33 = vector.broadcast %32 : vector<1x256xf32> to vector<4x256xf32>
    %34 = arith.mulf %31, %33 : vector<4x256xf32>
    %35 = tpu.concatenate %11, %12, %16, %20, %21, %25, %29, %30, %34 in 0 : vector<4x256xf32>, vector<4x256xf32>, vector<4x256xf32>, vector<4x256xf32>, vector<4x256xf32>, vector<4x256xf32>, vector<4x256xf32>, vector<4x256xf32>, vector<4x256xf32> -> vector<36x256xf32>
    %c0_17 = arith.constant 0 : index
    %c0_18 = arith.constant 0 : index
    %36 = vector.load %arg4[%c0_17, %c0_18] : memref<96x36xf32, #tpu.memory_space<vmem>>, vector<96x36xf32>
    %cst_19 = arith.constant dense<0.000000e+00> : vector<96x256xf32>
    %37 = tpu.matmul %36, %35, %cst_19 {dimension_numbers = #tpu.dot_dimension_numbers<[1], [0], [0], [1], [0, 0, 1, 1], [], []>} : vector<96x36xf32>, vector<36x256xf32>, vector<96x256xf32> -> vector<96x256xf32>
    %cst_20 = arith.constant 0.000000e+00 : f32
    %38 = vector.broadcast %cst_20 : f32 to vector<32x17xf32>
    %39 = tpu.concatenate %38, %3, %38 in 1 : vector<32x17xf32>, vector<32x256xf32>, vector<32x17xf32> -> vector<32x290xf32>
    %40 = vector.extract_strided_slice %39 {offsets = [0, 0], sizes = [32, 256], strides = [1, 1]} : vector<32x290xf32> to vector<32x256xf32>
    %c0_21 = arith.constant 0 : index
    %c0_22 = arith.constant 0 : index
    %41 = vector.load %arg15[%c0_21, %c0_22] : memref<3x256xf32, #tpu.memory_space<vmem>>, vector<1x256xf32>
    %42 = vector.broadcast %41 : vector<1x256xf32> to vector<32x256xf32>
    %43 = arith.mulf %40, %42 : vector<32x256xf32>
    %c0_23 = arith.constant 0 : index
    %c0_24 = arith.constant 0 : index
    %44 = vector.load %arg17[%c0_23, %c0_24] : memref<288x256xf32, #tpu.memory_space<vmem>>, vector<32x256xf32>
    tpu.vector_store %arg17[%c0_23, %c0_24], %43 {strides = array<i32>} : memref<288x256xf32, #tpu.memory_space<vmem>>, vector<32x256xf32>,
    %45 = vector.extract_strided_slice %39 {offsets = [0, 1], sizes = [32, 256], strides = [1, 1]} : vector<32x290xf32> to vector<32x256xf32>
    %c32 = arith.constant 32 : index
    %c0_25 = arith.constant 0 : index
    %46 = vector.load %arg17[%c32, %c0_25] : memref<288x256xf32, #tpu.memory_space<vmem>>, vector<32x256xf32>
    tpu.vector_store %arg17[%c32, %c0_25], %45 {strides = array<i32>} : memref<288x256xf32, #tpu.memory_space<vmem>>, vector<32x256xf32>,
    %47 = vector.extract_strided_slice %39 {offsets = [0, 2], sizes = [32, 256], strides = [1, 1]} : vector<32x290xf32> to vector<32x256xf32>
    %c2_26 = arith.constant 2 : index
    %c0_27 = arith.constant 0 : index
    %48 = vector.load %arg15[%c2_26, %c0_27] : memref<3x256xf32, #tpu.memory_space<vmem>>, vector<1x256xf32>
    %49 = vector.broadcast %48 : vector<1x256xf32> to vector<32x256xf32>
    %50 = arith.mulf %47, %49 : vector<32x256xf32>
    %c64 = arith.constant 64 : index
    %c0_28 = arith.constant 0 : index
    %51 = vector.load %arg17[%c64, %c0_28] : memref<288x256xf32, #tpu.memory_space<vmem>>, vector<32x256xf32>
    tpu.vector_store %arg17[%c64, %c0_28], %50 {strides = array<i32>} : memref<288x256xf32, #tpu.memory_space<vmem>>, vector<32x256xf32>,
    %52 = vector.extract_strided_slice %39 {offsets = [0, 16], sizes = [32, 256], strides = [1, 1]} : vector<32x290xf32> to vector<32x256xf32>
    %c0_29 = arith.constant 0 : index
    %c0_30 = arith.constant 0 : index
    %53 = vector.load %arg15[%c0_29, %c0_30] : memref<3x256xf32, #tpu.memory_space<vmem>>, vector<1x256xf32>
    %54 = vector.broadcast %53 : vector<1x256xf32> to vector<32x256xf32>
    %55 = arith.mulf %52, %54 : vector<32x256xf32>
    %c96 = arith.constant 96 : index
    %c0_31 = arith.constant 0 : index
    %56 = vector.load %arg17[%c96, %c0_31] : memref<288x256xf32, #tpu.memory_space<vmem>>, vector<32x256xf32>
    tpu.vector_store %arg17[%c96, %c0_31], %55 {strides = array<i32>} : memref<288x256xf32, #tpu.memory_space<vmem>>, vector<32x256xf32>,
    %57 = vector.extract_strided_slice %39 {offsets = [0, 17], sizes = [32, 256], strides = [1, 1]} : vector<32x290xf32> to vector<32x256xf32>
    %c128 = arith.constant 128 : index
    %c0_32 = arith.constant 0 : index
    %58 = vector.load %arg17[%c128, %c0_32] : memref<288x256xf32, #tpu.memory_space<vmem>>, vector<32x256xf32>
    tpu.vector_store %arg17[%c128, %c0_32], %57 {strides = array<i32>} : memref<288x256xf32, #tpu.memory_space<vmem>>, vector<32x256xf32>,
    %59 = vector.extract_strided_slice %39 {offsets = [0, 18], sizes = [32, 256], strides = [1, 1]} : vector<32x290xf32> to vector<32x256xf32>
    %c2_33 = arith.constant 2 : index
    %c0_34 = arith.constant 0 : index
    %60 = vector.load %arg15[%c2_33, %c0_34] : memref<3x256xf32, #tpu.memory_space<vmem>>, vector<1x256xf32>
    %61 = vector.broadcast %60 : vector<1x256xf32> to vector<32x256xf32>
    %62 = arith.mulf %59, %61 : vector<32x256xf32>
    %c160 = arith.constant 160 : index
    %c0_35 = arith.constant 0 : index
    %63 = vector.load %arg17[%c160, %c0_35] : memref<288x256xf32, #tpu.memory_space<vmem>>, vector<32x256xf32>
    tpu.vector_store %arg17[%c160, %c0_35], %62 {strides = array<i32>} : memref<288x256xf32, #tpu.memory_space<vmem>>, vector<32x256xf32>,
    %64 = vector.extract_strided_slice %39 {offsets = [0, 32], sizes = [32, 256], strides = [1, 1]} : vector<32x290xf32> to vector<32x256xf32>
    %c0_36 = arith.constant 0 : index
    %c0_37 = arith.constant 0 : index
    %65 = vector.load %arg15[%c0_36, %c0_37] : memref<3x256xf32, #tpu.memory_space<vmem>>, vector<1x256xf32>
    %66 = vector.broadcast %65 : vector<1x256xf32> to vector<32x256xf32>
    %67 = arith.mulf %64, %66 : vector<32x256xf32>
    %c192 = arith.constant 192 : index
    %c0_38 = arith.constant 0 : index
    %68 = vector.load %arg17[%c192, %c0_38] : memref<288x256xf32, #tpu.memory_space<vmem>>, vector<32x256xf32>
    tpu.vector_store %arg17[%c192, %c0_38], %67 {strides = array<i32>} : memref<288x256xf32, #tpu.memory_space<vmem>>, vector<32x256xf32>,
    %69 = vector.extract_strided_slice %39 {offsets = [0, 33], sizes = [32, 256], strides = [1, 1]} : vector<32x290xf32> to vector<32x256xf32>
    %c224 = arith.constant 224 : index
    %c0_39 = arith.constant 0 : index
    %70 = vector.load %arg17[%c224, %c0_39] : memref<288x256xf32, #tpu.memory_space<vmem>>, vector<32x256xf32>
    tpu.vector_store %arg17[%c224, %c0_39], %69 {strides = array<i32>} : memref<288x256xf32, #tpu.memory_space<vmem>>, vector<32x256xf32>,
    %71 = vector.extract_strided_slice %39 {offsets = [0, 34], sizes = [32, 256], strides = [1, 1]} : vector<32x290xf32> to vector<32x256xf32>
    %c2_40 = arith.constant 2 : index
    %c0_41 = arith.constant 0 : index
    %72 = vector.load %arg15[%c2_40, %c0_41] : memref<3x256xf32, #tpu.memory_space<vmem>>, vector<1x256xf32>
    %73 = vector.broadcast %72 : vector<1x256xf32> to vector<32x256xf32>
    %74 = arith.mulf %71, %73 : vector<32x256xf32>
    %c256 = arith.constant 256 : index
    %c0_42 = arith.constant 0 : index
    %75 = vector.load %arg17[%c256, %c0_42] : memref<288x256xf32, #tpu.memory_space<vmem>>, vector<32x256xf32>
    tpu.vector_store %arg17[%c256, %c0_42], %74 {strides = array<i32>} : memref<288x256xf32, #tpu.memory_space<vmem>>, vector<32x256xf32>,
    %76 = vector.extract_strided_slice %37 {offsets = [0, 0], sizes = [64, 256], strides = [1, 1]} : vector<96x256xf32> to vector<64x256xf32>
    %c0_43 = arith.constant 0 : index
    %c0_44 = arith.constant 0 : index
    %77 = vector.load %arg5[%c0_43, %c0_44] : memref<64x288xf32, #tpu.memory_space<vmem>>, vector<64x288xf32>
    %c0_45 = arith.constant 0 : index
    %c0_46 = arith.constant 0 : index
    %78 = vector.load %arg17[%c0_45, %c0_46] : memref<288x256xf32, #tpu.memory_space<vmem>>, vector<288x256xf32>
    %cst_47 = arith.constant dense<0.000000e+00> : vector<64x256xf32>
    %79 = tpu.matmul %77, %78, %cst_47 {dimension_numbers = #tpu.dot_dimension_numbers<[1], [0], [0], [1], [0, 0, 1, 1], [], []>} : vector<64x288xf32>, vector<288x256xf32>, vector<64x256xf32> -> vector<64x256xf32>
    %80 = arith.addf %76, %79 : vector<64x256xf32>
    %c0_48 = arith.constant 0 : index
    %c0_49 = arith.constant 0 : index
    %81 = vector.load %arg7[%c0_48, %c0_49] : memref<64x1xf32, #tpu.memory_space<vmem>>, vector<64x1xf32>
    %82 = vector.broadcast %81 : vector<64x1xf32> to vector<64x256xf32>
    %83 = arith.addf %80, %82 : vector<64x256xf32>
    %c0_50 = arith.constant 0 : index
    %c0_51 = arith.constant 0 : index
    %84 = vector.load %arg10[%c0_50, %c0_51] : memref<64x64xf32, #tpu.memory_space<vmem>>, vector<64x64xf32>
    %cst_52 = arith.constant dense<0.000000e+00> : vector<64x256xf32>
    %85 = tpu.matmul %84, %83, %cst_52 {dimension_numbers = #tpu.dot_dimension_numbers<[1], [0], [0], [1], [0, 0, 1, 1], [], []>} : vector<64x64xf32>, vector<64x256xf32>, vector<64x256xf32> -> vector<64x256xf32>
    %c0_53 = arith.constant 0 : index
    %c0_54 = arith.constant 0 : index
    %86 = vector.load %arg10[%c0_53, %c0_54] : memref<64x64xf32, #tpu.memory_space<vmem>>, vector<64x64xf32>
    %87 = arith.mulf %83, %83 : vector<64x256xf32>
    %cst_55 = arith.constant dense<0.000000e+00> : vector<64x256xf32>
    %88 = tpu.matmul %86, %87, %cst_55 {dimension_numbers = #tpu.dot_dimension_numbers<[1], [0], [0], [1], [0, 0, 1, 1], [], []>} : vector<64x64xf32>, vector<64x256xf32>, vector<64x256xf32> -> vector<64x256xf32>
    %cst_56 = arith.constant dense<0.000000e+00> : vector<64xf32>
    %89 = vector.multi_reduction <add>, %85, %cst_56 [1] : vector<64x256xf32> to vector<64xf32>
    %90 = vector.shape_cast %89 : vector<64xf32> to vector<64x1xf32>
    %cst_57 = arith.constant 4.096000e+03 : f32
    %91 = vector.broadcast %cst_57 : f32 to vector<64x1xf32>
    %92 = arith.divf %90, %91 : vector<64x1xf32>
    %cst_58 = arith.constant dense<0.000000e+00> : vector<64xf32>
    %93 = vector.multi_reduction <add>, %88, %cst_58 [1] : vector<64x256xf32> to vector<64xf32>
    %94 = vector.shape_cast %93 : vector<64xf32> to vector<64x1xf32>
    %cst_59 = arith.constant 4.096000e+03 : f32
    %95 = vector.broadcast %cst_59 : f32 to vector<64x1xf32>
    %96 = arith.divf %94, %95 : vector<64x1xf32>
    %97 = arith.mulf %92, %92 : vector<64x1xf32>
    %98 = arith.subf %96, %97 : vector<64x1xf32>
    %cst_60 = arith.constant 9.99999974E-6 : f32
    %99 = vector.broadcast %cst_60 : f32 to vector<64x1xf32>
    %100 = arith.addf %98, %99 : vector<64x1xf32>
    %101 = math.rsqrt %100 : vector<64x1xf32>
    %102 = vector.broadcast %92 : vector<64x1xf32> to vector<64x256xf32>
    %103 = arith.subf %83, %102 : vector<64x256xf32>
    %104 = vector.broadcast %101 : vector<64x1xf32> to vector<64x256xf32>
    %105 = arith.mulf %103, %104 : vector<64x256xf32>
    %c0_61 = arith.constant 0 : index
    %c0_62 = arith.constant 0 : index
    %106 = vector.load %arg8[%c0_61, %c0_62] : memref<64x1xf32, #tpu.memory_space<vmem>>, vector<64x1xf32>
    %107 = vector.broadcast %106 : vector<64x1xf32> to vector<64x256xf32>
    %108 = arith.mulf %105, %107 : vector<64x256xf32>
    %c0_63 = arith.constant 0 : index
    %c0_64 = arith.constant 0 : index
    %109 = vector.load %arg9[%c0_63, %c0_64] : memref<64x1xf32, #tpu.memory_space<vmem>>, vector<64x1xf32>
    %110 = vector.broadcast %109 : vector<64x1xf32> to vector<64x256xf32>
    %111 = arith.addf %108, %110 : vector<64x256xf32>
    %112 = vector.extract_strided_slice %111 {offsets = [0, 0], sizes = [32, 256], strides = [1, 1]} : vector<64x256xf32> to vector<32x256xf32>
    %113 = arith.negf %112 : vector<32x256xf32>
    %114 = math.exp %113 : vector<32x256xf32>
    %cst_65 = arith.constant 1.000000e+00 : f32
    %115 = vector.broadcast %cst_65 : f32 to vector<32x256xf32>
    %116 = arith.addf %115, %114 : vector<32x256xf32>
    %117 = arith.divf %115, %116 : vector<32x256xf32>
    %118 = vector.extract_strided_slice %111 {offsets = [32, 0], sizes = [32, 256], strides = [1, 1]} : vector<64x256xf32> to vector<32x256xf32>
    %119 = arith.negf %118 : vector<32x256xf32>
    %120 = math.exp %119 : vector<32x256xf32>
    %cst_66 = arith.constant 1.000000e+00 : f32
    %121 = vector.broadcast %cst_66 : f32 to vector<32x256xf32>
    %122 = arith.addf %121, %120 : vector<32x256xf32>
    %123 = arith.divf %121, %122 : vector<32x256xf32>
    %124 = arith.mulf %123, %3 : vector<32x256xf32>
    %cst_67 = arith.constant 0.000000e+00 : f32
    %125 = vector.broadcast %cst_67 : f32 to vector<32x17xf32>
    %126 = tpu.concatenate %125, %124, %125 in 1 : vector<32x17xf32>, vector<32x256xf32>, vector<32x17xf32> -> vector<32x290xf32>
    %127 = vector.extract_strided_slice %126 {offsets = [0, 0], sizes = [32, 256], strides = [1, 1]} : vector<32x290xf32> to vector<32x256xf32>
    %c0_68 = arith.constant 0 : index
    %c0_69 = arith.constant 0 : index
    %128 = vector.load %arg15[%c0_68, %c0_69] : memref<3x256xf32, #tpu.memory_space<vmem>>, vector<1x256xf32>
    %129 = vector.broadcast %128 : vector<1x256xf32> to vector<32x256xf32>
    %130 = arith.mulf %127, %129 : vector<32x256xf32>
    %c0_70 = arith.constant 0 : index
    %c0_71 = arith.constant 0 : index
    %131 = vector.load %arg17[%c0_70, %c0_71] : memref<288x256xf32, #tpu.memory_space<vmem>>, vector<32x256xf32>
    tpu.vector_store %arg17[%c0_70, %c0_71], %130 {strides = array<i32>} : memref<288x256xf32, #tpu.memory_space<vmem>>, vector<32x256xf32>,
    %132 = vector.extract_strided_slice %126 {offsets = [0, 1], sizes = [32, 256], strides = [1, 1]} : vector<32x290xf32> to vector<32x256xf32>
    %c32_72 = arith.constant 32 : index
    %c0_73 = arith.constant 0 : index
    %133 = vector.load %arg17[%c32_72, %c0_73] : memref<288x256xf32, #tpu.memory_space<vmem>>, vector<32x256xf32>
    tpu.vector_store %arg17[%c32_72, %c0_73], %132 {strides = array<i32>} : memref<288x256xf32, #tpu.memory_space<vmem>>, vector<32x256xf32>,
    %134 = vector.extract_strided_slice %126 {offsets = [0, 2], sizes = [32, 256], strides = [1, 1]} : vector<32x290xf32> to vector<32x256xf32>
    %c2_74 = arith.constant 2 : index
    %c0_75 = arith.constant 0 : index
    %135 = vector.load %arg15[%c2_74, %c0_75] : memref<3x256xf32, #tpu.memory_space<vmem>>, vector<1x256xf32>
    %136 = vector.broadcast %135 : vector<1x256xf32> to vector<32x256xf32>
    %137 = arith.mulf %134, %136 : vector<32x256xf32>
    %c64_76 = arith.constant 64 : index
    %c0_77 = arith.constant 0 : index
    %138 = vector.load %arg17[%c64_76, %c0_77] : memref<288x256xf32, #tpu.memory_space<vmem>>, vector<32x256xf32>
    tpu.vector_store %arg17[%c64_76, %c0_77], %137 {strides = array<i32>} : memref<288x256xf32, #tpu.memory_space<vmem>>, vector<32x256xf32>,
    %139 = vector.extract_strided_slice %126 {offsets = [0, 16], sizes = [32, 256], strides = [1, 1]} : vector<32x290xf32> to vector<32x256xf32>
    %c0_78 = arith.constant 0 : index
    %c0_79 = arith.constant 0 : index
    %140 = vector.load %arg15[%c0_78, %c0_79] : memref<3x256xf32, #tpu.memory_space<vmem>>, vector<1x256xf32>
    %141 = vector.broadcast %140 : vector<1x256xf32> to vector<32x256xf32>
    %142 = arith.mulf %139, %141 : vector<32x256xf32>
    %c96_80 = arith.constant 96 : index
    %c0_81 = arith.constant 0 : index
    %143 = vector.load %arg17[%c96_80, %c0_81] : memref<288x256xf32, #tpu.memory_space<vmem>>, vector<32x256xf32>
    tpu.vector_store %arg17[%c96_80, %c0_81], %142 {strides = array<i32>} : memref<288x256xf32, #tpu.memory_space<vmem>>, vector<32x256xf32>,
    %144 = vector.extract_strided_slice %126 {offsets = [0, 17], sizes = [32, 256], strides = [1, 1]} : vector<32x290xf32> to vector<32x256xf32>
    %c128_82 = arith.constant 128 : index
    %c0_83 = arith.constant 0 : index
    %145 = vector.load %arg17[%c128_82, %c0_83] : memref<288x256xf32, #tpu.memory_space<vmem>>, vector<32x256xf32>
    tpu.vector_store %arg17[%c128_82, %c0_83], %144 {strides = array<i32>} : memref<288x256xf32, #tpu.memory_space<vmem>>, vector<32x256xf32>,
    %146 = vector.extract_strided_slice %126 {offsets = [0, 18], sizes = [32, 256], strides = [1, 1]} : vector<32x290xf32> to vector<32x256xf32>
    %c2_84 = arith.constant 2 : index
    %c0_85 = arith.constant 0 : index
    %147 = vector.load %arg15[%c2_84, %c0_85] : memref<3x256xf32, #tpu.memory_space<vmem>>, vector<1x256xf32>
    %148 = vector.broadcast %147 : vector<1x256xf32> to vector<32x256xf32>
    %149 = arith.mulf %146, %148 : vector<32x256xf32>
    %c160_86 = arith.constant 160 : index
    %c0_87 = arith.constant 0 : index
    %150 = vector.load %arg17[%c160_86, %c0_87] : memref<288x256xf32, #tpu.memory_space<vmem>>, vector<32x256xf32>
    tpu.vector_store %arg17[%c160_86, %c0_87], %149 {strides = array<i32>} : memref<288x256xf32, #tpu.memory_space<vmem>>, vector<32x256xf32>,
    %151 = vector.extract_strided_slice %126 {offsets = [0, 32], sizes = [32, 256], strides = [1, 1]} : vector<32x290xf32> to vector<32x256xf32>
    %c0_88 = arith.constant 0 : index
    %c0_89 = arith.constant 0 : index
    %152 = vector.load %arg15[%c0_88, %c0_89] : memref<3x256xf32, #tpu.memory_space<vmem>>, vector<1x256xf32>
    %153 = vector.broadcast %152 : vector<1x256xf32> to vector<32x256xf32>
    %154 = arith.mulf %151, %153 : vector<32x256xf32>
    %c192_90 = arith.constant 192 : index
    %c0_91 = arith.constant 0 : index
    %155 = vector.load %arg17[%c192_90, %c0_91] : memref<288x256xf32, #tpu.memory_space<vmem>>, vector<32x256xf32>
    tpu.vector_store %arg17[%c192_90, %c0_91], %154 {strides = array<i32>} : memref<288x256xf32, #tpu.memory_space<vmem>>, vector<32x256xf32>,
    %156 = vector.extract_strided_slice %126 {offsets = [0, 33], sizes = [32, 256], strides = [1, 1]} : vector<32x290xf32> to vector<32x256xf32>
    %c224_92 = arith.constant 224 : index
    %c0_93 = arith.constant 0 : index
    %157 = vector.load %arg17[%c224_92, %c0_93] : memref<288x256xf32, #tpu.memory_space<vmem>>, vector<32x256xf32>
    tpu.vector_store %arg17[%c224_92, %c0_93], %156 {strides = array<i32>} : memref<288x256xf32, #tpu.memory_space<vmem>>, vector<32x256xf32>,
    %158 = vector.extract_strided_slice %126 {offsets = [0, 34], sizes = [32, 256], strides = [1, 1]} : vector<32x290xf32> to vector<32x256xf32>
    %c2_94 = arith.constant 2 : index
    %c0_95 = arith.constant 0 : index
    %159 = vector.load %arg15[%c2_94, %c0_95] : memref<3x256xf32, #tpu.memory_space<vmem>>, vector<1x256xf32>
    %160 = vector.broadcast %159 : vector<1x256xf32> to vector<32x256xf32>
    %161 = arith.mulf %158, %160 : vector<32x256xf32>
    %c256_96 = arith.constant 256 : index
    %c0_97 = arith.constant 0 : index
    %162 = vector.load %arg17[%c256_96, %c0_97] : memref<288x256xf32, #tpu.memory_space<vmem>>, vector<32x256xf32>
    tpu.vector_store %arg17[%c256_96, %c0_97], %161 {strides = array<i32>} : memref<288x256xf32, #tpu.memory_space<vmem>>, vector<32x256xf32>,
    %163 = vector.extract_strided_slice %37 {offsets = [64, 0], sizes = [32, 256], strides = [1, 1]} : vector<96x256xf32> to vector<32x256xf32>
    %c0_98 = arith.constant 0 : index
    %c0_99 = arith.constant 0 : index
    %164 = vector.load %arg6[%c0_98, %c0_99] : memref<32x288xf32, #tpu.memory_space<vmem>>, vector<32x288xf32>
    %c0_100 = arith.constant 0 : index
    %c0_101 = arith.constant 0 : index
    %165 = vector.load %arg17[%c0_100, %c0_101] : memref<288x256xf32, #tpu.memory_space<vmem>>, vector<288x256xf32>
    %cst_102 = arith.constant dense<0.000000e+00> : vector<32x256xf32>
    %166 = tpu.matmul %164, %165, %cst_102 {dimension_numbers = #tpu.dot_dimension_numbers<[1], [0], [0], [1], [0, 0, 1, 1], [], []>} : vector<32x288xf32>, vector<288x256xf32>, vector<32x256xf32> -> vector<32x256xf32>
    %167 = arith.addf %163, %166 : vector<32x256xf32>
    %c0_103 = arith.constant 0 : index
    %c0_104 = arith.constant 0 : index
    %168 = vector.load %arg11[%c0_103, %c0_104] : memref<32x1xf32, #tpu.memory_space<vmem>>, vector<32x1xf32>
    %169 = vector.broadcast %168 : vector<32x1xf32> to vector<32x256xf32>
    %170 = arith.addf %167, %169 : vector<32x256xf32>
    %c0_105 = arith.constant 0 : index
    %c0_106 = arith.constant 0 : index
    %171 = vector.load %arg14[%c0_105, %c0_106] : memref<32x32xf32, #tpu.memory_space<vmem>>, vector<32x32xf32>
    %cst_107 = arith.constant dense<0.000000e+00> : vector<32x256xf32>
    %172 = tpu.matmul %171, %170, %cst_107 {dimension_numbers = #tpu.dot_dimension_numbers<[1], [0], [0], [1], [0, 0, 1, 1], [], []>} : vector<32x32xf32>, vector<32x256xf32>, vector<32x256xf32> -> vector<32x256xf32>
    %c0_108 = arith.constant 0 : index
    %c0_109 = arith.constant 0 : index
    %173 = vector.load %arg14[%c0_108, %c0_109] : memref<32x32xf32, #tpu.memory_space<vmem>>, vector<32x32xf32>
    %174 = arith.mulf %170, %170 : vector<32x256xf32>
    %cst_110 = arith.constant dense<0.000000e+00> : vector<32x256xf32>
    %175 = tpu.matmul %173, %174, %cst_110 {dimension_numbers = #tpu.dot_dimension_numbers<[1], [0], [0], [1], [0, 0, 1, 1], [], []>} : vector<32x32xf32>, vector<32x256xf32>, vector<32x256xf32> -> vector<32x256xf32>
    %cst_111 = arith.constant dense<0.000000e+00> : vector<32xf32>
    %176 = vector.multi_reduction <add>, %172, %cst_111 [1] : vector<32x256xf32> to vector<32xf32>
    %177 = vector.shape_cast %176 : vector<32xf32> to vector<32x1xf32>
    %cst_112 = arith.constant 4.096000e+03 : f32
    %178 = vector.broadcast %cst_112 : f32 to vector<32x1xf32>
    %179 = arith.divf %177, %178 : vector<32x1xf32>
    %cst_113 = arith.constant dense<0.000000e+00> : vector<32xf32>
    %180 = vector.multi_reduction <add>, %175, %cst_113 [1] : vector<32x256xf32> to vector<32xf32>
    %181 = vector.shape_cast %180 : vector<32xf32> to vector<32x1xf32>
    %cst_114 = arith.constant 4.096000e+03 : f32
    %182 = vector.broadcast %cst_114 : f32 to vector<32x1xf32>
    %183 = arith.divf %181, %182 : vector<32x1xf32>
    %184 = arith.mulf %179, %179 : vector<32x1xf32>
    %185 = arith.subf %183, %184 : vector<32x1xf32>
    %cst_115 = arith.constant 9.99999974E-6 : f32
    %186 = vector.broadcast %cst_115 : f32 to vector<32x1xf32>
    %187 = arith.addf %185, %186 : vector<32x1xf32>
    %188 = math.rsqrt %187 : vector<32x1xf32>
    %189 = vector.broadcast %179 : vector<32x1xf32> to vector<32x256xf32>
    %190 = arith.subf %170, %189 : vector<32x256xf32>
    %191 = vector.broadcast %188 : vector<32x1xf32> to vector<32x256xf32>
    %192 = arith.mulf %190, %191 : vector<32x256xf32>
    %c0_116 = arith.constant 0 : index
    %c0_117 = arith.constant 0 : index
    %193 = vector.load %arg12[%c0_116, %c0_117] : memref<32x1xf32, #tpu.memory_space<vmem>>, vector<32x1xf32>
    %194 = vector.broadcast %193 : vector<32x1xf32> to vector<32x256xf32>
    %195 = arith.mulf %192, %194 : vector<32x256xf32>
    %c0_118 = arith.constant 0 : index
    %c0_119 = arith.constant 0 : index
    %196 = vector.load %arg13[%c0_118, %c0_119] : memref<32x1xf32, #tpu.memory_space<vmem>>, vector<32x1xf32>
    %197 = vector.broadcast %196 : vector<32x1xf32> to vector<32x256xf32>
    %198 = arith.addf %195, %197 : vector<32x256xf32>
    %199 = math.tanh %198 : vector<32x256xf32>
    %cst_120 = arith.constant 1.000000e+00 : f32
    %200 = vector.broadcast %cst_120 : f32 to vector<32x256xf32>
    %201 = arith.subf %200, %117 : vector<32x256xf32>
    %202 = arith.mulf %201, %3 : vector<32x256xf32>
    %203 = arith.mulf %117, %199 : vector<32x256xf32>
    %204 = arith.addf %202, %203 : vector<32x256xf32>
    %c0_121 = arith.constant 0 : index
    %c0_122 = arith.constant 0 : index
    %205 = vector.load %arg18[%c0_121, %c0_122] : memref<32x256xf32, #tpu.memory_space<vmem>>, vector<32x256xf32>
    tpu.vector_store %arg18[%c0_121, %c0_122], %204 {strides = array<i32>} : memref<32x256xf32, #tpu.memory_space<vmem>>, vector<32x256xf32>,
    %c0_123 = arith.constant 0 : index
    %c0_124 = arith.constant 0 : index
    %c0_125 = arith.constant 0 : index
    %c0_126 = arith.constant 0 : index
    %206 = vector.load %arg16[%c0_123, %c0_124, %c0_125, %c0_126] : memref<1x1x32x256xf32, #tpu.memory_space<vmem>>, vector<1x1x32x256xf32>
    %207 = vector.shape_cast %206 : vector<1x1x32x256xf32> to vector<32x256xf32>
    %208 = vector.shape_cast %204 : vector<32x256xf32> to vector<1x1x32x256xf32>
    tpu.vector_store %arg16[%c0_123, %c0_124, %c0_125, %c0_126], %208 {strides = array<i32>} : memref<1x1x32x256xf32, #tpu.memory_space<vmem>>, vector<1x1x32x256xf32>,
    return
  }
  func.func @transform_0(%arg0: i32, %arg1: i32) -> (i32, i32, i32, i32) {
    %c0_i32 = arith.constant 0 : i32
    %c0_i32_0 = arith.constant 0 : i32
    %c0_i32_1 = arith.constant 0 : i32
    return %arg0, %arg1, %c0_i32, %c0_i32_0 : i32, i32, i32, i32
  }
  func.func @transform_1(%arg0: i32, %arg1: i32) -> (i32, i32, i32) {
    %c0_i32 = arith.constant 0 : i32
    %c0_i32_0 = arith.constant 0 : i32
    %c0_i32_1 = arith.constant 0 : i32
    return %arg0, %c0_i32, %c0_i32_0 : i32, i32, i32
  }
  func.func @transform_2(%arg0: i32, %arg1: i32) -> (i32, i32) {
    %c0_i32 = arith.constant 0 : i32
    %c0_i32_0 = arith.constant 0 : i32
    %c0_i32_1 = arith.constant 0 : i32
    return %c0_i32, %c0_i32_0 : i32, i32
  }
  func.func @transform_3(%arg0: i32, %arg1: i32) -> (i32, i32) {
    %c0_i32 = arith.constant 0 : i32
    %c0_i32_0 = arith.constant 0 : i32
    %c0_i32_1 = arith.constant 0 : i32
    return %c0_i32, %c0_i32_0 : i32, i32
  }
  func.func @transform_4(%arg0: i32, %arg1: i32) -> (i32, i32) {
    %c0_i32 = arith.constant 0 : i32
    %c0_i32_0 = arith.constant 0 : i32
    %c0_i32_1 = arith.constant 0 : i32
    return %c0_i32, %c0_i32_0 : i32, i32
  }
  func.func @transform_5(%arg0: i32, %arg1: i32) -> (i32, i32) {
    %c0_i32 = arith.constant 0 : i32
    %c0_i32_0 = arith.constant 0 : i32
    %c0_i32_1 = arith.constant 0 : i32
    return %c0_i32, %c0_i32_0 : i32, i32
  }
  func.func @transform_6(%arg0: i32, %arg1: i32) -> (i32, i32) {
    %c0_i32 = arith.constant 0 : i32
    %c0_i32_0 = arith.constant 0 : i32
    %c0_i32_1 = arith.constant 0 : i32
    return %c0_i32, %c0_i32_0 : i32, i32
  }
  func.func @transform_7(%arg0: i32, %arg1: i32) -> (i32, i32) {
    %c0_i32 = arith.constant 0 : i32
    %c0_i32_0 = arith.constant 0 : i32
    %c0_i32_1 = arith.constant 0 : i32
    return %c0_i32, %c0_i32_0 : i32, i32
  }
  func.func @transform_8(%arg0: i32, %arg1: i32) -> (i32, i32) {
    %c0_i32 = arith.constant 0 : i32
    %c0_i32_0 = arith.constant 0 : i32
    %c0_i32_1 = arith.constant 0 : i32
    return %c0_i32, %c0_i32_0 : i32, i32
  }
  func.func @transform_9(%arg0: i32, %arg1: i32) -> (i32, i32) {
    %c0_i32 = arith.constant 0 : i32
    %c0_i32_0 = arith.constant 0 : i32
    %c0_i32_1 = arith.constant 0 : i32
    return %c0_i32, %c0_i32_0 : i32, i32
  }
  func.func @transform_10(%arg0: i32, %arg1: i32) -> (i32, i32) {
    %c0_i32 = arith.constant 0 : i32
    %c0_i32_0 = arith.constant 0 : i32
    %c0_i32_1 = arith.constant 0 : i32
    return %c0_i32, %c0_i32_0 : i32, i32
  }
  func.func @transform_11(%arg0: i32, %arg1: i32) -> (i32, i32) {
    %c0_i32 = arith.constant 0 : i32
    %c0_i32_0 = arith.constant 0 : i32
    %c0_i32_1 = arith.constant 0 : i32
    return %c0_i32, %c0_i32_0 : i32, i32
  }
  func.func @transform_12(%arg0: i32, %arg1: i32) -> (i32, i32) {
    %c0_i32 = arith.constant 0 : i32
    %c0_i32_0 = arith.constant 0 : i32
    %c0_i32_1 = arith.constant 0 : i32
    return %c0_i32, %c0_i32_0 : i32, i32
  }
  func.func @transform_13(%arg0: i32, %arg1: i32) -> (i32, i32) {
    %c0_i32 = arith.constant 0 : i32
    %c0_i32_0 = arith.constant 0 : i32
    %c0_i32_1 = arith.constant 0 : i32
    return %c0_i32, %c0_i32_0 : i32, i32
  }
  func.func @transform_14(%arg0: i32, %arg1: i32) -> (i32, i32, i32, i32) {
    %c0_i32 = arith.constant 0 : i32
    %c0_i32_0 = arith.constant 0 : i32
    %c0_i32_1 = arith.constant 0 : i32
    return %arg0, %arg1, %c0_i32, %c0_i32_0 : i32, i32, i32, i32
  }
}

</mosaic_0001>

<bundles_post_ra>
// kernel: _lambda_.1
= control target key start
LH: loop header
LB: loop body
LE: loop exit
PB: predicated region body
PF: predicated region fallthrough
CT: control target
= control target key end

     0   :  { %s7286_s0 = inlined_call_operand.vmem [shape: f32[2,8,4,256], index: 0, kind: input, shape index: {}]   ;;  %s7287_s1 = inlined_call_operand.vmem [shape: f32[2,32,256], index: 1, kind: input, shape index: {}]   ;;  %s7288_s2 = inlined_call_operand.hbm [shape: f32[96,36], index: 2, kind: input, shape index: {}]   ;;  %s7289_s3 = inlined_call_operand.hbm [shape: f32[64,288], index: 3, kind: input, shape index: {}]   ;;  %s7290_s4 = inlined_call_operand.hbm [shape: f32[32,288], index: 4, kind: input, shape index: {}]   ;;  %s7291_s5 = inlined_call_operand.hbm [shape: f32[64,1], index: 5, kind: input, shape index: {}]   ;;  %s7292_s6 = inlined_call_operand.hbm [shape: f32[64,1], index: 6, kind: input, shape index: {}]   ;;  %s7293_s7 = inlined_call_operand.hbm [shape: f32[64,1], index: 7, kind: input, shape index: {}]   ;;  %s7294_s8 = inlined_call_operand.hbm [shape: f32[64,64], index: 8, kind: input, shape index: {}]   ;;  %s7295_s9 = inlined_call_operand.hbm [shape: f32[32,1], index: 9, kind: input, shape index: {}]   ;;  %s7296_s10 = inlined_call_operand.hbm [shape: f32[32,1], index: 10, kind: input, shape index: {}]   ;;  %s7297_s11 = inlined_call_operand.hbm [shape: f32[32,1], index: 11, kind: input, shape index: {}]   ;;  %s7298_s12 = inlined_call_operand.hbm [shape: f32[32,32], index: 12, kind: input, shape index: {}]   ;;  %s7299_s13 = inlined_call_operand.vmem [shape: f32[3,256], index: 13, kind: input, shape index: {}]   ;;  %s7300_s14 = inlined_call_operand.vmem [shape: f32[2,8,32,256], index: 14, kind: output, shape index: {}]  }
   0x1   :  { %7332 = sst [smem:[#allocation60_spill]] %s7288_s2 }
   0x2   :  { %7333 = sst [smem:[#allocation61_spill]] %s7289_s3 }
   0x3   :  { %7334 = sst [smem:[#allocation62_spill]] %s7290_s4 }
   0x4   :  { %7335 = sst [smem:[#allocation63_spill]] %s7291_s5 }
   0x5   :  { %7336 = sst [smem:[#allocation64_spill]] %s7292_s6 }
   0x6   :  { %7337 = sst [smem:[#allocation65_spill]] %s7293_s7 }
   0x7   :  { %7338 = sst [smem:[#allocation66_spill]] %s7294_s8 }
   0x8   :  { %7339 = sst [smem:[#allocation67_spill]] %s7299_s13 }
   0x9   :  { %19 = vsyncpa [#allocation5], 0 }
   0xa   :  { %20 = vsyncpa [#allocation7], 0 }
   0xb   :  { %21 = vsyncpa [#allocation10], 0 }
   0xc   :  { %22 = vsyncpa [#allocation13], 0 }
   0xd   :  { %23 = vsyncpa [#allocation16], 0 }
   0xe   :  { %24 = vsyncpa [#allocation19], 0  ;;  %s5305_s29 = smov 0   ;;  %s5307_s30 = smov 0  }
   0xf   :  { %s5309_s15 = smov 0   ;;  %s5311_s16 = smov 0  }
  0x10   :  { %s5313_s17 = smov 0  }
  0x11 LB: > { %7340 = sst [smem:[#allocation27_spill]] %s5197_s17  ;;  %s5199_s18 = smov [#allocation6]   ;;  %s5197_s17 = sphi %s5313_s17, %s30_s17   ;;  %s5193_s16 = sphi %s5311_s16, %s7439_s16   ;;  %s5189_s15 = sphi %s5309_s15, %s7438_s15   ;;  %s5185_s30 = sphi %s5307_s30, %s7437_s30   ;;  %s5181_s29 = sphi %s5305_s29, %s7436_s29  }
  0x12   : > { %s406_s19 = sshll.u32 %s5199_s18, 4  ;;  %s4443_s20 = sadd.s32 4294967295, %s5197_s17   ;;  %s407_s19 = int_to_ptr.vmem [resolvable:$true] %s406_s19 }
  0x13   : > { %p4445_p0 = scmp.ge.s32.totalorder %s5197_s17, 1  ;;  %p381_p1 = scmp.lt.s32.totalorder %s5197_s17, 17 }
  0x14   : > { %p5333_p2 = scmp.eq.s32.totalorder %s4443_s20, 0  ;;  %s5200_s24 = smov [#allocation9]  }
  0x15   : > { %p5337_p3 = pnand %p4445_p0, %p381_p1  ;;  %s432_s25 = sshll.u32 %s5200_s24, 4  ;;  %s5349_s25 = int_to_ptr.vmem [resolvable:$true] %s432_s25 }
  0x16   : > { %s5201_s26 = smov [#allocation12]   ;;  %s4860_s18 = scalar_lea.vmem %s407_s19, 3072 }
  0x17   : > { %p4599_p4 = pneg %p5337_p3  ;;  %s458_s27 = sshll.u32 %s5201_s26, 4  ;;  %s5351_s27 = int_to_ptr.vmem [resolvable:$true] %s458_s27 }
  0x18   : > { %p4861_p7 = scmp.ne.s32.totalorder %s407_s19, %s4860_s18  ;;  %p4868_p10 = scmp.lt.s32.totalorder %s407_s19, %s407_s19 }
  0x19   : > { %p5345_p5 = pnand %p5333_p2, %p4599_p4  ;;  %p4869_p11 = scmp.lt.s32.totalorder %s4860_s18, %s4860_s18 }
  0x1b   : > { %p5355_p6 = pneg %p5345_p5  ;;  %p4870_p12 = por %p4869_p11, %p4868_p10 }
  0x1d   : > { %p4863_p8 = pnand %p4861_p7, %p5355_p6 }
  0x1f   : > { %p4864_p9 = pneg %p4863_p8 }
  0x21   : > { %p4871_p13 = pnand %p4870_p12, %p4864_p9 }
  0x23   : > { %4874 = shalt.err (!%p4871_p13)
}
  0x24   : > { %s7303_s20 = smov 384   ;;  %s7304_s24 = smov 24  }
  0x25   : > { %s7345_s3 = sld [smem:[#allocation61_spill]]  ;;  %s4886_s13 = scalar_lea.vmem %s5349_s25, 1024 }
  0x26   : > { %p4887_p0 = scmp.ne.s32.totalorder %s5349_s25, %s4886_s13  ;;  %p4894_p7 = scmp.lt.s32.totalorder %s5349_s25, %s5349_s25 }
  0x27   : > { %p4895_p8 = scmp.lt.s32.totalorder %s4886_s13, %s4886_s13 }
  0x28   : > { %p4889_p1 = pnand %p4887_p0, %p5355_p6 }
  0x29   : > { %p4896_p9 = por %p4895_p8, %p4894_p7 }
  0x2a   : > { %p4890_p4 = pneg %p4889_p1 }
  0x2b   : > { %4605 = dma.hbm_to_vmem [thread:$0]  (!%p5345_p5), %s7345_s3, 3072, %s407_s19, [#allocation7], %s7303_s20, %s7303_s20, %s7304_s24  }
  0x2c   : > { %p4897_p10 = pnand %p4896_p9, %p4890_p4 }
  0x2e   : > { %4900 = shalt.err (!%p4897_p10)
}
  0x2f   : > { %s7305_s18 = smov 128   ;;  %s7307_s17 = smov 8  }
  0x30   : > { %s7346_s5 = sld [smem:[#allocation63_spill]]  ;;  %s4912_s13 = scalar_lea.vmem %s5351_s27, 1024 }
  0x31   : > { %p4913_p11 = scmp.ne.s32.totalorder %s5351_s27, %s4912_s13  ;;  %p4920_p0 = scmp.lt.s32.totalorder %s5351_s27, %s5351_s27 }
  0x32   : > { %p4921_p1 = scmp.lt.s32.totalorder %s4912_s13, %s4912_s13 }
  0x33   : > { %p4915_p12 = pnand %p4913_p11, %p5355_p6 }
  0x34   : > { %p4922_p4 = por %p4921_p1, %p4920_p0 }
  0x35   : > { %p4916_p13 = pneg %p4915_p12 }
  0x36   : > { %4611 = dma.hbm_to_vmem [thread:$0]  (!%p5345_p5), %s7346_s5, 1024, %s5349_s25, [#allocation10], %s7305_s18, %s7305_s18, %s7307_s17  }
  0x37   : > { %p4923_p7 = pnand %p4922_p4, %p4916_p13 }
  0x39   : > { %4926 = shalt.err (!%p4923_p7)
}
  0x3a   : > { %s7347_s7 = sld [smem:[#allocation65_spill]]  ;;  %s5206_s25 = smov [#allocation15]  }
  0x3b   : > { %s484_s26 = sshll.u32 %s5206_s25, 4  ;;  %s5207_s24 = smov [#allocation18]   ;;  %s485_s26 = int_to_ptr.vmem [resolvable:$true] %s484_s26 }
  0x3c   : > { %s510_s3 = sshll.u32 %s5207_s24, 4  ;;  %s4938_s13 = scalar_lea.vmem %s485_s26, 512  ;;  %s511_s3 = int_to_ptr.vmem [resolvable:$true] %s510_s3 }
  0x3d   : > { %p4939_p8 = scmp.ne.s32.totalorder %s485_s26, %s4938_s13  ;;  %p4946_p11 = scmp.lt.s32.totalorder %s485_s26, %s485_s26 }
  0x3e   : > { %p4947_p12 = scmp.lt.s32.totalorder %s4938_s13, %s4938_s13 }
  0x3f   : > { %p4941_p9 = pnand %p4939_p8, %p5355_p6 }
  0x40   : > { %4617 = dma.hbm_to_vmem [thread:$0]  (!%p5345_p5), %s7347_s7, 1024, %s5351_s27, [#allocation13], %s7305_s18, %s7305_s18, %s7307_s17  }
  0x41   : > { %p4942_p10 = pneg %p4941_p9  ;;  %p4948_p13 = por %p4947_p12, %p4946_p11 }
  0x43   : > { %p4949_p0 = pnand %p4948_p13, %p4942_p10 }
  0x45   : > { %4952 = shalt.err (!%p4949_p0)
}
  0x46   : > { %4623 = dma.hbm_to_vmem [thread:$0]  (!%p5345_p5), %s7295_s9, 512, %s485_s26, [#allocation16], %s7305_s18, %s7305_s18, %s7307_s17  }
  0x47   : > { %s4964_s24 = scalar_lea.vmem %s511_s3, 512  ;;  %p4972_p8 = scmp.lt.s32.totalorder %s511_s3, %s511_s3 }
  0x48   : > { %p4965_p1 = scmp.ne.s32.totalorder %s511_s3, %s4964_s24  ;;  %p4973_p9 = scmp.lt.s32.totalorder %s4964_s24, %s4964_s24 }
  0x4a   : > { %p4967_p4 = pnand %p4965_p1, %p5355_p6  ;;  %p4974_p11 = por %p4973_p9, %p4972_p8 }
  0x4c   : > { %p4968_p7 = pneg %p4967_p4 }
  0x4e   : > { %p4975_p10 = pnand %p4974_p11, %p4968_p7 }
  0x50   : > { %4978 = shalt.err (!%p4975_p10)
}
  0x51   : > { %4629 = dma.hbm_to_vmem [thread:$0]  (!%p5345_p5), %s7297_s11, 512, %s511_s3, [#allocation19], %s7305_s18, %s7305_s18, %s7307_s17  }
  0x52   : > { %s39_s26 = sadd.s32 1, %s5189_s15  ;;  %s42_s13 = sadd.s32 1, %s5193_s16 }
  0x53   : > { %p40_p12 = scmp.ge.s32.totalorder %s39_s26, 8  ;;  %s5208_s27 = smov [#allocation4]  }
  0x54   : > { %s393_s20 = sshll.u32 %s5208_s27, 4  ;;  %s5209_s24 = smov [#allocation8]   ;;  %s394_s20 = int_to_ptr.vmem [resolvable:$true] %s393_s20 }
  0x55   : > { %s7441_s26 = smov (%p40_p12, %s39_s26), 0  ;;  %s7443_s13 = smov (!%p40_p12, %s42_s13), %s5193_s16 }
  0x56   : > { %s419_s5 = sshll.u32 %s5209_s24, 4  ;;  %p44_p13 = scmp.ge.s32.totalorder %s7443_s13, 2  ;;  %s420_s5 = int_to_ptr.vmem [resolvable:$true] %s419_s5 }
  0x57   : > { %s4990_s7 = scalar_lea.vmem %s394_s20, 1536  ;;  %p4998_p7 = scmp.lt.s32.totalorder %s394_s20, %s394_s20 }
  0x58   : > { %p4991_p0 = scmp.ne.s32.totalorder %s394_s20, %s4990_s7  ;;  %p4999_p8 = scmp.lt.s32.totalorder %s4990_s7, %s4990_s7 }
  0x5a   : > { %p4993_p1 = pnand %p4991_p0, %p5355_p6  ;;  %p5000_p9 = por %p4999_p8, %p4998_p7 }
  0x5c   : > { %p4994_p4 = pneg %p4993_p1 }
  0x5e   : > { %p5001_p11 = pnand %p5000_p9, %p4994_p4 }
  0x60   : > { %5004 = shalt.err (!%p5001_p11)
}
  0x61   : > { %s7348_s2 = sld [smem:[#allocation60_spill]]  ;;  %s7445_s13 = smov (%p44_p13, %s7443_s13), 0 }
  0x62   : > { %s5016_s25 = scalar_lea.vmem %s420_s5, 1536  ;;  %p5024_p1 = scmp.lt.s32.totalorder %s420_s5, %s420_s5 }
  0x63   : > { %p5017_p10 = scmp.ne.s32.totalorder %s420_s5, %s5016_s25  ;;  %p5025_p4 = scmp.lt.s32.totalorder %s5016_s25, %s5016_s25 }
  0x65   : > { %p5019_p12 = pnand %p5017_p10, %p5355_p6  ;;  %p5026_p7 = por %p5025_p4, %p5024_p1 }
  0x67   : > { %4602 = dma.hbm_to_vmem [thread:$0]  (!%p5345_p5), %s7348_s2, 1536, %s394_s20, [#allocation5], %s7305_s18, %s7305_s18, %s7307_s17  }
  0x68   : > { %p5020_p0 = pneg %p5019_p12 }
  0x6a   : > { %p5027_p8 = pnand %p5026_p7, %p5020_p0 }
  0x6c   : > { %5030 = shalt.err (!%p5027_p8)
}
  0x6d   : > { %s7349_s7 = smov 24   ;;  %s7350_s27 = smov 384  }
  0x6e   : > { %s7351_s4 = sld [smem:[#allocation62_spill]]  ;;  %s5210_s20 = smov [#allocation11]  }
  0x6f   : > { %s445_s19 = sshll.u32 %s5210_s20, 4  ;;  %s5211_s18 = smov [#allocation14]   ;;  %s446_s19 = int_to_ptr.vmem [resolvable:$true] %s445_s19 }
  0x70   : > { %s471_s17 = sshll.u32 %s5211_s18, 4  ;;  %s5042_s25 = scalar_lea.vmem %s446_s19, 1024  ;;  %s472_s17 = int_to_ptr.vmem [resolvable:$true] %s471_s17 }
  0x71   : > { %p5043_p13 = scmp.ne.s32.totalorder %s446_s19, %s5042_s25  ;;  %p5050_p10 = scmp.lt.s32.totalorder %s446_s19, %s446_s19 }
  0x72   : > { %p5051_p12 = scmp.lt.s32.totalorder %s5042_s25, %s5042_s25 }
  0x73   : > { %p5045_p9 = pnand %p5043_p13, %p5355_p6 }
  0x74   : > { %4608 = dma.hbm_to_vmem [thread:$0]  (!%p5345_p5), %s7351_s4, 1536, %s420_s5, [#allocation7], %s7350_s27, %s7350_s27, %s7349_s7  }
  0x75   : > { %p5046_p11 = pneg %p5045_p9  ;;  %p5052_p0 = por %p5051_p12, %p5050_p10 }
  0x77   : > { %p5053_p1 = pnand %p5052_p0, %p5046_p11 }
  0x79   : > { %5056 = shalt.err (!%p5053_p1)
}
  0x7a   : > { %s7352_s24 = smov 8   ;;  %s7353_s5 = smov 128  }
  0x7b   : > { %s7354_s6 = sld [smem:[#allocation64_spill]]  ;;  %s5068_s18 = scalar_lea.vmem %s472_s17, 1024 }
  0x7c   : > { %p5069_p4 = scmp.ne.s32.totalorder %s472_s17, %s5068_s18  ;;  %p5076_p13 = scmp.lt.s32.totalorder %s472_s17, %s472_s17 }
  0x7d   : > { %p5077_p9 = scmp.lt.s32.totalorder %s5068_s18, %s5068_s18 }
  0x7e   : > { %p5071_p7 = pnand %p5069_p4, %p5355_p6 }
  0x7f   : > { %p5078_p10 = por %p5077_p9, %p5076_p13 }
  0x80   : > { %p5072_p8 = pneg %p5071_p7 }
  0x81   : > { %4614 = dma.hbm_to_vmem [thread:$0]  (!%p5345_p5), %s7354_s6, 1024, %s446_s19, [#allocation10], %s7353_s5, %s7353_s5, %s7352_s24  }
  0x82   : > { %p5079_p11 = pnand %p5078_p10, %p5072_p8 }
  0x84   : > { %5082 = shalt.err (!%p5079_p11)
}
  0x85   : > { %s7355_s8 = sld [smem:[#allocation66_spill]]  ;;  %s5212_s19 = smov [#allocation17]  }
  0x86   : > { %s497_s25 = sshll.u32 %s5212_s19, 4  ;;  %s5213_s7 = smov [#allocation20]   ;;  %s498_s25 = int_to_ptr.vmem [resolvable:$true] %s497_s25 }
  0x87   : > { %s523_s27 = sshll.u32 %s5213_s7, 4  ;;  %s5094_s18 = scalar_lea.vmem %s498_s25, 512  ;;  %s524_s27 = int_to_ptr.vmem [resolvable:$true] %s523_s27 }
  0x88   : > { %p5095_p12 = scmp.ne.s32.totalorder %s498_s25, %s5094_s18  ;;  %p5102_p4 = scmp.lt.s32.totalorder %s498_s25, %s498_s25 }
  0x89   : > { %p5103_p7 = scmp.lt.s32.totalorder %s5094_s18, %s5094_s18 }
  0x8a   : > { %p5097_p0 = pnand %p5095_p12, %p5355_p6 }
  0x8b   : > { %4620 = dma.hbm_to_vmem [thread:$0]  (!%p5345_p5), %s7355_s8, 1024, %s472_s17, [#allocation13], %s7353_s5, %s7353_s5, %s7352_s24  }
  0x8c   : > { %p5098_p1 = pneg %p5097_p0  ;;  %p5104_p8 = por %p5103_p7, %p5102_p4 }
  0x8e   : > { %p5105_p13 = pnand %p5104_p8, %p5098_p1 }
  0x90   : > { %5108 = shalt.err (!%p5105_p13)
}
  0x91   : > { %4626 = dma.hbm_to_vmem [thread:$0]  (!%p5345_p5), %s7296_s10, 512, %s498_s25, [#allocation16], %s7353_s5, %s7353_s5, %s7352_s24  }
  0x92   : > { %s5120_s20 = scalar_lea.vmem %s524_s27, 512  ;;  %p5128_p12 = scmp.lt.s32.totalorder %s524_s27, %s524_s27 }
  0x93   : > { %p5121_p9 = scmp.ne.s32.totalorder %s524_s27, %s5120_s20  ;;  %p5129_p0 = scmp.lt.s32.totalorder %s5120_s20, %s5120_s20 }
  0x95   : > { %p5123_p10 = pnand %p5121_p9, %p5355_p6  ;;  %p5130_p4 = por %p5129_p0, %p5128_p12 }
  0x97   : > { %p5124_p11 = pneg %p5123_p10 }
  0x99   : > { %p5131_p1 = pnand %p5130_p4, %p5124_p11 }
  0x9b   : > { %5134 = shalt.err (!%p5131_p1)
}
  0x9c   : > { %4632 = dma.hbm_to_vmem [thread:$0]  (!%p5345_p5), %s7298_s12, 512, %s524_s27, [#allocation19], %s7353_s5, %s7353_s5, %s7352_s24  }
  0x9d   : > { %562 = sbr.rel (%p5337_p3) target bundleno = 2397 (0x95d), region = 76 }
  0xa2   : > { %5156 = dma.done.wait (%p5333_p2), [#allocation5], 1536  }
  0xa3   : > { %5158 = vsyncadd (%p5333_p2), [#allocation5], 4294965760 }
  0xa4   : > { %5160 = dma.done.wait (%p5333_p2), [#allocation7], 4608  }
  0xa5   : > { %5162 = vsyncadd (%p5333_p2), [#allocation7], 4294962688 }
  0xa6   : > { %5164 = dma.done.wait (%p5333_p2), [#allocation10], 2048  }
  0xa7   : > { %5166 = vsyncadd (%p5333_p2), [#allocation10], 4294965248 }
  0xa8   : > { %5168 = dma.done.wait (%p5333_p2), [#allocation13], 2048  }
  0xa9   : > { %5170 = vsyncadd (%p5333_p2), [#allocation13], 4294965248 }
  0xaa   : > { %5172 = dma.done.wait (%p5333_p2), [#allocation16], 1024  }
  0xab   : > { %5174 = vsyncadd (%p5333_p2), [#allocation16], 4294966272 }
  0xac   : > { %5176 = dma.done.wait (%p5333_p2), [#allocation19], 1024  }
  0xad   : > { %5178 = vsyncadd (%p5333_p2), [#allocation19], 4294966272  ;;  %p661_p3 = scmp.lt.s32.totalorder %s5185_s30, 1  ;;  %p663_p5 = scmp.lt.s32.totalorder %s5181_s29, 7 }
  0xae   : > { %p4478_p2 = scmp.ne.s32.totalorder %s5181_s29, 0 }
  0xaf   : > { %s7447_s30 = smov (!%p661_p3, %s5185_s30), 1 }
  0xb0   : > { %s664_s22 = scalar_select %p663_p5, %s5181_s29, 7 }
  0xb1   : > { %s4471_s23 = sshll.u32 %s7447_s30, 4  ;;  %s4554_s28 = sshll.u32 %s7447_s30, 6 }
  0xb2   : > { %s4470_s24 = sshll.u32 %s664_s22, 1  ;;  %s674_s27 = scalar_lea.vmem %s7287_s1, %s4554_s28 }
  0xb3   : > { %s667_s18 = sadd.s32 %s4471_s23, %s4470_s24  ;;  %s4475_s17 = sshll.u32 %s664_s22, 3 }
  0xb4   : > { %s4472_s3 = sshll.u32 %s667_s18, 2  ;;  %s681_s21 = sadd.s32 %s4554_s28, %s4475_s17 }
  0xb5   : > { %s5522_s7 = scalar_lea.vmem %s7286_s0, %s4472_s3  ;;  %s4477_s2 = sshll.u32 %s681_s21, 3 }
  0xb6   : > { %s5527_s8 = scalar_lea.vmem %s7300_s14, %s4477_s2  ;;  %687 = sbr.rel (%p4478_p2) target bundleno = 192 (0xc0), region = 124 }
  0xbb   : > { %v688_v0 = vld [vmem:[%s674_s27] sm:$0xff]  ;;  %v689_v1 = vld [vmem:[%s674_s27 + $0x8] sm:$0xff]  ;;  %v690_v2 = vld [vmem:[%s674_s27 + $0x10] sm:$0xff] }
  0xbc   : > { %696 = vst [vmem:[#allocation3 + $0x30] sm:$0xff] %v688_v0  ;;  %697 = vst [vmem:[#allocation3] sm:$0xff] %v689_v1  ;;  %v691_v3 = vld [vmem:[%s674_s27 + $0x18] sm:$0xff]  ;;  %v692_v4 = vld [vmem:[%s674_s27 + $0x20] sm:$0xff] }
  0xbd   : > { %698 = vst [vmem:[#allocation3 + $0x18] sm:$0xff] %v690_v2  ;;  %v693_v5 = vld [vmem:[%s674_s27 + $0x28] sm:$0xff]  ;;  %699 = vst [vmem:[#allocation3 + $0x10] sm:$0xff] %v691_v3  ;;  %v694_v6 = vld [vmem:[%s674_s27 + $0x30] sm:$0xff] }
  0xbe   : > { %700 = vst [vmem:[#allocation3 + $0x8] sm:$0xff] %v692_v4  ;;  %701 = vst [vmem:[#allocation3 + $0x20] sm:$0xff] %v693_v5  ;;  %v695_v7 = vld [vmem:[%s674_s27 + $0x38] sm:$0xff] }
  0xbf   : > { %702 = vst [vmem:[#allocation3 + $0x28] sm:$0xff] %v694_v6  ;;  %703 = vst [vmem:[#allocation3 + $0x38] sm:$0xff] %v695_v7 }
  0xc0 PF: > { %v728_v10 = vlaneseq  ;;  %s5214_s2 = smov 17   ;;  %s7356_s29 = sld [smem:[#allocation67_spill]]  ;;  %v712_v21 = vld [vmem:[%s5522_s7] sm:$0xff]  ;;  %vm719_vm0 = vcmask 138240   ;;  %vm767_vm1 = vcmask 130048   ;;  %vm803_vm2 = vcmask 277504  }
  0xc1   : > { %s5215_s30 = smov 16   ;;  %v714_v23 = vcombine.high %v712_v21, %v712_v21  ;;  %s5216_s24 = smov 34   ;;  %vm791_vm3 = vcmask 261120   ;;  %vm755_vm4 = vcmask 15360   ;;  %vm779_vm5 = vcmask 146432  }
  0xc2   : > { %v729_v12 = vshrl.u32 %v728_v10, 7  ;;  %s5217_s27 = smov 18   ;;  %s5218_s3 = smov 32   ;;  %vm920_vm6 = vcmask 769024   ;;  %vm923_vm7 = vcmask 1043456   ;;  %vm853_vm8 = vcmask 916480  }
  0xc3   : > { %v704_v26 = vld [vmem:[#allocation3 + $0x30] sm:$0xff]  ;;  %v705_v27 = vld [vmem:[#allocation3] sm:$0xff]  ;;  %s5219_s21 = smov 2   ;;  %s5220_s23 = smov 111   ;;  %vm906_vm9 = vcmask 777216   ;;  %vm895_vm10 = vcmask 785408  }
  0xc4   : > { %v5535_v14 = vsub.s32 0, %v729_v12  ;;  %v5537_v15 = vsub.s32 1, %v729_v12  ;;  %v706_v19 = vld [vmem:[#allocation3 + $0x18] sm:$0xff]  ;;  %v707_v20 = vld [vmem:[#allocation3 + $0x10] sm:$0xff]  ;;  %s5221_s28 = smov 95   ;;  %s5222_s5 = smov 112  }
  0xc5   : > { %v709_v9 = vld [vmem:[#allocation3 + $0x20] sm:$0xff]  ;;  %v708_v17 = vld [vmem:[#allocation3 + $0x8] sm:$0xff]  ;;  %s7316_s25 = smov 94   ;;  %s5224_s18 = smov 96   ;;  %vm836_vm11 = vcmask 1031168   ;;  %vm864_vm12 = vcmask 908288  }
  0xc6   : > { %v710_v8 = vld [vmem:[#allocation3 + $0x28] sm:$0xff]  ;;  %1140 = vrot.lane.b32.xlu1 %v709_v9, %s5214_s2  ;;  %v711_v11 = vld [vmem:[#allocation3 + $0x38] sm:$0xff]  ;;  %s7357_s22 = smov %s7356_s29  ;;  %v1332_v13 = vld [vmem:[%s7356_s29] ss:$4 sm:$0x3]  ;;  %7358 = vst [vmem:[#allocation28_spill] sm:$0xff] %v5535_v14 }
  0xc7   : > { %1142 = vrot.lane.b32.xlu0 %v710_v8, %s5214_s2  ;;  %7359 = vst [vmem:[#allocation29_spill] sm:$0xff] %v5537_v15  ;;  %v1337_v16 = vrot.slane %v1332_v13, %v5535_v14  ;;  %v1341_v18 = vrot.slane %v1332_v13, %v5537_v15  ;;  %v4479_v22 = vld [vmem:[%s7357_s22 + $0x2] ss:$4 sm:$0x3]  ;;  %s5225_s17 = smov 126   ;;  %s5226_s20 = smov 110  }
  0xc8   : > { %v746_v24 = vrot.slane %v4479_v22, %v5535_v14  ;;  %v750_v25 = vrot.slane %v4479_v22, %v5537_v15  ;;  %v726_v28 = vld [vmem:[%s7357_s22] ss:$4 sm:$0x3]  ;;  %v4494_v30 = vld [vmem:[%s7357_s22 + $0x2] ss:$4 sm:$0x3] }
  0xc9   : > { %v5564_v29 = vrot.slane %v726_v28, %v5535_v14  ;;  %v5571_v31 = vrot.slane %v726_v28, %v5537_v15  ;;  %v1247_v32 = vrot.slane %v4494_v30, %v5535_v14  ;;  %v1251_v33 = vrot.slane %v4494_v30, %v5537_v15  ;;  %v1560_v34 = vld [vmem:[%s7357_s22] ss:$4 sm:$0x3]  ;;  %v4495_v36 = vld [vmem:[%s7357_s22 + $0x2] ss:$4 sm:$0x3] }
  0xca   : > { %1342 = vrot.lane.b32.xlu1 %v1337_v16, %s5215_s30  ;;  %v1565_v35 = vrot.slane %v1560_v34, %v5535_v14  ;;  %v1569_v37 = vrot.slane %v1560_v34, %v5537_v15  ;;  %v1475_v38 = vrot.slane %v4495_v36, %v5535_v14  ;;  %v4496_v39 = vld [vmem:[%s7357_s22 + $0x2] ss:$4 sm:$0x3]  ;;  %v1479_v40 = vrot.slane %v4495_v36, %v5537_v15  ;;  %s5227_s19 = smov 127  }
  0xcb   : > { %1144 = vrot.lane.b32.xlu0 %v711_v11, %s5214_s2  ;;  %v1703_v41 = vrot.slane %v4496_v39, %v5535_v14  ;;  %v1707_v42 = vrot.slane %v4496_v39, %v5537_v15  ;;  %vm881_vm13 = vcmask 900096   ;;  %vm822_vm14 = vcmask 1039360  }
  0xcc   : > { %vm944_vm15 = vcmask 293888  }
  0xce   : > { %1344 = vrot.lane.b32.xlu1 %v1341_v18, %s5215_s30 }
  0xcf   : > { %1138 = vrot.lane.b32.xlu0 %v708_v17, %s5214_s2 }
  0xd2   : > { %1136 = vrot.lane.b32.xlu1 %v707_v20, %s5214_s2 }
  0xd3   : > { %1134 = vrot.lane.b32.xlu0 %v706_v19, %s5214_s2 }
  0xd6   : > { %717 = vrot.lane.b32.xlu1 %v714_v23, %s5214_s2 }
  0xd7   : > { %715 = vrot.lane.b32.xlu0 %v712_v21, %s5214_s2 }
  0xda   : > { %801 = vrot.lane.b32.xlu1 %v750_v25, %s5216_s24 }
  0xdb   : > { %799 = vrot.lane.b32.xlu0 %v746_v24, %s5216_s24 }
  0xde   : > { %1132 = vrot.lane.b32.xlu1 %v705_v27, %s5214_s2 }
  0xdf   : > { %1130 = vrot.lane.b32.xlu0 %v704_v26, %s5214_s2 }
  0xe2   : > { %777 = vrot.lane.b32.xlu1 %v750_v25, %s5217_s27 }
  0xe3   : > { %775 = vrot.lane.b32.xlu0 %v746_v24, %s5217_s27 }
  0xe6   : > { %789 = vrot.lane.b32.xlu1 %v5571_v31, %s5218_s3 }
  0xe7   : > { %787 = vrot.lane.b32.xlu0 %v5564_v29, %s5218_s3 }
  0xea   : > { %1254 = vrot.lane.b32.xlu1 %v1251_v33, %s5219_s21 }
  0xeb   : > { %1252 = vrot.lane.b32.xlu0 %v1247_v32, %s5219_s21 }
  0xee   : > { %765 = vrot.lane.b32.xlu1 %v5571_v31, %s5215_s30 }
  0xef   : > { %763 = vrot.lane.b32.xlu0 %v5564_v29, %s5215_s30 }
  0xf2   : > { %753 = vrot.lane.b32.xlu1 %v750_v25, %s5219_s21 }
  0xf3   : > { %751 = vrot.lane.b32.xlu0 %v746_v24, %s5219_s21 }
  0xf6   : > { %1572 = vrot.lane.b32.xlu1 %v1569_v37, %s5218_s3 }
  0xf7   : > { %1570 = vrot.lane.b32.xlu0 %v1565_v35, %s5218_s3 }
  0xfa   : > { %1482 = vrot.lane.b32.xlu1 %v1479_v40, %s5217_s27 }
  0xfb   : > { %1480 = vrot.lane.b32.xlu0 %v1475_v38, %s5217_s27 }
  0xfe   : > { %1710 = vrot.lane.b32.xlu1 %v1707_v42, %s5216_s24 }
  0xff   : > { %1708 = vrot.lane.b32.xlu0 %v1703_v41, %s5216_s24 }
 0x138   : > { %v5610_v44 = vpop.permute.xlu1 %1140 }
 0x139   : > { %v5608_v43 = vpop.permute.xlu0 %1142  ;;  %v5690_v8 = vsel %vm719_vm0, %v5610_v44, 0.0 }
 0x13a   : > { %v5672_v2 = vsel %vm719_vm0, 0.0, %v5608_v43 }
 0x13c   : > { %v5614_v46 = vpop.permute.xlu1 %1342 }
 0x13d   : > { %v5612_v45 = vpop.permute.xlu0 %1144  ;;  %v1359_v7 = vmul.f32 %v5614_v46, %v5672_v2 }
 0x13e   : > { %v5651_v60 = vsel %vm719_vm0, %v5612_v45, 0.0  ;;  %v5760_v39 = vsel %vm719_vm0, %v5608_v43, %v5612_v45 }
 0x140   : > { %v5618_v48 = vpop.permute.xlu1 %1344 }
 0x141   : > { %v5616_v47 = vpop.permute.xlu0 %1138  ;;  %v1361_v63 = vmul.f32 %v5618_v48, %v5651_v60  ;;  %v1358_v11 = vmul.f32 %v5618_v48, %v5690_v8  ;;  %v1346_v34 = vsel %vm767_vm1, %v5614_v46, %v5618_v48 }
 0x142   : > { %v5663_v0 = vsel %vm719_vm0, 0.0, %v5616_v47  ;;  %v5746_v35 = vsel %vm719_vm0, %v5616_v47, %v5610_v44  ;;  %v1360_v42 = vmul.f32 %v1346_v34, %v5760_v39 }
 0x143   : > { %v1356_v4 = vmul.f32 %v5614_v46, %v5663_v0  ;;  %v1357_v36 = vmul.f32 %v1346_v34, %v5746_v35 }
 0x144   : > { %v5622_v50 = vpop.permute.xlu1 %1136 }
 0x145   : > { %v5620_v49 = vpop.permute.xlu0 %1134  ;;  %v5680_v5 = vsel %vm719_vm0, %v5622_v50, 0.0 }
 0x146   : > { %v1355_v10 = vmul.f32 %v5618_v48, %v5680_v5  ;;  %v5698_v12 = vsel %vm719_vm0, 0.0, %v5620_v49  ;;  %v5772_v44 = vsel %vm719_vm0, %v5620_v49, %v5622_v50 }
 0x147   : > { %v1353_v18 = vmul.f32 %v5614_v46, %v5698_v12  ;;  %v1354_v47 = vmul.f32 %v1346_v34, %v5772_v44 }
 0x148   : > { %v718_v54 = vpop.permute.xlu1 %717 }
 0x149   : > { %v716_v51 = vpop.permute.xlu0 %715  ;;  %v5644_v59 = vsel %vm719_vm0, %v718_v54, 0.0 }
 0x14a   : > { %v5625_v52 = vsel %vm719_vm0, 0.0, %v716_v51  ;;  %v5631_v55 = vsel %vm719_vm0, %v716_v51, %v718_v54  ;;  %v815_v1 = vrot.slane %v5644_v59, 4 }
 0x14b   : > { %858 = vrot.lane.b32.xlu0 %v5625_v52, %s5220_s23  ;;  %v813_v53 = vrot.slane %v5625_v52, 4  ;;  %860 = vrot.lane.b32.xlu1 %v5631_v55, %s5220_s23  ;;  %v814_v58 = vrot.slane %v5631_v55, 4 }
 0x14c   : > { %v5640_v57 = vpop.permute.xlu1 %801 }
 0x14d   : > { %v5633_v56 = vpop.permute.xlu0 %799  ;;  %v810_v20 = vmul.f32 %v5640_v57, %v5644_v59 }
 0x14e   : > { %v808_v16 = vmul.f32 %v5633_v56, %v5625_v52  ;;  %v804_v37 = vsel %vm803_vm2, %v5633_v56, %v5640_v57 }
 0x14f   : > { %900 = vrot.lane.b32.xlu0 %v813_v53, %s5221_s28  ;;  %902 = vrot.lane.b32.xlu1 %v814_v58, %s5221_s28  ;;  %v809_v40 = vmul.f32 %v804_v37, %v5631_v55 }
 0x150   : > { %v5657_v62 = vpop.permute.xlu1 %1132 }
 0x151   : > { %v5653_v61 = vpop.permute.xlu0 %1130  ;;  %v5717_v22 = vsel %vm719_vm0, %v5657_v62, 0.0 }
 0x152   : > { %v1352_v25 = vmul.f32 %v5618_v48, %v5717_v22  ;;  %v5732_v30 = vsel %vm719_vm0, 0.0, %v5653_v61  ;;  %v5766_v41 = vsel %vm719_vm0, %v5653_v61, %v5657_v62 }
 0x153   : > { %862 = vrot.lane.b32.xlu0 %v5644_v59, %s5220_s23  ;;  %1396 = vrot.lane.b32.xlu1 %v1361_v63, %s5222_s5  ;;  %v1350_v33 = vmul.f32 %v5614_v46, %v5732_v30  ;;  %v1351_v43 = vmul.f32 %v1346_v34, %v5766_v41 }
 0x154   : > { %v5674_v3 = vpop.permute.xlu1 %777 }
 0x155   : > { %v5682_v6 = vpop.permute.xlu0 %775  ;;  %v786_v61 = vmul.f32 %v5674_v3, %v5644_v59 }
 0x156   : > { %v784_v56 = vmul.f32 %v5682_v6, %v5625_v52 }
 0x157   : > { %904 = vrot.lane.b32.xlu0 %v815_v1, %s5221_s28  ;;  %1386 = vrot.lane.b32.xlu1 %v1356_v4, %s5222_s5 }
 0x158   : > { %v790_v9 = vpop.permute.xlu1 %789 }
 0x159   : > { %v788_v13 = vpop.permute.xlu0 %787  ;;  %v798_v27 = vmul.f32 %v790_v9, %v5644_v59 }
 0x15a   : > { %v796_v19 = vmul.f32 %v788_v13, %v5625_v52  ;;  %v792_v45 = vsel %vm791_vm3, %v788_v13, %v790_v9  ;;  %v780_v9 = vsel %vm779_vm5, %v5682_v6, %v5674_v3 }
 0x15b   : > { %1392 = vrot.lane.b32.xlu0 %v1359_v7, %s5222_s5  ;;  %1384 = vrot.lane.b32.xlu1 %v1355_v10, %s5222_s5  ;;  %v797_v49 = vmul.f32 %v792_v45, %v5631_v55  ;;  %v872_v7 = vrot.slane %v784_v56, 4  ;;  %v874_v10 = vrot.slane %v786_v61, 4 }
 0x15c   : > { %v5704_v17 = vpop.permute.xlu1 %1254 }
 0x15d   : > { %v5713_v21 = vpop.permute.xlu0 %1252  ;;  %v1268_v26 = vmul.f32 %v5704_v17, %v5690_v8  ;;  %v1271_v38 = vmul.f32 %v5704_v17, %v5651_v60 }
 0x15e   : > { %v1269_v24 = vmul.f32 %v5713_v21, %v5672_v2  ;;  %v1256_v48 = vsel %vm755_vm4, %v5713_v21, %v5704_v17  ;;  %v1266_v3 = vmul.f32 %v5713_v21, %v5663_v0 }
 0x15f   : > { %1390 = vrot.lane.b32.xlu0 %v1358_v11, %s5222_s5  ;;  %914 = vrot.lane.b32.xlu1 %v808_v16, %s7316_s25  ;;  %v1267_v51 = vmul.f32 %v1256_v48, %v5746_v35  ;;  %v1270_v57 = vmul.f32 %v1256_v48, %v5760_v39  ;;  %v785_v16 = vmul.f32 %v780_v9, %v5631_v55 }
 0x160   : > { %v766_v23 = vpop.permute.xlu1 %765 }
 0x161   : > { %v764_v46 = vpop.permute.xlu0 %763  ;;  %v774_v4 = vmul.f32 %v766_v23, %v5644_v59 }
 0x162   : > { %v768_v63 = vsel %vm767_vm1, %v764_v46, %v766_v23 }
 0x163   : > { %1380 = vrot.lane.b32.xlu0 %v1353_v18, %s5222_s5  ;;  %889 = vrot.lane.b32.xlu1 %v796_v19, %s5224_s18  ;;  %v773_v11 = vmul.f32 %v768_v63, %v5631_v55  ;;  %v846_v13 = vrot.slane %v774_v4, 4  ;;  %v873_v19 = vrot.slane %v785_v16, 4 }
 0x164   : > { %v754_v28 = vpop.permute.xlu1 %753 }
 0x165   : > { %v762_v32 = vmul.f32 %v754_v28, %v5644_v59  ;;  %v752_v50 = vpop.permute.xlu0 %751  ;;  %v845_v18 = vrot.slane %v773_v11, 4 }
 0x166   : > { %v756_v54 = vsel %vm755_vm4, %v752_v50, %v754_v28  ;;  %v760_v6 = vmul.f32 %v752_v50, %v5625_v52  ;;  %v1262_v28 = vmul.f32 %v5704_v17, %v5717_v22 }
 0x167   : > { %918 = vrot.lane.b32.xlu0 %v810_v20, %s7316_s25  ;;  %1302 = vrot.lane.b32.xlu1 %v1269_v24, %s5225_s17  ;;  %v761_v62 = vmul.f32 %v756_v54, %v5631_v55  ;;  %v772_v20 = vmul.f32 %v764_v46, %v5625_v52  ;;  %v1264_v24 = vmul.f32 %v1256_v48, %v5772_v44 }
 0x169   : > { %v844_v23 = vrot.slane %v772_v20, 4  ;;  %v5843_v59 = vpop.permute.xlu0 %1570 }
 0x16a   : > { %v1587_v63 = vmul.f32 %v5843_v59, %v5672_v2 }
 0x16b   : > { %1378 = vrot.lane.b32.xlu0 %v1352_v25, %s5222_s5  ;;  %1300 = vrot.lane.b32.xlu1 %v1268_v26, %s5225_s17  ;;  %v1265_v25 = vmul.f32 %v5704_v17, %v5680_v5  ;;  %v1263_v26 = vmul.f32 %v5713_v21, %v5698_v12 }
 0x16f   : > { %893 = vrot.lane.b32.xlu0 %v798_v27, %s5224_s18  ;;  %834 = vrot.lane.b32.xlu1 %v762_v32, %s5225_s17  ;;  %v1261_v27 = vmul.f32 %v1256_v48, %v5766_v41 }
 0x173   : > { %1374 = vrot.lane.b32.xlu0 %v1350_v33, %s5222_s5  ;;  %1388 = vrot.lane.b32.xlu1 %v1357_v36, %s5222_s5 }
 0x177   : > { %1306 = vrot.lane.b32.xlu0 %v1271_v38, %s5225_s17  ;;  %916 = vrot.lane.b32.xlu1 %v809_v40, %s7316_s25 }
 0x17b   : > { %1394 = vrot.lane.b32.xlu0 %v1360_v42, %s5222_s5  ;;  %1376 = vrot.lane.b32.xlu1 %v1351_v43, %s5222_s5 }
 0x17f   : > { %1382 = vrot.lane.b32.xlu0 %v1354_v47, %s5222_s5  ;;  %891 = vrot.lane.b32.xlu1 %v797_v49, %s5224_s18 }
 0x183   : > { %1298 = vrot.lane.b32.xlu0 %v1267_v51, %s5225_s17  ;;  %1304 = vrot.lane.b32.xlu1 %v1270_v57, %s5225_s17 }
 0x187   : > { %832 = vrot.lane.b32.xlu0 %v761_v62, %s5225_s17  ;;  %875 = vrot.lane.b32.xlu1 %v872_v7, %s5226_s20 }
 0x18b   : > { %879 = vrot.lane.b32.xlu0 %v874_v10, %s5226_s20  ;;  %851 = vrot.lane.b32.xlu1 %v846_v13, %s5222_s5  ;;  %v1584_v13 = vmul.f32 %v5843_v59, %v5663_v0 }
 0x18f   : > { %849 = vrot.lane.b32.xlu0 %v845_v18, %s5222_s5  ;;  %877 = vrot.lane.b32.xlu1 %v873_v19, %s5226_s20 }
 0x193   : > { %1296 = vrot.lane.b32.xlu0 %v1266_v3, %s5225_s17  ;;  %830 = vrot.lane.b32.xlu1 %v760_v6, %s5225_s17  ;;  %v1581_v6 = vmul.f32 %v5843_v59, %v5698_v12 }
 0x197   : > { %847 = vrot.lane.b32.xlu0 %v844_v23, %s5222_s5  ;;  %1292 = vrot.lane.b32.xlu1 %v1264_v24, %s5225_s17 }
 0x19b   : > { %1294 = vrot.lane.b32.xlu0 %v1265_v25, %s5225_s17  ;;  %818 = vrot.lane.b32.xlu1 %v814_v58, %s5227_s19  ;;  %v1260_v58 = vmul.f32 %v5713_v21, %v5732_v30 }
 0x19f   : > { %820 = vrot.lane.b32.xlu0 %v815_v1, %s5227_s19  ;;  %1290 = vrot.lane.b32.xlu1 %v1263_v26, %s5225_s17  ;;  %v5853_v1 = vpop.permute.xlu0 %1480 }
 0x1a3   : > { %816 = vrot.lane.b32.xlu0 %v813_v53, %s5227_s19  ;;  %1286 = vrot.lane.b32.xlu1 %v1261_v27, %s5225_s17  ;;  %v5849_v53 = vpop.permute.xlu1 %1572  ;;  %v5863_v21 = vpop.permute.xlu0 %1708 }
 0x1a4   : > { %v1574_v50 = vsel %vm791_vm3, %v5843_v59, %v5849_v53  ;;  %v1589_v61 = vmul.f32 %v5849_v53, %v5651_v60  ;;  %v1586_v10 = vmul.f32 %v5849_v53, %v5690_v8  ;;  %v1583_v20 = vmul.f32 %v5849_v53, %v5680_v5 }
 0x1a5   : > { %v1588_v56 = vmul.f32 %v1574_v50, %v5760_v39  ;;  %v1585_v7 = vmul.f32 %v1574_v50, %v5746_v35  ;;  %v1582_v18 = vmul.f32 %v1574_v50, %v5772_v44  ;;  %v1579_v24 = vmul.f32 %v1574_v50, %v5766_v41 }
 0x1a6   : > { %v1580_v27 = vmul.f32 %v5849_v53, %v5717_v22 }
 0x1a7   : > { %1288 = vrot.lane.b32.xlu0 %v1262_v28, %s5225_s17  ;;  %1284 = vrot.lane.b32.xlu1 %v1260_v58, %s5225_s17  ;;  %v5857_v17 = vpop.permute.xlu1 %1482 }
 0x1a8   : > { %v5968_v50 = vsel %vm779_vm5, %v5853_v1, %v5857_v17 }
 0x1ab   : > { %1214 = vrot.lane.b32.xlu0 %v5760_v39, %s5227_s19  ;;  %1216 = vrot.lane.b32.xlu1 %v5651_v60, %s5227_s19  ;;  %v5869_v32 = vpop.permute.xlu1 %1710 }
 0x1af   : > { %1212 = vrot.lane.b32.xlu0 %v5672_v2, %s5227_s19  ;;  %1208 = vrot.lane.b32.xlu1 %v5746_v35, %s5227_s19 }
 0x1b3   : > { %1210 = vrot.lane.b32.xlu0 %v5690_v8, %s5227_s19  ;;  %1206 = vrot.lane.b32.xlu1 %v5663_v0, %s5227_s19 }
 0x1b7   : > { %1202 = vrot.lane.b32.xlu0 %v5772_v44, %s5227_s19  ;;  %1204 = vrot.lane.b32.xlu1 %v5680_v5, %s5227_s19 }
 0x1bb   : > { %1200 = vrot.lane.b32.xlu0 %v5698_v12, %s5227_s19  ;;  %1196 = vrot.lane.b32.xlu1 %v5766_v41, %s5227_s19 }
 0x1bd   : > { %v5871_v33 = vpop.permute.xlu0 %858  ;;  %v5877_v34 = vpop.permute.xlu1 %860 }
 0x1bf   : > { %1198 = vrot.lane.b32.xlu0 %v5717_v22, %s5227_s19  ;;  %1194 = vrot.lane.b32.xlu1 %v5732_v30, %s5227_s19 }
 0x1c1   : > { %v5879_v36 = vpop.permute.xlu0 %900  ;;  %v5885_v37 = vpop.permute.xlu1 %902 }
 0x1c3   : > { %1670 = vrot.lane.b32.xlu0 %v5760_v39, %s5221_s28  ;;  %1672 = vrot.lane.b32.xlu1 %v5651_v60, %s5221_s28 }
 0x1c5   : > { %v5887_v38 = vpop.permute.xlu0 %862  ;;  %v1397_v40 = vpop.permute.xlu1 %1396 }
 0x1c7   : > { %1668 = vrot.lane.b32.xlu0 %v5672_v2, %s5221_s28  ;;  %1664 = vrot.lane.b32.xlu1 %v5746_v35, %s5221_s28 }
 0x1c9   : > { %v5893_v42 = vpop.permute.xlu0 %904  ;;  %v5899_v46 = vpop.permute.xlu1 %1386 }
 0x1cb   : > { %1666 = vrot.lane.b32.xlu0 %v5690_v8, %s5221_s28  ;;  %1662 = vrot.lane.b32.xlu1 %v5663_v0, %s5221_s28 }
 0x1cd   : > { %v1393_v43 = vpop.permute.xlu0 %1392  ;;  %v5905_v45 = vpop.permute.xlu1 %1384 }
 0x1cf   : > { %1658 = vrot.lane.b32.xlu0 %v5772_v44, %s5221_s28  ;;  %1660 = vrot.lane.b32.xlu1 %v5680_v5, %s5221_s28 }
 0x1d1   : > { %v1391_v47 = vpop.permute.xlu0 %1390  ;;  %v915_v48 = vpop.permute.xlu1 %914 }
 0x1d3   : > { %1656 = vrot.lane.b32.xlu0 %v5698_v12, %s5221_s28  ;;  %1652 = vrot.lane.b32.xlu1 %v5766_v41, %s5221_s28 }
 0x1d5   : > { %v5911_v49 = vpop.permute.xlu0 %1380  ;;  %v5920_v51 = vpop.permute.xlu1 %889 }
 0x1d7   : > { %1654 = vrot.lane.b32.xlu0 %v5717_v22, %s5221_s28  ;;  %1650 = vrot.lane.b32.xlu1 %v5732_v30, %s5221_s28 }
 0x1d9   : > { %v919_v54 = vpop.permute.xlu0 %918  ;;  %v5926_v57 = vpop.permute.xlu1 %1302 }
 0x1db   : > { %1622 = vrot.lane.b32.xlu0 %v1588_v56, %s5224_s18  ;;  %1624 = vrot.lane.b32.xlu1 %v1589_v61, %s5224_s18 }
 0x1dd   : > { %v5930_v62 = vpop.permute.xlu0 %1378  ;;  %v5936_v4 = vpop.permute.xlu1 %1300 }
 0x1df   : > { %1620 = vrot.lane.b32.xlu0 %v1587_v63, %s5224_s18  ;;  %1616 = vrot.lane.b32.xlu1 %v1585_v7, %s5224_s18 }
 0x1e1   : > { %v894_v9 = vpop.permute.xlu0 %893  ;;  %v5943_v11 = vpop.permute.xlu1 %834 }
 0x1e3   : > { %1618 = vrot.lane.b32.xlu0 %v1586_v10, %s5224_s18  ;;  %1614 = vrot.lane.b32.xlu1 %v1584_v13, %s5224_s18  ;;  %v1499_v10 = vmul.f32 %v5857_v17, %v5651_v60 }
 0x1e5   : > { %v1375_v16 = vpop.permute.xlu0 %1374  ;;  %v1389_v19 = vpop.permute.xlu1 %1388 }
 0x1e6   : > { %v1402_v61 = vsel %vm853_vm8, %v5899_v46, %v1389_v19  ;;  %v1497_v46 = vmul.f32 %v5853_v1, %v5672_v2 }
 0x1e7   : > { %1610 = vrot.lane.b32.xlu0 %v1582_v18, %s5224_s18  ;;  %1612 = vrot.lane.b32.xlu1 %v1583_v20, %s5224_s18 }
 0x1e9   : > { %v1307_v3 = vpop.permute.xlu0 %1306  ;;  %v917_v23 = vpop.permute.xlu1 %916 }
 0x1ea   : > { %v922_v26 = vsel %vm920_vm6, %v917_v23, %v919_v54  ;;  %v921_v28 = vsel %vm920_vm6, %v915_v48, %v917_v23  ;;  %v1578_v48 = vmul.f32 %v5843_v59, %v5732_v30 }
 0x1eb   : > { %1608 = vrot.lane.b32.xlu0 %v1581_v6, %s5224_s18  ;;  %1604 = vrot.lane.b32.xlu1 %v1579_v24, %s5224_s18 }
 0x1ec   : > { %4480 = vmatprep.subr.msk.mxu0 %vm923_vm7, %v922_v26 }
 0x1ed   : > { %v1395_v25 = vpop.permute.xlu0 %1394  ;;  %4481 = vmatpush1.msk.msra.mxu0 %vm923_vm7, %v921_v28  ;;  %v1377_v53 = vpop.permute.xlu1 %1376 }
 0x1ee   : > { %v1405_v58 = vsel %vm853_vm8, %v1395_v25, %v1397_v40  ;;  %v1404_v56 = vsel %vm853_vm8, %v1393_v43, %v1395_v25  ;;  %v1403_v40 = vsel %vm853_vm8, %v1389_v19, %v1391_v47  ;;  %v1498_v43 = vmul.f32 %v5968_v50, %v5760_v39 }
 0x1ef   : > { %1606 = vrot.lane.b32.xlu0 %v1580_v27, %s5224_s18  ;;  %1908 = vmatprep.subr.mxu1 %v1405_v58  ;;  %v907_v47 = vsel %vm906_vm9, %v5879_v36, %v5885_v37  ;;  %v1399_v36 = vsel %vm853_vm8, %v1377_v53, %v5930_v62  ;;  %v1398_v19 = vsel %vm853_vm8, %v1375_v16, %v1377_v53  ;;  %v7309_v25 = vmov 0.0  }
 0x1f0   : > { %1909 = vmatpush1.msra.mxu1 %v1404_v56  ;;  %1602 = vrot.lane.b32.xlu1 %v1578_v48, %s5224_s18  ;;  %v1491_v58 = vmul.f32 %v5853_v1, %v5698_v12  ;;  %v865_v56 = vsel %vm864_vm12, %v5871_v33, %v5877_v34  ;;  %v1489_v48 = vmul.f32 %v5968_v50, %v5766_v41 }
 0x1f1   : > { %v1383_v54 = vpop.permute.xlu0 %1382  ;;  %1910 = vmatprep.subr.mxu1 %v1403_v40  ;;  %v892_v7 = vpop.permute.xlu1 %891  ;;  %1049 = vmatprep.mubr.f32.mxu0 %v7309_v25  ;;  %v1490_v40 = vmul.f32 %v5857_v17, %v5717_v22 }
 0x1f2   : > { %v1401_v63 = vsel %vm853_vm8, %v1383_v54, %v5905_v45  ;;  %v1400_v59 = vsel %vm853_vm8, %v5911_v49, %v1383_v54  ;;  %1911 = vmatpush1.msra.mxu1 %v1402_v61  ;;  %v908_v45 = vsel %vm906_vm9, %v5885_v37, %v5893_v42  ;;  %v896_v49 = vsel %vm895_vm10, %v5920_v51, %v892_v7 }
 0x1f3   : > { %1532 = vrot.lane.b32.xlu0 %v1498_v43, %s5226_s20  ;;  %1912 = vmatprep.subr.mxu1 %v1401_v63  ;;  %v897_v13 = vsel %vm895_vm10, %v892_v7, %v894_v9  ;;  %v930_v6 = vsel %vm923_vm7, %v896_v49, %v907_v47  ;;  %v1495_v42 = vmul.f32 %v5968_v50, %v5746_v35 }
 0x1f4   : > { %1913 = vmatpush1.msra.mxu1 %v1400_v59  ;;  %1534 = vrot.lane.b32.xlu1 %v1499_v10, %s5226_s20  ;;  %v931_v20 = vsel %vm923_vm7, %v897_v13, %v908_v45  ;;  %v1496_v9 = vmul.f32 %v5857_v17, %v5690_v8  ;;  %v866_v54 = vsel %vm864_vm12, %v5877_v34, %v5887_v38 }
 0x1f5   : > { %v1299_v18 = vpop.permute.xlu0 %1298  ;;  %1914 = vmatprep.subr.mxu1 %v1399_v36  ;;  %1009 = vmatprep.subr.mxu0 %v931_v20  ;;  %v1305_v37 = vpop.permute.xlu1 %1304  ;;  %v1488_v7 = vmul.f32 %v5853_v1, %v5732_v30  ;;  %v1727_v20 = vmul.f32 %v5869_v32, %v5651_v60 }
 0x1f6   : > { %1915 = vmatpush1.msra.mxu1 %v1398_v19  ;;  %1010 = vmatpush1.msra.mxu0 %v930_v6  ;;  %v1315_v62 = vsel %vm836_vm11, %v1305_v37, %v1307_v3  ;;  %v1314_v16 = vsel %vm836_vm11, %v5926_v57, %v1305_v37  ;;  %v1313_v23 = vsel %vm836_vm11, %v1299_v18, %v5936_v4 }
 0x1f7   : > { %1530 = vrot.lane.b32.xlu0 %v1497_v46, %s5226_s20  ;;  %1916 = vmatprep.subr.mxu1 %v1315_v62  ;;  %v1494_v3 = vmul.f32 %v5853_v1, %v5663_v0  ;;  %v1492_v57 = vmul.f32 %v5968_v50, %v5772_v44  ;;  %v1493_v4 = vmul.f32 %v5857_v17, %v5680_v5 }
 0x1f8   : > { %1526 = vrot.lane.b32.xlu1 %v1495_v42, %s5226_s20  ;;  %1917 = vmatpush1.msra.mxu1 %v1314_v16  ;;  %v739_v37 = vmul.f32 %v5571_v31, %v5631_v55  ;;  %v738_v55 = vmul.f32 %v5564_v29, %v5625_v52 }
 0x1f9   : > { %v833_v51 = vpop.permute.xlu0 %832  ;;  %v876_v24 = vpop.permute.xlu1 %875  ;;  %1918 = vmatprep.subr.mxu1 %v1313_v23 }
 0x1fa   : > { %v838_v17 = vsel %vm836_vm11, %v833_v51, %v5943_v11  ;;  %v6058_v11 = vsel %vm803_vm2, %v5863_v21, %v5869_v32 }
 0x1fb   : > { %1528 = vrot.lane.b32.xlu0 %v1496_v9, %s5226_s20  ;;  %v1726_v36 = vmul.f32 %v6058_v11, %v5760_v39  ;;  %v1725_v9 = vmul.f32 %v5863_v21, %v5672_v2 }
 0x1fc   : > { %1524 = vrot.lane.b32.xlu1 %v1494_v3, %s5226_s20 }
 0x1fd   : > { %v880_v26 = vpop.permute.xlu0 %879  ;;  %v852_v27 = vpop.permute.xlu1 %851 }
 0x1ff   : > { %1520 = vrot.lane.b32.xlu0 %v1492_v57, %s5226_s20 }
 0x200   : > { %1522 = vrot.lane.b32.xlu1 %v1493_v4, %s5226_s20  ;;  %v933_v4 = vld [vmem:[#allocation4 + $0x8] sm:$0xff] }
 0x201   : > { %v850_v28 = vpop.permute.xlu0 %849  ;;  %v878_v53 = vpop.permute.xlu1 %877 }
 0x202   : > { %v855_v43 = vsel %vm853_vm8, %v850_v28, %v852_v27  ;;  %v882_v61 = vsel %vm881_vm13, %v876_v24, %v878_v53  ;;  %v883_v63 = vsel %vm881_vm13, %v878_v53, %v880_v26  ;;  %v932_v24 = vld [vmem:[#allocation4] sm:$0xff]  ;;  %v1723_v27 = vmul.f32 %v6058_v11, %v5746_v35 }
 0x203   : > { %1518 = vrot.lane.b32.xlu0 %v1491_v58, %s5226_s20  ;;  %v929_v33 = vsel %vm923_vm7, %v866_v54, %v883_v63  ;;  %v928_v47 = vsel %vm923_vm7, %v865_v56, %v882_v61  ;;  %v927_v38 = vsel %vm923_vm7, %v838_v17, %v855_v43  ;;  %v1724_v58 = vmul.f32 %v5869_v32, %v5690_v8  ;;  %v935_v63 = vld [vmem:[#allocation4 + $0x18] sm:$0xff]  ;;  %v936_v17 = vld [vmem:[#allocation4 + $0x20] sm:$0xff] }
 0x204   : > { %1514 = vrot.lane.b32.xlu1 %v1489_v48, %s5226_s20  ;;  %1011 = vmatprep.subr.mxu0 %v929_v33  ;;  %v934_v48 = vld [vmem:[#allocation4 + $0x10] sm:$0xff]  ;;  %v1722_v54 = vmul.f32 %v5863_v21, %v5663_v0 }
 0x205   : > { %v1297_v59 = vpop.permute.xlu0 %1296  ;;  %v831_v34 = vpop.permute.xlu1 %830  ;;  %1012 = vmatpush1.msra.mxu0 %v928_v47 }
 0x206   : > { %v1312_v50 = vsel %vm836_vm11, %v1297_v59, %v1299_v18  ;;  %v837_v10 = vsel %vm836_vm11, %v831_v34, %v833_v51  ;;  %1013 = vmatprep.subr.mxu0 %v927_v38  ;;  %v1721_v38 = vmul.f32 %v5869_v32, %v5680_v5 }
 0x207   : > { %1516 = vrot.lane.b32.xlu0 %v1490_v40, %s5226_s20  ;;  %1919 = vmatpush1.msra.mxu1 %v1312_v50  ;;  %v1720_v50 = vmul.f32 %v6058_v11, %v5772_v44 }
 0x208   : > { %1512 = vrot.lane.b32.xlu1 %v1488_v7, %s5226_s20 }
 0x209   : > { %v848_v46 = vpop.permute.xlu0 %847  ;;  %v1293_v13 = vpop.permute.xlu1 %1292 }
 0x20a   : > { %v854_v45 = vsel %vm853_vm8, %v848_v46, %v850_v28  ;;  %v937_v46 = vld [vmem:[#allocation4 + $0x28] sm:$0xff] }
 0x20b   : > { %1442 = vrot.lane.b32.xlu0 %v5760_v39, %s5220_s23  ;;  %v926_v49 = vsel %vm923_vm7, %v837_v10, %v854_v45  ;;  %v1789_v45 = vld [vmem:[#allocation6 + $0x8] sm:$0xff] }
 0x20c   : > { %1014 = vmatpush1.msra.mxu0 %v926_v49  ;;  %1444 = vrot.lane.b32.xlu1 %v5651_v60, %s5220_s23 }
 0x20d   : > { %v1295_v1 = vpop.permute.xlu0 %1294  ;;  %v819_v19 = vpop.permute.xlu1 %818  ;;  %1972 = vmatprep.mubr.f32.mxu1 %v1789_v45 }
 0x20e   : > { %v1311_v18 = vsel %vm836_vm11, %v1293_v13, %v1295_v1 }
 0x20f   : > { %1760 = vrot.lane.b32.xlu0 %v1726_v36, %s7316_s25  ;;  %1920 = vmatprep.subr.mxu1 %v1311_v18  ;;  %v938_v18 = vld [vmem:[#allocation4 + $0x30] sm:$0xff] }
 0x210   : > { %1762 = vrot.lane.b32.xlu1 %v1727_v20, %s7316_s25 }
 0x211   : > { %v821_v6 = vpop.permute.xlu0 %820  ;;  %v1291_v62 = vpop.permute.xlu1 %1290 }
 0x212   : > { %v824_v42 = vsel %vm822_vm14, %v819_v19, %v821_v6  ;;  %v1310_v60 = vsel %vm836_vm11, %v1291_v62, %v1293_v13  ;;  %v1719_v13 = vmul.f32 %v5863_v21, %v5698_v12  ;;  %v1717_v6 = vmul.f32 %v6058_v11, %v5766_v41 }
 0x213   : > { %1440 = vrot.lane.b32.xlu0 %v5672_v2, %s5220_s23  ;;  %v925_v51 = vsel %vm923_vm7, %v739_v37, %v824_v42  ;;  %1921 = vmatpush1.msra.mxu1 %v1310_v60  ;;  %v939_v42 = vld [vmem:[#allocation4 + $0x38] sm:$0xff]  ;;  %v1718_v62 = vmul.f32 %v5869_v32, %v5717_v22  ;;  %v1176_v60 = vmul.f32 %v5672_v2, %v5564_v29 }
 0x214   : > { %1015 = vmatprep.subr.mxu0 %v925_v51  ;;  %1758 = vrot.lane.b32.xlu1 %v1725_v9, %s7316_s25 }
 0x215   : > { %v817_v16 = vpop.permute.xlu0 %816  ;;  %v1287_v26 = vpop.permute.xlu1 %1286 }
 0x216   : > { %v823_v23 = vsel %vm822_vm14, %v817_v16, %v819_v19  ;;  %v1177_v16 = vmul.f32 %v5760_v39, %v5571_v31  ;;  %v1716_v39 = vmul.f32 %v5863_v21, %v5732_v30 }
 0x217   : > { %1436 = vrot.lane.b32.xlu0 %v5746_v35, %s5220_s23  ;;  %v924_v3 = vsel %vm923_vm7, %v738_v55, %v823_v23  ;;  %v940_v55 = vld [vmem:[#allocation4 + $0x40] sm:$0xff]  ;;  %v1174_v23 = vmul.f32 %v5663_v0, %v5564_v29  ;;  %vm2222_vm7 = vcmask 523264  }
 0x218   : > { %1016 = vmatpush1.msra.mxu0 %v924_v3  ;;  %1438 = vrot.lane.b32.xlu1 %v5690_v8, %s5220_s23  ;;  %v941_v3 = vld [vmem:[#allocation4 + $0x48] sm:$0xff] }
 0x219   : > { %v1289_v57 = vpop.permute.xlu0 %1288  ;;  %4482 = vmatmul.mubr.msk.f32.vlgmr.msra.gmra.mxu0 %vm944_vm15, %v932_v24  ;;  %v1285_v28 = vpop.permute.xlu1 %1284  ;;  %v1173_v24 = vmul.f32 %v5772_v44, %v5571_v31 }
 0x21a   : > { %v1309_v52 = vsel %vm836_vm11, %v1287_v26, %v1289_v57  ;;  %1055 = vmatprep.mubr.f32.mxu0 %v7309_v25  ;;  %v1308_v53 = vsel %vm836_vm11, %v1285_v28, %v1287_v26 }
 0x21b   : > { %1754 = vrot.lane.b32.xlu0 %v1723_v27, %s7316_s25  ;;  %1922 = vmatprep.subr.mxu1 %v1309_v52 }
 0x21c   : > { %1756 = vrot.lane.b32.xlu1 %v1724_v58, %s7316_s25  ;;  %1923 = vmatpush1.msra.mxu1 %v1308_v53 }
 0x21d   : > { %v1215_v56 = vpop.permute.xlu0 %1214  ;;  %4483 = vmatmul.mubr.msk.f32.gmra.mxu0 %vm944_vm15, %v933_v4  ;;  %v1217_v40 = vpop.permute.xlu1 %1216 }
 0x21e   : > { %1061 = vmatprep.mubr.f32.mxu0 %v7309_v25  ;;  %v1225_v8 = vsel %vm822_vm14, %v1215_v56, %v1217_v40 }
 0x21f   : > { %1434 = vrot.lane.b32.xlu0 %v5663_v0, %s5220_s23  ;;  %1924 = vmatprep.subr.mxu1 %v1225_v8  ;;  %v1171_v0 = vmul.f32 %v5766_v41, %v5571_v31 }
 0x220   : > { %1752 = vrot.lane.b32.xlu1 %v1722_v54, %s7316_s25  ;;  %v2157_v54 = vld [vmem:[#allocation9 + $0x38] sm:$0xff] }
 0x221   : > { %v1213_v43 = vpop.permute.xlu0 %1212  ;;  %4484 = vmatmul.mubr.msk.f32.gmra.mxu0 %vm944_vm15, %v934_v48  ;;  %v1209_v59 = vpop.permute.xlu1 %1208 }
 0x222   : > { %v1224_v61 = vsel %vm822_vm14, %v1213_v43, %v1215_v56  ;;  %1067 = vmatprep.mubr.f32.mxu0 %v7309_v25  ;;  %v2156_v43 = vld [vmem:[#allocation9 + $0x30] sm:$0xff] }
 0x223   : > { %1430 = vrot.lane.b32.xlu0 %v5772_v44, %s5220_s23  ;;  %1925 = vmatpush1.msra.mxu1 %v1224_v61  ;;  %v1170_v44 = vmul.f32 %v5732_v30, %v5564_v29  ;;  %v5229_v61 = vmov 0  }
 0x224   : > { %1432 = vrot.lane.b32.xlu1 %v5680_v5, %s5220_s23  ;;  %4726 = vset.pattern.permute.xlu0 %v5229_v61 }
 0x225   : > { %v1211_v33 = vpop.permute.xlu0 %1210  ;;  %4485 = vmatmul.mubr.msk.f32.gmra.mxu0 %vm944_vm15, %v935_v63  ;;  %v1207_v34 = vpop.permute.xlu1 %1206  ;;  %4727 = vset.pattern.permute.xlu1 %v5229_v61 }
 0x226   : > { %v1223_v47 = vsel %vm822_vm14, %v1209_v59, %v1211_v33  ;;  %1073 = vmatprep.mubr.f32.mxu0 %v7309_v25  ;;  %v1222_v10 = vsel %vm822_vm14, %v1207_v34, %v1209_v59  ;;  %v2154_v33 = vld [vmem:[#allocation9 + $0x20] sm:$0xff] }
 0x227   : > { %1748 = vrot.lane.b32.xlu0 %v1720_v50, %s7316_s25  ;;  %1926 = vmatprep.subr.mxu1 %v1223_v47  ;;  %v2155_v50 = vld [vmem:[#allocation9 + $0x28] sm:$0xff] }
 0x228   : > { %1750 = vrot.lane.b32.xlu1 %v1721_v38, %s7316_s25  ;;  %1927 = vmatpush1.msra.mxu1 %v1222_v10  ;;  %v2153_v10 = vld [vmem:[#allocation9 + $0x18] sm:$0xff] }
 0x229   : > { %v1203_v7 = vpop.permute.xlu0 %1202  ;;  %4486 = vmatmul.mubr.msk.f32.gmra.mxu0 %vm944_vm15, %v936_v17  ;;  %v1205_v49 = vpop.permute.xlu1 %1204 }
 0x22a   : > { %1079 = vmatprep.mubr.f32.mxu0 %v7309_v25  ;;  %v1221_v1 = vsel %vm822_vm14, %v1203_v7, %v1205_v49 }
 0x22b   : > { %1428 = vrot.lane.b32.xlu0 %v5698_v12, %s5220_s23  ;;  %1928 = vmatprep.subr.mxu1 %v1221_v1 }
 0x22c   : > { %1746 = vrot.lane.b32.xlu1 %v1719_v13, %s7316_s25  ;;  %v2150_v13 = vld [vmem:[#allocation9] sm:$0xff] }
 0x22d   : > { %v1201_v5 = vpop.permute.xlu0 %1200  ;;  %4487 = vmatmul.mubr.msk.f32.gmra.mxu0 %vm944_vm15, %v937_v46  ;;  %v1197_v19 = vpop.permute.xlu1 %1196 }
 0x22e   : > { %v1220_v36 = vsel %vm822_vm14, %v1201_v5, %v1203_v7  ;;  %1085 = vmatprep.mubr.f32.mxu0 %v7309_v25  ;;  %v2152_v7 = vld [vmem:[#allocation9 + $0x10] sm:$0xff]  ;;  %v2151_v5 = vld [vmem:[#allocation9 + $0x8] sm:$0xff] }
 0x22f   : > { %1424 = vrot.lane.b32.xlu0 %v5766_v41, %s5220_s23  ;;  %1929 = vmatpush1.msra.mxu1 %v1220_v36 }
 0x230   : > { %1426 = vrot.lane.b32.xlu1 %v5717_v22, %s5220_s23  ;;  %v1175_v22 = vmul.f32 %v5746_v35, %v5571_v31  ;;  %v1172_v35 = vmul.f32 %v5698_v12, %v5564_v29  ;;  %v942_v12 = vld [vmem:[#allocation4 + $0x50] sm:$0xff] }
 0x231   : > { %v1199_v20 = vpop.permute.xlu0 %1198  ;;  %4488 = vmatmul.mubr.msk.f32.gmra.mxu0 %vm944_vm15, %v938_v18  ;;  %v1195_v51 = vpop.permute.xlu1 %1194 }
 0x232   : > { %v1219_v37 = vsel %vm822_vm14, %v1197_v19, %v1199_v20  ;;  %1091 = vmatprep.mubr.f32.mxu0 %v7309_v25  ;;  %v1218_v11 = vsel %vm822_vm14, %v1195_v51, %v1197_v19  ;;  %v2624_v19 = vld [vmem:[#allocation11 + $0x30] sm:$0xff]  ;;  %v2625_v20 = vld [vmem:[#allocation11 + $0x38] sm:$0xff] }
 0x233   : > { %1742 = vrot.lane.b32.xlu0 %v1717_v6, %s7316_s25  ;;  %1930 = vmatprep.subr.mxu1 %v1219_v37 }
 0x234   : > { %1744 = vrot.lane.b32.xlu1 %v1718_v62, %s7316_s25  ;;  %1931 = vmatpush1.msra.mxu1 %v1218_v11  ;;  %v2689_v62 = vld [vmem:[#allocation12 + $0x38] sm:$0xff] }
 0x235   : > { %v1671_v9 = vpop.permute.xlu0 %1670  ;;  %4489 = vmatmul.mubr.msk.f32.gmra.mxu0 %vm944_vm15, %v939_v42  ;;  %1932 = vmatprep.subr.mxu1 %v1177_v16  ;;  %v1673_v32 = vpop.permute.xlu1 %1672 }
 0x236   : > { %1933 = vmatpush1.msra.mxu1 %v1176_v60  ;;  %1097 = vmatprep.mubr.f32.mxu0 %v7309_v25  ;;  %v1681_v57 = vsel %vm906_vm9, %v1671_v9, %v1673_v32 }
 0x237   : > { %1422 = vrot.lane.b32.xlu0 %v5732_v30, %s5220_s23  ;;  %1934 = vmatprep.subr.mxu1 %v1175_v22  ;;  %v943_v30 = vld [vmem:[#allocation4 + $0x58] sm:$0xff]  ;;  %v2622_v22 = vld [vmem:[#allocation11 + $0x20] sm:$0xff] }
 0x238   : > { %1740 = vrot.lane.b32.xlu1 %v1716_v39, %s7316_s25  ;;  %1935 = vmatpush1.msra.mxu1 %v1174_v23 }
 0x239   : > { %v1669_v2 = vpop.permute.xlu0 %1668  ;;  %4490 = vmatmul.mubr.msk.f32.gmra.mxu0 %vm944_vm15, %v940_v55  ;;  %1936 = vmatprep.subr.mxu1 %v1173_v24  ;;  %v1665_v21 = vpop.permute.xlu1 %1664  ;;  %v2688_v55 = vld [vmem:[#allocation12 + $0x30] sm:$0xff]  ;;  %v2686_v24 = vld [vmem:[#allocation12 + $0x20] sm:$0xff] }
 0x23a   : > { %1103 = vmatprep.mubr.f32.mxu0 %v7309_v25  ;;  %1937 = vmatpush1.msra.mxu1 %v1172_v35  ;;  %v1680_v31 = vsel %vm906_vm9, %v1669_v2, %v1671_v9  ;;  %v2623_v9 = vld [vmem:[#allocation11 + $0x28] sm:$0xff] }
 0x23b   : > { %1938 = vmatprep.subr.mxu1 %v1171_v0  ;;  %2195 = vperm.xlu0 %4726, %v2157_v54   ;;  %v2687_v2 = vld [vmem:[#allocation12 + $0x28] sm:$0xff] }
 0x23c   : > { %1939 = vmatpush1.msra.mxu1 %v1170_v44  ;;  %2190 = vperm.xlu1 %4727, %v2156_v43  }
 0x23d   : > { %v1667_v26 = vpop.permute.xlu0 %1666  ;;  %4491 = vmatmul.mubr.msk.f32.gmra.mxu0 %vm944_vm15, %v941_v3  ;;  %1940 = vmatprep.subr.mxu1 %v1681_v57  ;;  %v1663_v41 = vpop.permute.xlu1 %1662 }
 0x23e   : > { %1109 = vmatprep.mubr.f32.mxu0 %v7309_v25  ;;  %1941 = vmatpush2.msra.mxu1 %v1680_v31  ;;  %v1679_v27 = vsel %vm906_vm9, %v1665_v21, %v1667_v26  ;;  %v1678_v29 = vsel %vm906_vm9, %v1663_v41, %v1665_v21 }
 0x23f   : > { %1942 = vmatprep.subr.mxu1 %v1679_v27  ;;  %2180 = vperm.xlu0 %4726, %v2154_v33  }
 0x240   : > { %1943 = vmatpush2.msra.mxu1 %v1678_v29  ;;  %2185 = vperm.xlu1 %4727, %v2155_v50  }
 0x241   : > { %v1659_v52 = vpop.permute.xlu0 %1658  ;;  %4492 = vmatmul.mubr.msk.f32.gmra.mxu0 %vm944_vm15, %v942_v12  ;;  %v1661_v4 = vpop.permute.xlu1 %1660 }
 0x242   : > { %1115 = vmatprep.mubr.f32.mxu0 %v7309_v25  ;;  %v1677_v58 = vsel %vm906_vm9, %v1659_v52, %v1661_v4 }
 0x243   : > { %1944 = vmatprep.subr.mxu1 %v1677_v58  ;;  %2170 = vperm.xlu0 %4726, %v2152_v7  }
 0x244   : > { %2175 = vperm.xlu1 %4727, %v2153_v10  }
 0x245   : > { %v1657_v28 = vpop.permute.xlu0 %1656  ;;  %4493 = vmatmul.mubr.msk.f32.gmra.mxu0 %vm944_vm15, %v943_v30  ;;  %v1653_v53 = vpop.permute.xlu1 %1652 }
 0x246   : > { %v1676_v56 = vsel %vm906_vm9, %v1657_v28, %v1659_v52  ;;  %2085 = vmatprep.mubr.f32.mxu0 %v7309_v25 }
 0x247   : > { %1945 = vmatpush2.msra.mxu1 %v1676_v56  ;;  %2160 = vperm.xlu0 %4726, %v2150_v13  }
 0x248   : > { %2165 = vperm.xlu1 %4727, %v2151_v5  }
 0x249   : > { %v1655_v48 = vpop.permute.xlu0 %1654  ;;  %v1651_v8 = vpop.permute.xlu1 %1650 }
 0x24a   : > { %v1675_v40 = vsel %vm906_vm9, %v1653_v53, %v1655_v48  ;;  %v1674_v59 = vsel %vm906_vm9, %v1651_v8, %v1653_v53 }
 0x24b   : > { %1946 = vmatprep.subr.mxu1 %v1675_v40  ;;  %2663 = vperm.xlu0 %4726, %v2625_v20  }
 0x24c   : > { %1947 = vmatpush2.msra.mxu1 %v1674_v59  ;;  %2658 = vperm.xlu1 %4727, %v2624_v19  }
 0x24d   : > { %v1623_v63 = vpop.permute.xlu0 %1622  ;;  %v1625_v47 = vpop.permute.xlu1 %1624 }
 0x24e   : > { %v1633_v34 = vsel %vm895_vm10, %v1623_v63, %v1625_v47 }
 0x24f   : > { %1948 = vmatprep.subr.mxu1 %v1633_v34  ;;  %2653 = vperm.xlu0 %4726, %v2623_v9  }
 0x250   : > { %2727 = vperm.xlu1 %4727, %v2689_v62  }
 0x251   : > { %v1621_v17 = vpop.permute.xlu0 %1620  ;;  %v1617_v46 = vpop.permute.xlu1 %1616 }
 0x252   : > { %v1632_v38 = vsel %vm895_vm10, %v1621_v17, %v1623_v63 }
 0x253   : > { %1949 = vmatpush2.msra.mxu1 %v1632_v38  ;;  %2648 = vperm.xlu0 %4726, %v2622_v22  }
 0x254   : > { %2722 = vperm.xlu1 %4727, %v2688_v55  }
 0x255   : > { %v1619_v45 = vpop.permute.xlu0 %1618  ;;  %v1615_v1 = vpop.permute.xlu1 %1614 }
 0x256   : > { %v1631_v49 = vsel %vm895_vm10, %v1617_v46, %v1619_v45  ;;  %v1630_v18 = vsel %vm895_vm10, %v1615_v1, %v1617_v46 }
 0x257   : > { %1950 = vmatprep.subr.mxu1 %v1631_v49  ;;  %2712 = vperm.xlu0 %4726, %v2686_v24   ;;  %v1790_v24 = vld [vmem:[#allocation6 + $0x10] sm:$0xff] }
 0x258   : > { %1951 = vmatpush2.msra.mxu1 %v1630_v18  ;;  %2717 = vperm.xlu1 %4727, %v2687_v2  }
 0x259   : > { %v1611_v36 = vpop.permute.xlu0 %1610  ;;  %v1613_v6 = vpop.permute.xlu1 %1612 }
 0x25a   : > { %v1629_v42 = vsel %vm895_vm10, %v1611_v36, %v1613_v6 }
 0x25b   : > { %1952 = vmatprep.subr.mxu1 %v1629_v42 }
 0x25d   : > { %v1609_v37 = vpop.permute.xlu0 %1608  ;;  %v1605_v11 = vpop.permute.xlu1 %1604 }
 0x25e   : > { %v1628_v51 = vsel %vm895_vm10, %v1609_v37, %v1611_v36 }
 0x25f   : > { %1953 = vmatpush2.msra.mxu1 %v1628_v51 }
 0x261   : > { %v1607_v16 = vpop.permute.xlu0 %1606 }
 0x262   : > { %v1627_v60 = vsel %vm895_vm10, %v1605_v11, %v1607_v16  ;;  %v1603_v32 = vpop.permute.xlu1 %1602 }
 0x263   : > { %1954 = vmatprep.subr.mxu1 %v1627_v60  ;;  %v1626_v23 = vsel %vm895_vm10, %v1603_v32, %v1605_v11  ;;  %v1788_v32 = vld [vmem:[#allocation6] sm:$0xff] }
 0x264   : > { %1955 = vmatpush2.msra.mxu1 %v1626_v23  ;;  %v1792_v23 = vld [vmem:[#allocation6 + $0x20] sm:$0xff] }
 0x265   : > { %v1533_v39 = vpop.permute.xlu0 %1532 }
 0x266   : > { %v1535_v35 = vpop.permute.xlu1 %1534 }
 0x267   : > { %v1543_v0 = vsel %vm881_vm13, %v1533_v39, %v1535_v35 }
 0x268   : > { %1956 = vmatprep.subr.mxu1 %v1543_v0  ;;  %v1795_v0 = vld [vmem:[#allocation6 + $0x38] sm:$0xff] }
 0x269   : > { %v1531_v3 = vpop.permute.xlu0 %1530 }
 0x26a   : > { %v1542_v21 = vsel %vm881_vm13, %v1531_v3, %v1533_v39  ;;  %v1527_v44 = vpop.permute.xlu1 %1526  ;;  %v1791_v3 = vld [vmem:[#allocation6 + $0x18] sm:$0xff] }
 0x26b   : > { %1957 = vmatpush2.msra.mxu1 %v1542_v21  ;;  %v1793_v21 = vld [vmem:[#allocation6 + $0x28] sm:$0xff] }
 0x26d   : > { %v1529_v26 = vpop.permute.xlu0 %1528 }
 0x26e   : > { %v1541_v57 = vsel %vm881_vm13, %v1527_v44, %v1529_v26  ;;  %v1525_v12 = vpop.permute.xlu1 %1524  ;;  %v1798_v26 = vld [vmem:[#allocation6 + $0x50] sm:$0xff] }
 0x26f   : > { %1958 = vmatprep.subr.mxu1 %v1541_v57  ;;  %v1540_v41 = vsel %vm881_vm13, %v1525_v12, %v1527_v44  ;;  %v1794_v44 = vld [vmem:[#allocation6 + $0x30] sm:$0xff]  ;;  %v1796_v57 = vld [vmem:[#allocation6 + $0x40] sm:$0xff]  ;;  %v1797_v12 = vld [vmem:[#allocation6 + $0x48] sm:$0xff] }
 0x270   : > { %1959 = vmatpush2.msra.mxu1 %v1540_v41  ;;  %v1799_v41 = vld [vmem:[#allocation6 + $0x58] sm:$0xff] }
 0x271   : > { %v1521_v31 = vpop.permute.xlu0 %1520 }
 0x272   : > { %v1523_v27 = vpop.permute.xlu1 %1522 }
 0x273   : > { %v1539_v29 = vsel %vm881_vm13, %v1521_v31, %v1523_v27  ;;  %v1800_v27 = vld [vmem:[#allocation6 + $0x60] sm:$0xff] }
 0x274   : > { %1960 = vmatprep.subr.mxu1 %v1539_v29  ;;  %v1802_v29 = vld [vmem:[#allocation6 + $0x70] sm:$0xff] }
 0x275   : > { %v1519_v52 = vpop.permute.xlu0 %1518 }
 0x276   : > { %v1538_v30 = vsel %vm881_vm13, %v1519_v52, %v1521_v31  ;;  %v1515_v4 = vpop.permute.xlu1 %1514  ;;  %v1801_v31 = vld [vmem:[#allocation6 + $0x68] sm:$0xff]  ;;  %v1804_v52 = vld [vmem:[#allocation6 + $0x80] sm:$0xff] }
 0x277   : > { %1961 = vmatpush2.msra.mxu1 %v1538_v30  ;;  %v1803_v30 = vld [vmem:[#allocation6 + $0x78] sm:$0xff] }
 0x279   : > { %v1517_v28 = vpop.permute.xlu0 %1516 }
 0x27a   : > { %v1537_v58 = vsel %vm881_vm13, %v1515_v4, %v1517_v28  ;;  %v1513_v56 = vpop.permute.xlu1 %1512  ;;  %v1805_v28 = vld [vmem:[#allocation6 + $0x88] sm:$0xff] }
 0x27b   : > { %1962 = vmatprep.subr.mxu1 %v1537_v58  ;;  %v1536_v48 = vsel %vm881_vm13, %v1513_v56, %v1515_v4  ;;  %v1807_v4 = vld [vmem:[#allocation6 + $0x98] sm:$0xff]  ;;  %v1806_v58 = vld [vmem:[#allocation6 + $0x90] sm:$0xff] }
 0x27c   : > { %1963 = vmatpush2.msra.mxu1 %v1536_v48  ;;  %v1810_v56 = vld [vmem:[#allocation6 + $0xb0] sm:$0xff]  ;;  %v1809_v48 = vld [vmem:[#allocation6 + $0xa8] sm:$0xff] }
 0x27d   : > { %v1443_v53 = vpop.permute.xlu0 %1442 }
 0x27e   : > { %v1445_v40 = vpop.permute.xlu1 %1444 }
 0x27f   : > { %v1453_v43 = vsel %vm864_vm12, %v1443_v53, %v1445_v40  ;;  %v1811_v40 = vld [vmem:[#allocation6 + $0xb8] sm:$0xff] }
 0x280   : > { %1964 = vmatprep.subr.mxu1 %v1453_v43 }
 0x281   : > { %v1761_v54 = vpop.permute.xlu0 %1760 }
 0x282   : > { %v1763_v8 = vpop.permute.xlu1 %1762 }
 0x283   : > { %v1771_v63 = vsel %vm920_vm6, %v1761_v54, %v1763_v8 }
 0x284   : > { %2045 = vmatprep.subr.mxu0 %v1771_v63 }
 0x285   : > { %v1441_v61 = vpop.permute.xlu0 %1440 }
 0x286   : > { %v1452_v59 = vsel %vm864_vm12, %v1441_v61, %v1443_v53  ;;  %v1759_v33 = vpop.permute.xlu1 %1758  ;;  %v1808_v53 = vld [vmem:[#allocation6 + $0xa0] sm:$0xff] }
 0x287   : > { %1965 = vmatpush2.msra.mxu1 %v1452_v59  ;;  %v1770_v50 = vsel %vm920_vm6, %v1759_v33, %v1761_v54 }
 0x288   : > { %2046 = vmatpush1.msra.mxu0 %v1770_v50 }
 0x289   : > { %v1437_v47 = vpop.permute.xlu0 %1436 }
 0x28a   : > { %v1439_v17 = vpop.permute.xlu1 %1438 }
 0x28b   : > { %v1451_v38 = vsel %vm864_vm12, %v1437_v47, %v1439_v17 }
 0x28c   : > { %1966 = vmatprep.subr.mxu1 %v1451_v38 }
 0x28d   : > { %v1755_v34 = vpop.permute.xlu0 %1754 }
 0x28e   : > { %v1757_v7 = vpop.permute.xlu1 %1756 }
 0x28f   : > { %v1769_v46 = vsel %vm920_vm6, %v1755_v34, %v1757_v7 }
 0x290   : > { %2047 = vmatprep.subr.mxu0 %v1769_v46 }
 0x291   : > { %v1435_v10 = vpop.permute.xlu0 %1434 }
 0x292   : > { %v1450_v45 = vsel %vm864_vm12, %v1435_v10, %v1437_v47  ;;  %v1753_v49 = vpop.permute.xlu1 %1752  ;;  %v6265_v10 = vld [vmem:[%s7357_s22] ss:$4 sm:$0x3] }
 0x293   : > { %1967 = vmatpush2.msra.mxu1 %v1450_v45  ;;  %v1768_v13 = vsel %vm920_vm6, %v1753_v49, %v1755_v34  ;;  %7362 = vst [vmem:[#allocation32_spill] sm:$0xff] %v6265_v10  ;;  %v3077_v46 = vrot.slane %v6265_v10, %v5535_v14 }
 0x294   : > { %2048 = vmatpush1.msra.mxu0 %v1768_v13 }
 0x295   : > { %v1431_v5 = vpop.permute.xlu0 %1430  ;;  %3082 = vrot.lane.b32.xlu1 %v3077_v46, %s5215_s30 }
 0x296   : > { %v1433_v1 = vpop.permute.xlu1 %1432 }
 0x297   : > { %v1449_v18 = vsel %vm864_vm12, %v1431_v5, %v1433_v1 }
 0x298   : > { %1968 = vmatprep.subr.mxu1 %v1449_v18 }
 0x299   : > { %v1749_v36 = vpop.permute.xlu0 %1748 }
 0x29a   : > { %v1751_v19 = vpop.permute.xlu1 %1750 }
 0x29b   : > { %v1767_v6 = vsel %vm920_vm6, %v1749_v36, %v1751_v19 }
 0x29c   : > { %2049 = vmatprep.subr.mxu0 %v1767_v6 }
 0x29d   : > { %v1429_v20 = vpop.permute.xlu0 %1428 }
 0x29e   : > { %v1448_v37 = vsel %vm864_vm12, %v1429_v20, %v1431_v5  ;;  %v1747_v42 = vpop.permute.xlu1 %1746 }
 0x29f   : > { %1969 = vmatpush2.msra.mxu1 %v1448_v37  ;;  %v1766_v51 = vsel %vm920_vm6, %v1747_v42, %v1749_v36 }
 0x2a0   : > { %2050 = vmatpush1.msra.mxu0 %v1766_v51 }
 0x2a1   : > { %v1425_v62 = vpop.permute.xlu0 %1424 }
 0x2a2   : > { %v1427_v9 = vpop.permute.xlu1 %1426 }
 0x2a3   : > { %v1447_v16 = vsel %vm864_vm12, %v1425_v62, %v1427_v9 }
 0x2a4   : > { %1970 = vmatprep.subr.mxu1 %v1447_v16 }
 0x2a5   : > { %v1743_v11 = vpop.permute.xlu0 %1742 }
 0x2a6   : > { %v1745_v60 = vpop.permute.xlu1 %1744 }
 0x2a7   : > { %v1765_v22 = vsel %vm920_vm6, %v1743_v11, %v1745_v60 }
 0x2a8   : > { %2051 = vmatprep.subr.mxu0 %v1765_v22 }
 0x2a9   : > { %v1423_v55 = vpop.permute.xlu0 %1422 }
 0x2aa   : > { %v1446_v39 = vsel %vm864_vm12, %v1423_v55, %v1425_v62  ;;  %v1741_v2 = vpop.permute.xlu1 %1740 }
 0x2ab   : > { %1971 = vmatpush2.msra.mxu1 %v1446_v39  ;;  %v1764_v35 = vsel %vm920_vm6, %v1741_v2, %v1743_v11 }
 0x2ac   : > { %1973 = vmatmul.mubr.f32.vlgmr.msra.gmra.mxu1 %v1788_v32  ;;  %2052 = vmatpush1.msra.mxu0 %v1764_v35 }
 0x2ad   : > { %1978 = vmatprep.mubr.f32.mxu1 %v1792_v23  ;;  %4497 = vmatmul.mubr.msk.f32.vlgmr.msra.gmra.mxu0 %vm791_vm3, %v1790_v24 }
 0x2ae   : > { %2091 = vmatprep.mubr.f32.mxu0 %v7309_v25 }
 0x2b0   : > { %1979 = vmatmul.mubr.f32.gmra.mxu1 %v1791_v3 }
 0x2b1   : > { %1984 = vmatprep.mubr.f32.mxu1 %v1795_v0  ;;  %4498 = vmatmul.mubr.msk.f32.gmra.mxu0 %vm791_vm3, %v1793_v21 }
 0x2b2   : > { %2097 = vmatprep.mubr.f32.mxu0 %v7309_v25 }
 0x2b4   : > { %1985 = vmatmul.mubr.f32.gmra.mxu1 %v1794_v44 }
 0x2b5   : > { %1990 = vmatprep.mubr.f32.mxu1 %v1798_v26  ;;  %4499 = vmatmul.mubr.msk.f32.gmra.mxu0 %vm791_vm3, %v1796_v57 }
 0x2b6   : > { %2103 = vmatprep.mubr.f32.mxu0 %v7309_v25 }
 0x2b8   : > { %1991 = vmatmul.mubr.f32.gmra.mxu1 %v1797_v12 }
 0x2b9   : > { %1996 = vmatprep.mubr.f32.mxu1 %v1801_v31  ;;  %4500 = vmatmul.mubr.msk.f32.gmra.mxu0 %vm791_vm3, %v1799_v41 }
 0x2ba   : > { %2109 = vmatprep.mubr.f32.mxu0 %v7309_v25 }
 0x2bc   : > { %1997 = vmatmul.mubr.f32.gmra.mxu1 %v1800_v27 }
 0x2bd   : > { %2002 = vmatprep.mubr.f32.mxu1 %v1804_v52  ;;  %4501 = vmatmul.mubr.msk.f32.gmra.mxu0 %vm791_vm3, %v1802_v29 }
 0x2be   : > { %2115 = vmatprep.mubr.f32.mxu0 %v7309_v25 }
 0x2c0   : > { %2003 = vmatmul.mubr.f32.gmra.mxu1 %v1803_v30  ;;  %v2191_v30 = vpop.permute.xlu1 %2190 }
 0x2c1   : > { %2008 = vmatprep.mubr.f32.mxu1 %v1807_v4  ;;  %4502 = vmatmul.mubr.msk.f32.gmra.mxu0 %vm791_vm3, %v1805_v28 }
 0x2c2   : > { %2121 = vmatprep.mubr.f32.mxu0 %v7309_v25 }
 0x2c4   : > { %2009 = vmatmul.mubr.f32.gmra.mxu1 %v1806_v58  ;;  %v2196_v58 = vpop.permute.xlu0 %2195 }
 0x2c5   : > { %2014 = vmatprep.mubr.f32.mxu1 %v1810_v56  ;;  %4503 = vmatmul.mubr.msk.f32.gmra.mxu0 %vm791_vm3, %v1808_v53 }
 0x2c6   : > { %2127 = vmatprep.mubr.f32.mxu0 %v7309_v25 }
 0x2c8   : > { %2015 = vmatmul.mubr.f32.gmra.mxu1 %v1809_v48  ;;  %v2181_v10 = vpop.permute.xlu0 %2180 }
 0x2c9   : > { %2440 = vmatprep.mubr.f32.mxu1 %v7309_v25  ;;  %4504 = vmatmul.mubr.msk.f32.gmra.mxu0 %vm791_vm3, %v1811_v40 }
 0x2ca   : > { %2311 = vmatprep.mubr.f32.mxu0 %v7309_v25 }
 0x2d9   : > { %v6238_v54 = vpop.f32.mrf.mxu0 }
 0x2da   : > { %7360 = vst [vmem:[#allocation30_spill] sm:$0xff] %v6238_v54 }
 0x2db   : > { %v6240_v43 = vpop.f32.mrf.mxu0 }
 0x2dc   : > { %7361 = vst [vmem:[#allocation31_spill] sm:$0xff] %v6240_v43 }
 0x2dd   : > { %v6242_v8 = vpop.f32.mrf.mxu0 }
 0x2df   : > { %v6244_v61 = vpop.f32.mrf.mxu0 }
 0x2e1   : > { %v6246_v63 = vpop.f32.mrf.mxu0 }
 0x2e3   : > { %v6248_v59 = vpop.f32.mrf.mxu0 }
 0x2e5   : > { %v6250_v33 = vpop.f32.mrf.mxu0 }
 0x2e7   : > { %v6252_v50 = vpop.f32.mrf.mxu0 }
 0x2e9   : > { %v6254_v47 = vpop.f32.mrf.mxu0 }
 0x2eb   : > { %v6256_v17 = vpop.f32.mrf.mxu0 }
 0x2ed   : > { %v6258_v34 = vpop.f32.mrf.mxu0 }
 0x2ef   : > { %v6260_v38 = vpop.f32.mrf.mxu0 }
 0x2f1   : > { %v1087_v7 = vpop.f32.mrf.mxu0 }
 0x2f3   : > { %v1089_v45 = vpop.f32.mrf.mxu0 }
 0x2f5   : > { %v1093_v49 = vpop.f32.mrf.mxu0 }
 0x2f7   : > { %v1095_v13 = vpop.f32.mrf.mxu0 }
 0x2f9   : > { %v6270_v5 = vpop.f32.mrf.mxu0 }
 0x2fa   : > { %7363 = vst [vmem:[#allocation33_spill] sm:$0xff] %v6270_v5 }
 0x2fb   : > { %v6272_v1 = vpop.f32.mrf.mxu0 }
 0x2fc   : > { %7364 = vst [vmem:[#allocation34_spill] sm:$0xff] %v6272_v1 }
 0x2fd   : > { %v6274_v36 = vpop.f32.mrf.mxu0 }
 0x2fe   : > { %7365 = vst [vmem:[#allocation35_spill] sm:$0xff] %v6274_v36  ;;  %v2186_v36 = vpop.permute.xlu1 %2185 }
 0x2ff   : > { %v6276_v18 = vpop.f32.mrf.mxu0 }
 0x300   : > { %7366 = vst [vmem:[#allocation36_spill] sm:$0xff] %v6276_v18 }
 0x301   : > { %v6278_v19 = vpop.f32.mrf.mxu0 }
 0x302   : > { %7367 = vst [vmem:[#allocation37_spill] sm:$0xff] %v6278_v19 }
 0x303   : > { %v6280_v20 = vpop.f32.mrf.mxu0 }
 0x304   : > { %7368 = vst [vmem:[#allocation38_spill] sm:$0xff] %v6280_v20 }
 0x305   : > { %v6282_v6 = vpop.f32.mrf.mxu0 }
 0x306   : > { %7369 = vst [vmem:[#allocation39_spill] sm:$0xff] %v6282_v6 }
 0x307   : > { %v6284_v42 = vpop.f32.mrf.mxu0 }
 0x308   : > { %7370 = vst [vmem:[#allocation40_spill] sm:$0xff] %v6284_v42 }
 0x36c   : > { %v1974_v37 = vpop.f32.mrf.mxu1 }
 0x36d   : > { %v2087_v62 = vpop.f32.mrf.mxu0 }
 0x36e   : > { %v1976_v51 = vpop.f32.mrf.mxu1 }
 0x36f   : > { %v2089_v11 = vpop.f32.mrf.mxu0 }
 0x370   : > { %v6286_v9 = vpop.f32.mrf.mxu1 }
 0x371   : > { %v2093_v60 = vpop.f32.mrf.mxu0 }
 0x372   : > { %v1982_v16 = vpop.f32.mrf.mxu1 }
 0x373   : > { %v2095_v22 = vpop.f32.mrf.mxu0 }
 0x374   : > { %v1986_v55 = vpop.f32.mrf.mxu1 }
 0x375   : > { %v2099_v39 = vpop.f32.mrf.mxu0 }
 0x376   : > { %v1988_v32 = vpop.f32.mrf.mxu1 }
 0x377   : > { %v2101_v2 = vpop.f32.mrf.mxu0 }
 0x378   : > { %v1992_v23 = vpop.f32.mrf.mxu1 }
 0x379   : > { %v2105_v35 = vpop.f32.mrf.mxu0 }
 0x37a   : > { %v1994_v24 = vpop.f32.mrf.mxu1 }
 0x37b   : > { %v2107_v0 = vpop.f32.mrf.mxu0 }
 0x37c   : > { %v1998_v3 = vpop.f32.mrf.mxu1  ;;  %v2108_v15 = vadd.f32 %v2107_v0, %v1994_v24 }
 0x37d   : > { %v2111_v44 = vpop.f32.mrf.mxu0 }
 0x37e   : > { %v2000_v21 = vpop.f32.mrf.mxu1  ;;  %v2112_v6 = vadd.f32 %v2111_v44, %v1998_v3 }
 0x37f   : > { %v2113_v57 = vpop.f32.mrf.mxu0 }
 0x380   : > { %v2004_v26 = vpop.f32.mrf.mxu1  ;;  %v2114_v18 = vadd.f32 %v2113_v57, %v2000_v21 }
 0x381   : > { %v2117_v31 = vpop.f32.mrf.mxu0 }
 0x382   : > { %v2006_v12 = vpop.f32.mrf.mxu1  ;;  %v2118_v25 = vadd.f32 %v2117_v31, %v2004_v26  ;;  %v2102_v26 = vadd.f32 %v2101_v2, %v1988_v32  ;;  %v2143_v31 = vadd.f32 %v2114_v18, %v6256_v17 }
 0x383   : > { %v2119_v27 = vpop.f32.mrf.mxu0 }
 0x384   : > { %v2010_v41 = vpop.f32.mrf.mxu1  ;;  %v2120_v40 = vadd.f32 %v2119_v27, %v2006_v12  ;;  %v2144_v12 = vadd.f32 %v2118_v25, %v6258_v34 }
 0x385   : > { %v2123_v29 = vpop.f32.mrf.mxu0 }
 0x386   : > { %v2012_v52 = vpop.f32.mrf.mxu1  ;;  %v2124_v53 = vadd.f32 %v2123_v29, %v2010_v41  ;;  %v2145_v54 = vadd.f32 %v2120_v40, %v6260_v38  ;;  %v2106_v41 = vadd.f32 %v2105_v35, %v1992_v23  ;;  %v2176_v38 = vpop.permute.xlu1 %2175  ;;  %v6308_v18 = vadd.f32 %v2186_v36, %v2144_v12  ;;  %v2214_v29 = vld [vmem:[#allocation14] sm:$0xff]  ;;  %v2219_v40 = vld [vmem:[#allocation14 + $0x28] sm:$0xff] }
 0x387   : > { %v2125_v28 = vpop.f32.mrf.mxu0 }
 0x388   : > { %v2016_v4 = vpop.f32.mrf.mxu1  ;;  %v2126_v56 = vadd.f32 %v2125_v28, %v2012_v52  ;;  %v2146_v14 = vadd.f32 %v2124_v53, %v1087_v7  ;;  %v2088_v52 = vadd.f32 %v2087_v62, %v1974_v37  ;;  %v2100_v7 = vadd.f32 %v2099_v39, %v1986_v55  ;;  %v2217_v53 = vld [vmem:[#allocation14 + $0x18] sm:$0xff] }
 0x389   : > { %v2129_v48 = vpop.f32.mrf.mxu0  ;;  %v6304_v17 = vadd.f32 %v2186_v36, %v2145_v54  ;;  %v2140_v34 = vadd.f32 %v2106_v41, %v6250_v33  ;;  %v7381_v28 = vmov 0.0  }
 0x38a   : > { %v2130_v46 = vadd.f32 %v2129_v48, %v2016_v4  ;;  %v2018_v5 = vpop.f32.mrf.mxu1  ;;  %v2147_v19 = vadd.f32 %v2126_v56, %v1089_v45  ;;  %v2138_v33 = vadd.f32 %v2100_v7, %v6246_v63  ;;  %v2166_v62 = vpop.permute.xlu1 %2165  ;;  %v2216_v56 = vld [vmem:[#allocation14 + $0x10] sm:$0xff]  ;;  %v2218_v48 = vld [vmem:[#allocation14 + $0x20] sm:$0xff] }
 0x38b   : > { %v2131_v1 = vpop.f32.mrf.mxu0 }
 0x38c   : > { %v2148_v42 = vadd.f32 %v2130_v46, %v1093_v49  ;;  %v2132_v20 = vadd.f32 %v2131_v1, %v2018_v5  ;;  %v6295_v45 = vadd.f32 %v2191_v30, %v2147_v19  ;;  %v2090_v49 = vadd.f32 %v2089_v11, %v1976_v51  ;;  %v7373_v51 = vld [vmem:[#allocation31_spill] sm:$0xff]  ;;  %v2220_v46 = vld [vmem:[#allocation14 + $0x30] sm:$0xff] }
 0x38d   : > { %v2142_v5 = vadd.f32 %v2112_v6, %v6254_v47  ;;  %v6298_v1 = vadd.f32 %v2191_v30, %v2146_v14  ;;  %v2171_v47 = vpop.permute.xlu0 %2170  ;;  %v2371_v6 = vmul.f32 %v6304_v17, %v6304_v17 }
 0x38e   : > { %v2149_v43 = vadd.f32 %v2132_v20, %v1095_v13  ;;  %v6290_v27 = vadd.f32 %v2196_v58, %v2148_v42  ;;  %v2096_v13 = vadd.f32 %v2095_v22, %v1982_v16  ;;  %v2141_v20 = vadd.f32 %v2108_v15, %v6252_v50 }
 0x38f   : > { %v2139_v15 = vadd.f32 %v2102_v26, %v6248_v59  ;;  %v2373_v54 = vmul.f32 %v6295_v45, %v6295_v45  ;;  %v6317_v50 = vadd.f32 %v2181_v10, %v2143_v31  ;;  %v6320_v36 = vadd.f32 %v2181_v10, %v2142_v5 }
 0x390   : > { %v6293_v21 = vadd.f32 %v2196_v58, %v2149_v43  ;;  %v2094_v43 = vadd.f32 %v2093_v60, %v6286_v9  ;;  %v2374_v14 = vmul.f32 %v6290_v27, %v6290_v27  ;;  %v2372_v19 = vmul.f32 %v6298_v1, %v6298_v1  ;;  %v2215_v58 = vld [vmem:[#allocation14 + $0x8] sm:$0xff] }
 0x391   : > { %v2137_v59 = vadd.f32 %v2096_v13, %v6244_v61  ;;  %v6329_v37 = vadd.f32 %v2176_v38, %v2141_v20  ;;  %v6332_v10 = vadd.f32 %v2176_v38, %v2140_v34  ;;  %v2370_v42 = vmul.f32 %v6308_v18, %v6308_v18  ;;  %v2161_v22 = vpop.permute.xlu0 %2160 }
 0x392   : > { %2263 = vmatprep.subr.mxu0 %v6293_v21  ;;  %v2375_v25 = vmul.f32 %v6293_v21, %v6293_v21  ;;  %v2136_v63 = vadd.f32 %v2094_v43, %v6242_v8  ;;  %v2135_v61 = vadd.f32 %v2090_v49, %v7373_v51  ;;  %v2369_v9 = vmul.f32 %v6317_v50, %v6317_v50  ;;  %v7375_v8 = vld [vmem:[#allocation30_spill] sm:$0xff] }
 0x393   : > { %2264 = vmatpush1.msra.mxu0 %v6290_v27  ;;  %7371 = vst [vmem:[#allocation41_spill] sm:$0xff] %v6329_v37  ;;  %7372 = vst [vmem:[#allocation42_spill] sm:$0xff] %v6332_v10  ;;  %v6341_v11 = vadd.f32 %v2171_v47, %v2139_v15  ;;  %v2134_v16 = vadd.f32 %v2088_v52, %v7375_v8  ;;  %v6344_v60 = vadd.f32 %v2171_v47, %v2138_v33  ;;  %v2221_v52 = vld [vmem:[#allocation14 + $0x38] sm:$0xff] }
 0x394   : > { %2265 = vmatprep.subr.mxu0 %v6295_v45  ;;  %2392 = vmatprep.subr.mxu1 %v2375_v25  ;;  %v2368_v55 = vmul.f32 %v6320_v36, %v6320_v36  ;;  %v6349_v32 = vadd.f32 %v2166_v62, %v2137_v59  ;;  %v2367_v39 = vmul.f32 %v6329_v37, %v6329_v37 }
 0x395   : > { %2266 = vmatpush1.msra.mxu0 %v6298_v1  ;;  %2393 = vmatpush1.msra.mxu1 %v2374_v14  ;;  %7374 = vst [vmem:[#allocation31_spill] sm:$0xff] %v6341_v11  ;;  %7376 = vst [vmem:[#allocation30_spill] sm:$0xff] %v6344_v60  ;;  %v6354_v23 = vadd.f32 %v2166_v62, %v2136_v63  ;;  %v2366_v2 = vmul.f32 %v6332_v10, %v6332_v10 }
 0x396   : > { %2267 = vmatprep.subr.mxu0 %v6304_v17  ;;  %2394 = vmatprep.subr.mxu1 %v2373_v54  ;;  %7377 = vst [vmem:[#allocation43_spill] sm:$0xff] %v6349_v32  ;;  %v6359_v24 = vadd.f32 %v2161_v22, %v2135_v61  ;;  %v2365_v35 = vmul.f32 %v6341_v11, %v6341_v11 }
 0x397   : > { %2268 = vmatpush1.msra.mxu0 %v6308_v18  ;;  %2395 = vmatpush1.msra.mxu1 %v2372_v19  ;;  %7378 = vst [vmem:[#allocation44_spill] sm:$0xff] %v6354_v23  ;;  %v6364_v3 = vadd.f32 %v2161_v22, %v2134_v16  ;;  %v2364_v0 = vmul.f32 %v6344_v60, %v6344_v60 }
 0x398   : > { %2269 = vmatprep.subr.mxu0 %v6317_v50  ;;  %2396 = vmatprep.subr.mxu1 %v2371_v6  ;;  %7379 = vst [vmem:[#allocation45_spill] sm:$0xff] %v6359_v24  ;;  %v2363_v44 = vmul.f32 %v6349_v32, %v6349_v32  ;;  %v2362_v57 = vmul.f32 %v6354_v23, %v6354_v23 }
 0x399   : > { %2270 = vmatpush1.msra.mxu0 %v6320_v36  ;;  %2397 = vmatpush1.msra.mxu1 %v2370_v42  ;;  %7380 = vst [vmem:[#allocation46_spill] sm:$0xff] %v6364_v3  ;;  %v2361_v30 = vmul.f32 %v6359_v24, %v6359_v24  ;;  %v2360_v4 = vmul.f32 %v6364_v3, %v6364_v3 }
 0x39a   : > { %2271 = vmatprep.subr.mxu0 %v6329_v37  ;;  %2398 = vmatprep.subr.mxu1 %v2369_v9 }
 0x39b   : > { %2272 = vmatpush1.msra.mxu0 %v6332_v10  ;;  %2399 = vmatpush1.msra.mxu1 %v2368_v55 }
 0x39c   : > { %2273 = vmatprep.subr.mxu0 %v6341_v11  ;;  %2400 = vmatprep.subr.mxu1 %v2367_v39 }
 0x39d   : > { %2274 = vmatpush1.msra.mxu0 %v6344_v60  ;;  %2401 = vmatpush1.msra.mxu1 %v2366_v2 }
 0x39e   : > { %2275 = vmatprep.subr.mxu0 %v6349_v32  ;;  %2402 = vmatprep.subr.mxu1 %v2365_v35 }
 0x39f   : > { %2276 = vmatpush1.msra.mxu0 %v6354_v23  ;;  %2403 = vmatpush1.msra.mxu1 %v2364_v0 }
 0x3a0   : > { %2277 = vmatprep.subr.mxu0 %v6359_v24  ;;  %2404 = vmatprep.subr.mxu1 %v2363_v44 }
 0x3a1   : > { %2278 = vmatpush1.msra.mxu0 %v6364_v3  ;;  %2405 = vmatpush1.msra.mxu1 %v2362_v57 }
 0x3a2   : > { %4505 = vmatmul.mubr.msk.f32.vlgmr.msra.gmra.mxu0 %vm2222_vm7, %v2214_v29  ;;  %2406 = vmatprep.subr.mxu1 %v2361_v30 }
 0x3a3   : > { %2407 = vmatpush1.msra.mxu1 %v2360_v4  ;;  %2317 = vmatprep.mubr.f32.mxu0 %v7381_v28 }
 0x3a4   : > { %4513 = vmatmul.mubr.msk.f32.vlgmr.msra.gmra.mxu1 %vm2222_vm7, %v2214_v29 }
 0x3a5   : > { %2446 = vmatprep.mubr.f32.mxu1 %v7381_v28 }
 0x3a6   : > { %4506 = vmatmul.mubr.msk.f32.gmra.mxu0 %vm2222_vm7, %v2215_v58 }
 0x3a7   : > { %2323 = vmatprep.mubr.f32.mxu0 %v7381_v28 }
 0x3a8   : > { %4514 = vmatmul.mubr.msk.f32.gmra.mxu1 %vm2222_vm7, %v2215_v58 }
 0x3a9   : > { %2452 = vmatprep.mubr.f32.mxu1 %v7381_v28 }
 0x3aa   : > { %4507 = vmatmul.mubr.msk.f32.gmra.mxu0 %vm2222_vm7, %v2216_v56 }
 0x3ab   : > { %2329 = vmatprep.mubr.f32.mxu0 %v7381_v28 }
 0x3ac   : > { %4515 = vmatmul.mubr.msk.f32.gmra.mxu1 %vm2222_vm7, %v2216_v56 }
 0x3ad   : > { %2458 = vmatprep.mubr.f32.mxu1 %v7381_v28 }
 0x3ae   : > { %4508 = vmatmul.mubr.msk.f32.gmra.mxu0 %vm2222_vm7, %v2217_v53 }
 0x3af   : > { %2335 = vmatprep.mubr.f32.mxu0 %v7381_v28 }
 0x3b0   : > { %4516 = vmatmul.mubr.msk.f32.gmra.mxu1 %vm2222_vm7, %v2217_v53 }
 0x3b1   : > { %2464 = vmatprep.mubr.f32.mxu1 %v7381_v28 }
 0x3b2   : > { %4509 = vmatmul.mubr.msk.f32.gmra.mxu0 %vm2222_vm7, %v2218_v48 }
 0x3b3   : > { %2341 = vmatprep.mubr.f32.mxu0 %v7381_v28 }
 0x3b4   : > { %4517 = vmatmul.mubr.msk.f32.gmra.mxu1 %vm2222_vm7, %v2218_v48 }
 0x3b5   : > { %2470 = vmatprep.mubr.f32.mxu1 %v7381_v28 }
 0x3b6   : > { %4510 = vmatmul.mubr.msk.f32.gmra.mxu0 %vm2222_vm7, %v2219_v40 }
 0x3b7   : > { %2347 = vmatprep.mubr.f32.mxu0 %v7381_v28 }
 0x3b8   : > { %4518 = vmatmul.mubr.msk.f32.gmra.mxu1 %vm2222_vm7, %v2219_v40 }
 0x3b9   : > { %2476 = vmatprep.mubr.f32.mxu1 %v7381_v28 }
 0x3ba   : > { %4511 = vmatmul.mubr.msk.f32.gmra.mxu0 %vm2222_vm7, %v2220_v46 }
 0x3bb   : > { %2353 = vmatprep.mubr.f32.mxu0 %v7381_v28 }
 0x3bc   : > { %4519 = vmatmul.mubr.msk.f32.gmra.mxu1 %vm2222_vm7, %v2220_v46 }
 0x3bd   : > { %2482 = vmatprep.mubr.f32.mxu1 %v7381_v28 }
 0x3be   : > { %4512 = vmatmul.mubr.msk.f32.gmra.mxu0 %vm2222_vm7, %v2221_v52 }
 0x3c0   : > { %4520 = vmatmul.mubr.msk.f32.gmra.mxu1 %vm2222_vm7, %v2221_v52 }
 0x3c1   : > { %3777 = vmatprep.mubr.f32.mxu1 %v7381_v28 }
 0x462   : > { %v2313_v41 = vpop.f32.mrf.mxu0 }
 0x464   : > { %v2315_v12 = vpop.f32.mrf.mxu0  ;;  %v2442_v26 = vpop.f32.mrf.mxu1 }
 0x465   : > { %v6412_v31 = vadd.f32 %v2315_v12, %v2313_v41  ;;  %v7382_v12 = vld [vmem:[#allocation29_spill] sm:$0xff] }
 0x466   : > { %v2319_v49 = vpop.f32.mrf.mxu0  ;;  %v2444_v7 = vpop.f32.mrf.mxu1 }
 0x467   : > { %v6414_v5 = vadd.f32 %v2444_v7, %v2442_v26  ;;  %v7383_v26 = vld [vmem:[#allocation32_spill] sm:$0xff] }
 0x468   : > { %v2321_v38 = vpop.f32.mrf.mxu0  ;;  %v2448_v13 = vpop.f32.mrf.mxu1  ;;  %v4537_v7 = vld [vmem:[%s7357_s22 + $0x2] ss:$4 sm:$0x3] }
 0x469   : > { %v6416_v20 = vadd.f32 %v2321_v38, %v2319_v49  ;;  %v3081_v49 = vrot.slane %v7383_v26, %v7382_v12  ;;  %v2991_v38 = vrot.slane %v4537_v7, %v7382_v12 }
 0x46a   : > { %v2325_v25 = vpop.f32.mrf.mxu0  ;;  %v2450_v43 = vpop.f32.mrf.mxu1 }
 0x46b   : > { %v6418_v34 = vadd.f32 %v2450_v43, %v2448_v13  ;;  %v7384_v13 = vld [vmem:[#allocation28_spill] sm:$0xff] }
 0x46c   : > { %v2327_v14 = vpop.f32.mrf.mxu0  ;;  %v2454_v47 = vpop.f32.mrf.mxu1  ;;  %v3300_v43 = vld [vmem:[%s7357_s22] ss:$4 sm:$0x3] }
 0x46d   : > { %v6420_v15 = vadd.f32 %v2327_v14, %v2325_v25  ;;  %v2987_v25 = vrot.slane %v4537_v7, %v7384_v13  ;;  %v3309_v14 = vrot.slane %v3300_v43, %v7382_v12 }
 0x46e   : > { %v2331_v54 = vpop.f32.mrf.mxu0  ;;  %v2456_v33 = vpop.f32.mrf.mxu1 }
 0x46f   : > { %v6422_v19 = vadd.f32 %v2456_v33, %v2454_v47  ;;  %v3305_v47 = vrot.slane %v3300_v43, %v7384_v13  ;;  %v4539_v33 = vld [vmem:[%s7357_s22 + $0x2] ss:$4 sm:$0x3] }
 0x470   : > { %v2333_v59 = vpop.f32.mrf.mxu0  ;;  %v2460_v6 = vpop.f32.mrf.mxu1 }
 0x471   : > { %v6424_v63 = vadd.f32 %v2333_v59, %v2331_v54  ;;  %v4538_v54 = vld [vmem:[%s7357_s22 + $0x2] ss:$4 sm:$0x3] }
 0x472   : > { %v2337_v42 = vpop.f32.mrf.mxu0  ;;  %v2462_v51 = vpop.f32.mrf.mxu1  ;;  %v3219_v59 = vrot.slane %v4538_v54, %v7382_v12 }
 0x473   : > { %v6426_v61 = vadd.f32 %v2462_v51, %v2460_v6  ;;  %v3215_v6 = vrot.slane %v4538_v54, %v7384_v13  ;;  %v3443_v51 = vrot.slane %v4539_v33, %v7384_v13 }
 0x474   : > { %v2339_v62 = vpop.f32.mrf.mxu0  ;;  %v2466_v9 = vpop.f32.mrf.mxu1 }
 0x475   : > { %v2501_v8 = vadd.f32 %v2339_v62, %v2337_v42  ;;  %v3447_v42 = vrot.slane %v4539_v33, %v7382_v12  ;;  %v6459_v62 = vpop.permute.xlu1 %2658 }
 0x476   : > { %v2343_v16 = vpop.f32.mrf.mxu0  ;;  %v2468_v55 = vpop.f32.mrf.mxu1 }
 0x477   : > { %2502 = vadd.xlane.f32.xlu1 %v2501_v8  ;;  %v2534_v2 = vadd.f32 %v2468_v55, %v2466_v9  ;;  %v6463_v8 = vpop.permute.xlu0 %2663 }
 0x478   : > { %v2345_v22 = vpop.f32.mrf.mxu0  ;;  %v2472_v39 = vpop.f32.mrf.mxu1 }
 0x479   : > { %v2504_v44 = vadd.f32 %v2345_v22, %v2343_v16  ;;  %v6461_v9 = vpop.permute.xlu1 %2727 }
 0x47a   : > { %v2349_v35 = vpop.f32.mrf.mxu0  ;;  %v2474_v0 = vpop.f32.mrf.mxu1 }
 0x47b   : > { %v2537_v57 = vadd.f32 %v2474_v0, %v2472_v39  ;;  %2535 = vadd.xlane.f32.xlu1 %v2534_v2  ;;  %v2654_v55 = vpop.permute.xlu0 %2653 }
 0x47c   : > { %v2351_v29 = vpop.f32.mrf.mxu0  ;;  %v2478_v30 = vpop.f32.mrf.mxu1 }
 0x47d   : > { %v2507_v4 = vadd.f32 %v2351_v29, %v2349_v35  ;;  %2538 = vadd.xlane.f32.xlu0 %v2537_v57  ;;  %v6465_v16 = vpop.permute.xlu1 %2722 }
 0x47e   : > { %v2355_v58 = vpop.f32.mrf.mxu0  ;;  %v2480_v56 = vpop.f32.mrf.mxu1 }
 0x47f   : > { %2505 = vadd.xlane.f32.xlu1 %v2504_v44  ;;  %v2540_v46 = vadd.f32 %v2480_v56, %v2478_v30  ;;  %v2649_v39 = vpop.permute.xlu0 %2648 }
 0x480   : > { %v2357_v53 = vpop.f32.mrf.mxu0  ;;  %v2484_v48 = vpop.f32.mrf.mxu1 }
 0x481   : > { %v2510_v40 = vadd.f32 %v2357_v53, %v2355_v58  ;;  %2508 = vadd.xlane.f32.xlu0 %v2507_v4  ;;  %v2718_v22 = vpop.permute.xlu1 %2717 }
 0x482   : > { %v2486_v52 = vpop.f32.mrf.mxu1 }
 0x483   : > { %2511 = vadd.xlane.f32.xlu1 %v2510_v40  ;;  %v2543_v41 = vadd.f32 %v2486_v52, %v2484_v48  ;;  %v2713_v44 = vpop.permute.xlu0 %2712 }
 0x485   : > { %2541 = vadd.xlane.f32.xlu0 %v2540_v46  ;;  %v6467_v2 = vpop.permute.xlu1 %3082 }
 0x489   : > { %2544 = vadd.xlane.f32.xlu0 %v2543_v41 }
 0x494   : > { %2992 = vrot.lane.b32.xlu1 %v2987_v25, %s5219_s21 }
 0x498   : > { %3310 = vrot.lane.b32.xlu1 %v3305_v47, %s5218_s3 }
 0x49c   : > { %3220 = vrot.lane.b32.xlu1 %v3215_v6, %s5217_s27 }
 0x49f   : > { %3084 = vrot.lane.b32.xlu0 %v3081_v49, %s5215_s30 }
 0x4a0   : > { %3448 = vrot.lane.b32.xlu1 %v3443_v51, %s5216_s24 }
 0x4a3   : > { %2994 = vrot.lane.b32.xlu0 %v2991_v38, %s5219_s21 }
 0x4a7   : > { %3312 = vrot.lane.b32.xlu0 %v3309_v14, %s5218_s3 }
 0x4ab   : > { %3222 = vrot.lane.b32.xlu0 %v3219_v59, %s5217_s27 }
 0x4af   : > { %3450 = vrot.lane.b32.xlu0 %v3447_v42, %s5216_s24 }
 0x500   : > { %v2503_v35 = vpop.xlane.xlu1 %2502 }
 0x501   : > { %v2518_v0 = vmul.f32 0.00024414063, %v2503_v35 }
 0x503   : > { %v2558_v29 = vmul.f32 %v2518_v0, %v2518_v0  ;;  %v2594_v51 = vsub.f32 %v6320_v36, %v2518_v0  ;;  %v2595_v35 = vsub.f32 %v6317_v50, %v2518_v0 }
 0x504   : > { %v2536_v57 = vpop.xlane.xlu1 %2535 }
 0x505   : > { %v2550_v30 = vmul.f32 0.00024414063, %v2536_v57 }
 0x506   : > { %v2539_v4 = vpop.xlane.xlu0 %2538 }
 0x507   : > { %v2566_v58 = vsub.f32 %v2550_v30, %v2558_v29  ;;  %v2551_v48 = vmul.f32 0.00024414063, %v2539_v4 }
 0x508   : > { %v2506_v56 = vpop.xlane.xlu1 %2505 }
 0x509   : > { %v2574_v53 = vadd.f32 1e-05, %v2566_v58  ;;  %v2519_v40 = vmul.f32 0.00024414063, %v2506_v56 }
 0x50a   : > { %v2509_v46 = vpop.xlane.xlu0 %2508 }
 0x50b   : > { %4729 = vrsqrt.f32 %v2574_v53  ;;  %v2559_v52 = vmul.f32 %v2519_v40, %v2519_v40  ;;  %v2520_v41 = vmul.f32 0.00024414063, %v2509_v46  ;;  %v2596_v46 = vsub.f32 %v6308_v18, %v2519_v40 }
 0x50c   : > { %v2512_v26 = vpop.xlane.xlu1 %2511 }
 0x50d   : > { %v2567_v49 = vsub.f32 %v2551_v48, %v2559_v52  ;;  %v2560_v7 = vmul.f32 %v2520_v41, %v2520_v41  ;;  %v2521_v43 = vmul.f32 0.00024414063, %v2512_v26  ;;  %v2597_v52 = vsub.f32 %v6304_v17, %v2519_v40 }
 0x50e   : > { %v2542_v38 = vpop.xlane.xlu0 %2541  ;;  %v2598_v50 = vsub.f32 %v6298_v1, %v2520_v41 }
 0x50f   : > { %v2575_v25 = vadd.f32 1e-05, %v2567_v49  ;;  %v2552_v14 = vmul.f32 0.00024414063, %v2542_v38  ;;  %v2561_v54 = vmul.f32 %v2521_v43, %v2521_v43  ;;  %v2600_v17 = vsub.f32 %v6290_v27, %v2521_v43 }
 0x511   : > { %4731 = vrsqrt.f32 %v2575_v25  ;;  %v2568_v47 = vsub.f32 %v2552_v14, %v2560_v7  ;;  %v2599_v14 = vsub.f32 %v6295_v45, %v2520_v41 }
 0x512   : > { %v2545_v33 = vpop.xlane.xlu0 %2544 }
 0x513   : > { %v2576_v59 = vadd.f32 1e-05, %v2568_v47  ;;  %v2553_v6 = vmul.f32 0.00024414063, %v2545_v33 }
 0x515   : > { %4733 = vrsqrt.f32 %v2576_v59  ;;  %v2569_v42 = vsub.f32 %v2553_v6, %v2561_v54 }
 0x517   : > { %v2577_v57 = vadd.f32 1e-05, %v2569_v42  ;;  %v2601_v42 = vsub.f32 %v6293_v21, %v2521_v43 }
 0x518   : > { %v4730_v29 = vpop.eup %4729 }
 0x519   : > { %v2610_v30 = vmul.f32 %v4730_v29, %v2594_v51  ;;  %v2611_v4 = vmul.f32 %v4730_v29, %v2595_v35  ;;  %4735 = vrsqrt.f32 %v2577_v57 }
 0x51b   : > { %v2674_v58 = vmul.f32 %v2649_v39, %v2610_v30  ;;  %v2675_v56 = vmul.f32 %v2649_v39, %v2611_v4 }
 0x51d   : > { %v2738_v53 = vadd.f32 %v2713_v44, %v2674_v58  ;;  %v2739_v48 = vadd.f32 %v2713_v44, %v2675_v56 }
 0x51e   : > { %v4732_v26 = vpop.eup %4731 }
 0x51f   : > { %v4529_v49 = vmul.f32 -1.442695, %v2738_v53  ;;  %v4530_v7 = vmul.f32 -1.442695, %v2739_v48  ;;  %v2612_v38 = vmul.f32 %v4732_v26, %v2596_v46  ;;  %v2613_v36 = vmul.f32 %v4732_v26, %v2597_v52 }
 0x521   : > { %4737 = vpow2.f32 %v4529_v49  ;;  %v2676_v0 = vmul.f32 %v2654_v55, %v2612_v38  ;;  %v2677_v25 = vmul.f32 %v2654_v55, %v2613_v36 }
 0x522   : > { %v4734_v47 = vpop.eup %4733  ;;  %4739 = vpow2.f32 %v4530_v7 }
 0x523   : > { %v2740_v39 = vadd.f32 %v2718_v22, %v2676_v0  ;;  %v2741_v44 = vadd.f32 %v2718_v22, %v2677_v25  ;;  %v2614_v54 = vmul.f32 %v4734_v47, %v2598_v50  ;;  %v2615_v18 = vmul.f32 %v4734_v47, %v2599_v14  ;;  %v4833_v25 = vld [vmem:[#allocation3 + $0x30] sm:$0xff]  ;;  %v4834_v47 = vld [vmem:[#allocation3] sm:$0xff] }
 0x525   : > { %v4531_v40 = vmul.f32 -1.442695, %v2740_v39  ;;  %v4532_v33 = vmul.f32 -1.442695, %v2741_v44  ;;  %v2678_v59 = vmul.f32 %v6459_v62, %v2614_v54  ;;  %v2679_v6 = vmul.f32 %v6459_v62, %v2615_v18  ;;  %v4835_v18 = vld [vmem:[#allocation3 + $0x18] sm:$0xff] }
 0x526   : > { %v4736_v1 = vpop.eup %4735 }
 0x527   : > { %4741 = vpow2.f32 %v4531_v40  ;;  %v2742_v45 = vadd.f32 %v6465_v16, %v2678_v59  ;;  %v2743_v55 = vadd.f32 %v6465_v16, %v2679_v6  ;;  %v2616_v41 = vmul.f32 %v4736_v1, %v2600_v17  ;;  %v4836_v40 = vld [vmem:[#allocation3 + $0x10] sm:$0xff] }
 0x528   : > { %4743 = vpow2.f32 %v4532_v33  ;;  %v2617_v22 = vmul.f32 %v4736_v1, %v2601_v42  ;;  %v4837_v1 = vld [vmem:[#allocation3 + $0x8] sm:$0xff] }
 0x529   : > { %v4533_v51 = vmul.f32 -1.442695, %v2742_v45  ;;  %v4534_v35 = vmul.f32 -1.442695, %v2743_v55  ;;  %v2680_v27 = vmul.f32 %v6463_v8, %v2616_v41  ;;  %v4838_v45 = vld [vmem:[#allocation3 + $0x20] sm:$0xff] }
 0x52a   : > { %v2681_v57 = vmul.f32 %v6463_v8, %v2617_v22 }
 0x52b   : > { %4745 = vpow2.f32 %v4533_v51  ;;  %v2744_v62 = vadd.f32 %v6461_v9, %v2680_v27  ;;  %v4839_v51 = vld [vmem:[#allocation3 + $0x28] sm:$0xff]  ;;  %v4840_v27 = vld [vmem:[#allocation3 + $0x38] sm:$0xff] }
 0x52c   : > { %4747 = vpow2.f32 %v4534_v35  ;;  %v2745_v21 = vadd.f32 %v6461_v9, %v2681_v57 }
 0x52d   : > { %v4535_v43 = vmul.f32 -1.442695, %v2744_v62  ;;  %v6493_v62 = vpop.permute.xlu0 %3084 }
 0x52e   : > { %v4738_v29 = vpop.eup %4737  ;;  %v4536_v30 = vmul.f32 -1.442695, %v2745_v21  ;;  %v6495_v21 = vpop.permute.xlu1 %2992 }
 0x52f   : > { %v4740_v4 = vpop.eup %4739  ;;  %4749 = vpow2.f32 %v4535_v43  ;;  %v2818_v16 = vadd.f32 1.0, %v4738_v29 }
 0x530   : > { %4751 = vpow2.f32 %v4536_v30  ;;  %v2819_v58 = vadd.f32 1.0, %v4740_v4 }
 0x531   : > { %4753 = vrcp.f32 %v2818_v16  ;;  %v6497_v43 = vpop.permute.xlu0 %2994 }
 0x532   : > { %4755 = vrcp.f32 %v2819_v58  ;;  %v6499_v29 = vpop.permute.xlu1 %3310 }
 0x534   : > { %v4742_v56 = vpop.eup %4741 }
 0x535   : > { %v4744_v53 = vpop.eup %4743  ;;  %v2820_v48 = vadd.f32 1.0, %v4742_v56  ;;  %v6501_v30 = vpop.permute.xlu0 %3312 }
 0x536   : > { %v2821_v8 = vadd.f32 1.0, %v4744_v53  ;;  %v6503_v4 = vpop.permute.xlu1 %3220 }
 0x537   : > { %4757 = vrcp.f32 %v2820_v48 }
 0x538   : > { %v4746_v46 = vpop.eup %4745  ;;  %4759 = vrcp.f32 %v2821_v8 }
 0x539   : > { %v4748_v52 = vpop.eup %4747  ;;  %v2822_v26 = vadd.f32 1.0, %v4746_v46  ;;  %v6505_v16 = vpop.permute.xlu0 %3222 }
 0x53a   : > { %v2823_v9 = vadd.f32 1.0, %v4748_v52  ;;  %v6507_v58 = vpop.permute.xlu1 %3448 }
 0x53b   : > { %4761 = vrcp.f32 %v2822_v26 }
 0x53c   : > { %v4750_v49 = vpop.eup %4749  ;;  %4763 = vrcp.f32 %v2823_v9 }
 0x53d   : > { %v4752_v7 = vpop.eup %4751  ;;  %v2824_v38 = vadd.f32 1.0, %v4750_v49  ;;  %v6509_v56 = vpop.permute.xlu0 %3450  ;;  %v6541_v49 = vsel %vm767_vm1, %v6467_v2, %v6493_v62 }
 0x53e   : > { %v4754_v36 = vpop.eup %4753  ;;  %v2825_v50 = vadd.f32 1.0, %v4752_v7 }
 0x53f   : > { %v4756_v0 = vpop.eup %4755  ;;  %v2842_v14 = vmul.f32 %v4833_v25, %v4754_v36  ;;  %4765 = vrcp.f32 %v2824_v38 }
 0x540   : > { %v2843_v39 = vmul.f32 %v4834_v47, %v4756_v0  ;;  %4767 = vrcp.f32 %v2825_v50 }
 0x541   : > { %2858 = vrot.lane.b32.xlu1 %v2842_v14, %s5214_s2  ;;  %v6558_v14 = vsel %vm755_vm4, %v6495_v21, %v6497_v43 }
 0x542   : > { %2860 = vrot.lane.b32.xlu0 %v2843_v39, %s5214_s2 }
 0x544   : > { %v4758_v44 = vpop.eup %4757 }
 0x545   : > { %v4760_v54 = vpop.eup %4759  ;;  %v2844_v17 = vmul.f32 %v4835_v18, %v4758_v44  ;;  %v6579_v18 = vsel %vm791_vm3, %v6499_v29, %v6501_v30 }
 0x546   : > { %v2845_v33 = vmul.f32 %v4836_v40, %v4760_v54 }
 0x547   : > { %2862 = vrot.lane.b32.xlu1 %v2844_v17, %s5214_s2 }
 0x548   : > { %v4762_v59 = vpop.eup %4761  ;;  %2864 = vrot.lane.b32.xlu0 %v2845_v33, %s5214_s2  ;;  %v6594_v33 = vsel %vm779_vm5, %v6503_v4, %v6505_v16 }
 0x549   : > { %v4764_v6 = vpop.eup %4763  ;;  %v2846_v42 = vmul.f32 %v4837_v1, %v4762_v59 }
 0x54a   : > { %v2847_v55 = vmul.f32 %v4838_v45, %v4764_v6 }
 0x54b   : > { %2866 = vrot.lane.b32.xlu1 %v2846_v42, %s5214_s2 }
 0x54c   : > { %v4766_v41 = vpop.eup %4765  ;;  %2868 = vrot.lane.b32.xlu0 %v2847_v55, %s5214_s2 }
 0x54d   : > { %v4768_v22 = vpop.eup %4767  ;;  %v2848_v35 = vmul.f32 %v4839_v51, %v4766_v41 }
 0x54e   : > { %v2849_v57 = vmul.f32 %v4840_v27, %v4768_v22 }
 0x54f   : > { %2870 = vrot.lane.b32.xlu1 %v2848_v35, %s5214_s2 }
 0x550   : > { %2872 = vrot.lane.b32.xlu0 %v2849_v57, %s5214_s2  ;;  %s7390_s2 = smov 94  }
 0x5b3   : > { %v2859_v53 = vpop.permute.xlu1 %2858 }
 0x5b4   : > { %v2861_v48 = vpop.permute.xlu0 %2860  ;;  %v6522_v52 = vsel %vm719_vm0, 0.0, %v2859_v53 }
 0x5b5   : > { %v6512_v8 = vsel %vm719_vm0, %v2859_v53, %v2861_v48  ;;  %v6515_v46 = vsel %vm719_vm0, %v2861_v48, 0.0  ;;  %v3090_v50 = vmul.f32 %v6467_v2, %v6522_v52  ;;  %v3000_v44 = vmul.f32 %v6495_v21, %v6522_v52 }
 0x5b6   : > { %2938 = vrot.lane.b32.xlu1 %v6515_v46, %s5227_s19  ;;  %2936 = vrot.lane.b32.xlu0 %v6512_v8, %s5227_s19  ;;  %v3092_v26 = vmul.f32 %v6493_v62, %v6515_v46  ;;  %v3002_v9 = vmul.f32 %v6497_v43, %v6515_v46  ;;  %v3320_v7 = vmul.f32 %v6501_v30, %v6515_v46 }
 0x5b7   : > { %v3091_v38 = vmul.f32 %v6541_v49, %v6512_v8  ;;  %v3230_v36 = vmul.f32 %v6505_v16, %v6515_v46  ;;  %v3001_v47 = vmul.f32 %v6558_v14, %v6512_v8  ;;  %v3319_v17 = vmul.f32 %v6579_v18, %v6512_v8 }
 0x5b8   : > { %v3318_v40 = vmul.f32 %v6499_v29, %v6522_v52  ;;  %v3229_v59 = vmul.f32 %v6594_v33, %v6512_v8 }
 0x5b9   : > { %v2863_v0 = vpop.permute.xlu1 %2862 }
 0x5ba   : > { %3394 = vrot.lane.b32.xlu1 %v6515_v46, %s5221_s28  ;;  %2934 = vrot.lane.b32.xlu0 %v6522_v52, %s5227_s19  ;;  %v2865_v25 = vpop.permute.xlu0 %2864  ;;  %v6571_v54 = vsel %vm719_vm0, 0.0, %v2863_v0 }
 0x5bb   : > { %v6563_v39 = vsel %vm719_vm0, %v2863_v0, %v2865_v25  ;;  %v3093_v1 = vmul.f32 %v6467_v2, %v6571_v54  ;;  %v6605_v42 = vsel %vm719_vm0, %v2865_v25, 0.0  ;;  %v3003_v41 = vmul.f32 %v6495_v21, %v6571_v54 }
 0x5bc   : > { %v3094_v6 = vmul.f32 %v6541_v49, %v6563_v39  ;;  %v3004_v45 = vmul.f32 %v6558_v14, %v6563_v39  ;;  %v3095_v55 = vmul.f32 %v6493_v62, %v6605_v42  ;;  %v3005_v22 = vmul.f32 %v6497_v43, %v6605_v42 }
 0x5bd   : > { %v3322_v51 = vmul.f32 %v6579_v18, %v6563_v39  ;;  %v3323_v35 = vmul.f32 %v6501_v30, %v6605_v42  ;;  %v3321_v27 = vmul.f32 %v6499_v29, %v6571_v54  ;;  %v3233_v57 = vmul.f32 %v6505_v16, %v6605_v42  ;;  %v2867_v48 = vpop.permute.xlu1 %2866 }
 0x5be   : > { %3118 = vrot.lane.b32.xlu1 %v3092_v26, %s5222_s5  ;;  %3392 = vrot.lane.b32.xlu0 %v6512_v8, %s5221_s28  ;;  %v3232_v53 = vmul.f32 %v6594_v33, %v6563_v39  ;;  %v2869_v26 = vpop.permute.xlu0 %2868  ;;  %v3459_v10 = vmul.f32 %v6507_v58, %v6571_v54 }
 0x5c2   : > { %3028 = vrot.lane.b32.xlu1 %v3002_v9, %s5225_s17  ;;  %3390 = vrot.lane.b32.xlu0 %v6522_v52, %s5221_s28  ;;  %v3231_v9 = vmul.f32 %v6503_v4, %v6571_v54 }
 0x5c6   : > { %3346 = vrot.lane.b32.xlu1 %v3320_v7, %s5224_s18  ;;  %3116 = vrot.lane.b32.xlu0 %v3091_v38, %s5222_s5  ;;  %v6642_v7 = vsel %vm719_vm0, %v2867_v48, %v2869_v26  ;;  %v6648_v38 = vsel %vm719_vm0, 0.0, %v2867_v48 }
 0x5c7   : > { %v3097_v25 = vmul.f32 %v6541_v49, %v6642_v7 }
 0x5ca   : > { %3256 = vrot.lane.b32.xlu1 %v3230_v36, %s5226_s20  ;;  %3114 = vrot.lane.b32.xlu0 %v3090_v50, %s5222_s5  ;;  %v6651_v36 = vsel %vm719_vm0, %v2869_v26, 0.0 }
 0x5cb   : > { %v3098_v50 = vmul.f32 %v6493_v62, %v6651_v36  ;;  %v3008_v0 = vmul.f32 %v6497_v43, %v6651_v36 }
 0x5ce   : > { %3026 = vrot.lane.b32.xlu0 %v3001_v47, %s5225_s17  ;;  %2942 = vrot.lane.b32.xlu1 %v6563_v39, %s5227_s19  ;;  %v3326_v47 = vmul.f32 %v6501_v30, %v6651_v36 }
 0x5d2   : > { %3024 = vrot.lane.b32.xlu0 %v3000_v44, %s5225_s17  ;;  %2940 = vrot.lane.b32.xlu1 %v6571_v54, %s5227_s19  ;;  %v3096_v44 = vmul.f32 %v6467_v2, %v6648_v38 }
 0x5d6   : > { %3344 = vrot.lane.b32.xlu0 %v3319_v17, %s5224_s18  ;;  %3398 = vrot.lane.b32.xlu1 %v6563_v39, %s5221_s28  ;;  %v3236_v17 = vmul.f32 %v6505_v16, %v6651_v36 }
 0x5da   : > { %3342 = vrot.lane.b32.xlu0 %v3318_v40, %s5224_s18  ;;  %3396 = vrot.lane.b32.xlu1 %v6571_v54, %s5221_s28  ;;  %v3007_v40 = vmul.f32 %v6558_v14, %v6642_v7 }
 0x5de   : > { %3254 = vrot.lane.b32.xlu0 %v3229_v59, %s5226_s20  ;;  %3122 = vrot.lane.b32.xlu1 %v3094_v6, %s5222_s5  ;;  %v2871_v59 = vpop.permute.xlu1 %2870  ;;  %v2873_v6 = vpop.permute.xlu0 %2872 }
 0x5df   : > { %v6721_v48 = vsel %vm719_vm0, %v2873_v6, 0.0 }
 0x5e0   : > { %v3329_v11 = vmul.f32 %v6501_v30, %v6721_v48 }
 0x5e2   : > { %2944 = vrot.lane.b32.xlu0 %v6605_v42, %s5227_s19  ;;  %3120 = vrot.lane.b32.xlu1 %v3093_v1, %s5222_s5  ;;  %v3006_v1 = vmul.f32 %v6495_v21, %v6648_v38 }
 0x5e6   : > { %3400 = vrot.lane.b32.xlu0 %v6605_v42, %s5221_s28  ;;  %3032 = vrot.lane.b32.xlu1 %v3004_v45, %s5225_s17  ;;  %v6687_v45 = vsel %vm719_vm0, %v2871_v59, %v2873_v6 }
 0x5ea   : > { %3124 = vrot.lane.b32.xlu0 %v3095_v55, %s5222_s5  ;;  %3030 = vrot.lane.b32.xlu1 %v3003_v41, %s5225_s17  ;;  %v3325_v55 = vmul.f32 %v6579_v18, %v6642_v7  ;;  %v6695_v41 = vsel %vm719_vm0, 0.0, %v2871_v59 }
 0x5eb   : > { %v3009_v59 = vmul.f32 %v6495_v21, %v6695_v41  ;;  %v3327_v32 = vmul.f32 %v6499_v29, %v6695_v41 }
 0x5ee   : > { %3034 = vrot.lane.b32.xlu0 %v3005_v22, %s5225_s17  ;;  %3350 = vrot.lane.b32.xlu1 %v3322_v51, %s5224_s18  ;;  %v3324_v22 = vmul.f32 %v6499_v29, %v6648_v38  ;;  %v3235_v51 = vmul.f32 %v6594_v33, %v6642_v7 }
 0x5f2   : > { %3352 = vrot.lane.b32.xlu0 %v3323_v35, %s5224_s18  ;;  %3348 = vrot.lane.b32.xlu1 %v3321_v27, %s5224_s18  ;;  %v3234_v35 = vmul.f32 %v6503_v4, %v6648_v38  ;;  %v3100_v27 = vmul.f32 %v6541_v49, %v6687_v45 }
 0x5f6   : > { %3262 = vrot.lane.b32.xlu0 %v3233_v57, %s5226_s20  ;;  %3260 = vrot.lane.b32.xlu1 %v3232_v53, %s5226_s20 }
 0x5fa   : > { %3258 = vrot.lane.b32.xlu1 %v3231_v9, %s5226_s20  ;;  %2948 = vrot.lane.b32.xlu0 %v6642_v7, %s5227_s19  ;;  %v3099_v9 = vmul.f32 %v6467_v2, %v6695_v41 }
 0x5fe   : > { %2950 = vrot.lane.b32.xlu1 %v6651_v36, %s5227_s19  ;;  %2946 = vrot.lane.b32.xlu0 %v6648_v38, %s5227_s19 }
 0x602   : > { %3406 = vrot.lane.b32.xlu1 %v6651_v36, %s5221_s28  ;;  %3404 = vrot.lane.b32.xlu0 %v6642_v7, %s5221_s28 }
 0x606   : > { %3130 = vrot.lane.b32.xlu1 %v3098_v50, %s5222_s5  ;;  %3402 = vrot.lane.b32.xlu0 %v6648_v38, %s5221_s28 }
 0x60a   : > { %3040 = vrot.lane.b32.xlu1 %v3008_v0, %s5225_s17  ;;  %3128 = vrot.lane.b32.xlu0 %v3097_v25, %s5222_s5  ;;  %v3101_v25 = vmul.f32 %v6493_v62, %v6721_v48 }
 0x60e   : > { %3358 = vrot.lane.b32.xlu1 %v3326_v47, %s5224_s18  ;;  %3126 = vrot.lane.b32.xlu0 %v3096_v44, %s5222_s5  ;;  %v3010_v47 = vmul.f32 %v6558_v14, %v6687_v45  ;;  %v3011_v14 = vmul.f32 %v6497_v43, %v6721_v48  ;;  %v6776_v43 = vsel %vm803_vm2, %v6507_v58, %v6509_v56 }
 0x60f   : > { %v3466_v60 = vmul.f32 %v6776_v43, %v6687_v45  ;;  %v3457_v24 = vmul.f32 %v6776_v43, %v6512_v8 }
 0x612   : > { %3268 = vrot.lane.b32.xlu1 %v3236_v17, %s5226_s20  ;;  %3038 = vrot.lane.b32.xlu0 %v3007_v40, %s5225_s17  ;;  %v3228_v17 = vmul.f32 %v6503_v4, %v6522_v52 }
 0x616   : > { %3036 = vrot.lane.b32.xlu0 %v3006_v1, %s5225_s17  ;;  %2954 = vrot.lane.b32.xlu1 %v6687_v45, %s5227_s19 }
 0x61a   : > { %3356 = vrot.lane.b32.xlu0 %v3325_v55, %s5224_s18  ;;  %2952 = vrot.lane.b32.xlu1 %v6695_v41, %s5227_s19 }
 0x61e   : > { %3354 = vrot.lane.b32.xlu0 %v3324_v22, %s5224_s18  ;;  %3410 = vrot.lane.b32.xlu1 %v6687_v45, %s5221_s28  ;;  %v3463_v22 = vmul.f32 %v6776_v43, %v6642_v7 }
 0x622   : > { %3266 = vrot.lane.b32.xlu0 %v3235_v51, %s5226_s20  ;;  %3408 = vrot.lane.b32.xlu1 %v6695_v41, %s5221_s28 }
 0x626   : > { %3264 = vrot.lane.b32.xlu0 %v3234_v35, %s5226_s20  ;;  %3134 = vrot.lane.b32.xlu1 %v3100_v27, %s5222_s5  ;;  %v3464_v27 = vmul.f32 %v6509_v56, %v6651_v36 }
 0x628   : > { %v6716_v57 = vpop.permute.xlu1 %2938  ;;  %v6718_v53 = vpop.permute.xlu0 %2936 }
 0x62a   : > { %2956 = vrot.lane.b32.xlu0 %v6721_v48, %s5227_s19  ;;  %3182 = vrot.lane.b32.xlu1 %v6687_v45, %s5220_s23 }
 0x62c   : > { %v6727_v26 = vpop.permute.xlu1 %3394  ;;  %v6729_v49 = vpop.permute.xlu0 %2934 }
 0x62d   : > { %7385 = vst [vmem:[#allocation29_spill] sm:$0xff] %v6727_v26 }
 0x62e   : > { %3412 = vrot.lane.b32.xlu0 %v6721_v48, %s5221_s28  ;;  %3132 = vrot.lane.b32.xlu1 %v3099_v9, %s5222_s5 }
 0x630   : > { %v6736_v50 = vpop.permute.xlu1 %3118  ;;  %v6738_v0 = vpop.permute.xlu0 %3392 }
 0x631   : > { %7386 = vst [vmem:[#allocation32_spill] sm:$0xff] %v6738_v0 }
 0x632   : > { %3136 = vrot.lane.b32.xlu0 %v3101_v25, %s5222_s5  ;;  %3044 = vrot.lane.b32.xlu1 %v3010_v47, %s5225_s17  ;;  %v3462_v47 = vmul.f32 %v6507_v58, %v6648_v38 }
 0x634   : > { %v6746_v2 = vpop.permute.xlu1 %3028  ;;  %v6748_v44 = vpop.permute.xlu0 %3390 }
 0x635   : > { %7387 = vst [vmem:[#allocation28_spill] sm:$0xff] %v6748_v44 }
 0x636   : > { %3252 = vrot.lane.b32.xlu0 %v3228_v17, %s5226_s20  ;;  %3180 = vrot.lane.b32.xlu1 %v6695_v41, %s5220_s23 }
 0x638   : > { %v6755_v62 = vpop.permute.xlu1 %3346  ;;  %v6757_v40 = vpop.permute.xlu0 %3116 }
 0x639   : > { %7388 = vst [vmem:[#allocation47_spill] sm:$0xff] %v6755_v62 }
 0x63a   : > { %3046 = vrot.lane.b32.xlu0 %v3011_v14, %s5225_s17  ;;  %3042 = vrot.lane.b32.xlu1 %v3009_v59, %s5225_s17  ;;  %v3460_v14 = vmul.f32 %v6776_v43, %v6563_v39 }
 0x63c   : > { %v6765_v6 = vpop.permute.xlu1 %3256  ;;  %v6767_v1 = vpop.permute.xlu0 %3114 }
 0x63d   : > { %7389 = vst [vmem:[#allocation48_spill] sm:$0xff] %v6765_v6 }
 0x63e   : > { %3184 = vrot.lane.b32.xlu0 %v6721_v48, %s5220_s23  ;;  %3176 = vrot.lane.b32.xlu1 %v6642_v7, %s5220_s23 }
 0x640   : > { %v6778_v21 = vpop.permute.xlu1 %2942  ;;  %v6780_v55 = vpop.permute.xlu0 %3026 }
 0x642   : > { %3178 = vrot.lane.b32.xlu0 %v6651_v36, %s5220_s23  ;;  %3494 = vrot.lane.b32.xlu1 %v3463_v22, %s7390_s2 }
 0x644   : > { %v6787_v51 = vpop.permute.xlu1 %2940  ;;  %v6789_v35 = vpop.permute.xlu0 %3024 }
 0x646   : > { %3496 = vrot.lane.b32.xlu0 %v3464_v27, %s7390_s2  ;;  %3174 = vrot.lane.b32.xlu1 %v6648_v38, %s5220_s23  ;;  %v3461_v27 = vmul.f32 %v6509_v56, %v6605_v42 }
 0x648   : > { %v6796_v9 = vpop.permute.xlu1 %3398  ;;  %v6798_v25 = vpop.permute.xlu0 %3344 }
 0x649   : > { %7391 = vst [vmem:[#allocation49_spill] sm:$0xff] %v6798_v25 }
 0x64a   : > { %3492 = vrot.lane.b32.xlu0 %v3462_v47, %s7390_s2  ;;  %3170 = vrot.lane.b32.xlu1 %v6563_v39, %s5220_s23 }
 0x64c   : > { %v6805_v17 = vpop.permute.xlu1 %3396  ;;  %v6807_v36 = vpop.permute.xlu0 %3342 }
 0x64d   : > { %7392 = vst [vmem:[#allocation50_spill] sm:$0xff] %v6807_v36 }
 0x64e   : > { %3172 = vrot.lane.b32.xlu0 %v6605_v42, %s5220_s23  ;;  %3488 = vrot.lane.b32.xlu1 %v3460_v14, %s7390_s2  ;;  %v3328_v14 = vmul.f32 %v6579_v18, %v6687_v45 }
 0x650   : > { %v6814_v59 = vpop.permute.xlu1 %3122  ;;  %v6816_v22 = vpop.permute.xlu0 %3254 }
 0x651   : > { %7393 = vst [vmem:[#allocation51_spill] sm:$0xff] %v6816_v22 }
 0x652   : > { %3490 = vrot.lane.b32.xlu0 %v3461_v27, %s7390_s2  ;;  %3168 = vrot.lane.b32.xlu1 %v6571_v54, %s5220_s23 }
 0x654   : > { %v6823_v47 = vpop.permute.xlu1 %3120  ;;  %v6825_v37 = vpop.permute.xlu0 %2944 }
 0x656   : > { %3486 = vrot.lane.b32.xlu0 %v3459_v10, %s7390_s2  ;;  %3362 = vrot.lane.b32.xlu1 %v3328_v14, %s5224_s18  ;;  %v3239_v10 = vmul.f32 %v6505_v16, %v6721_v48  ;;  %v3238_v14 = vmul.f32 %v6594_v33, %v6687_v45  ;;  %v3467_v33 = vmul.f32 %v6509_v56, %v6721_v48 }
 0x658   : > { %v6833_v42 = vpop.permute.xlu1 %3032  ;;  %v6835_v27 = vpop.permute.xlu0 %3400 }
 0x65a   : > { %3364 = vrot.lane.b32.xlu0 %v3329_v11, %s5224_s18  ;;  %3360 = vrot.lane.b32.xlu1 %v3327_v32, %s5224_s18  ;;  %v3237_v11 = vmul.f32 %v6503_v4, %v6695_v41 }
 0x65c   : > { %v6843_v23 = vpop.permute.xlu1 %3030  ;;  %v6845_v18 = vpop.permute.xlu0 %3124 }
 0x65e   : > { %3274 = vrot.lane.b32.xlu0 %v3239_v10, %s5226_s20  ;;  %3272 = vrot.lane.b32.xlu1 %v3238_v14, %s5226_s20  ;;  %v3529_v10 = vld [vmem:[#allocation8 + $0x8] sm:$0xff] }
 0x65f   : > { %3688 = vmatprep.mubr.f32.mxu0 %v3529_v10  ;;  %v3458_v10 = vmul.f32 %v6509_v56, %v6515_v46  ;;  %v3812_v56 = vld [vmem:[#allocation15 + $0x10] sm:$0xff] }
 0x660   : > { %v6853_v30 = vpop.permute.xlu1 %3350  ;;  %v6855_v29 = vpop.permute.xlu0 %3034 }
 0x661   : > { %7394 = vst [vmem:[#allocation52_spill] sm:$0xff] %v6853_v30 }
 0x662   : > { %3166 = vrot.lane.b32.xlu0 %v6515_v46, %s5220_s23  ;;  %3270 = vrot.lane.b32.xlu1 %v3237_v11, %s5226_s20  ;;  %v3465_v11 = vmul.f32 %v6507_v58, %v6695_v41  ;;  %v3813_v46 = vld [vmem:[#allocation15 + $0x18] sm:$0xff] }
 0x664   : > { %v6862_v32 = vpop.permute.xlu1 %3348  ;;  %v6864_v16 = vpop.permute.xlu0 %3352 }
 0x665   : > { %7395 = vst [vmem:[#allocation53_spill] sm:$0xff] %v6862_v32  ;;  %7396 = vst [vmem:[#allocation54_spill] sm:$0xff] %v6864_v16 }
 0x666   : > { %3502 = vrot.lane.b32.xlu0 %v3467_v33, %s7390_s2  ;;  %3164 = vrot.lane.b32.xlu1 %v6512_v8, %s5220_s23 }
 0x668   : > { %v6871_v4 = vpop.permute.xlu1 %3260  ;;  %v6873_v14 = vpop.permute.xlu0 %3262 }
 0x669   : > { %7397 = vst [vmem:[#allocation55_spill] sm:$0xff] %v6871_v4  ;;  %7398 = vst [vmem:[#allocation56_spill] sm:$0xff] %v6873_v14 }
 0x66a   : > { %3498 = vrot.lane.b32.xlu0 %v3465_v11, %s7390_s2  ;;  %3500 = vrot.lane.b32.xlu1 %v3466_v60, %s7390_s2  ;;  %v3456_v11 = vmul.f32 %v6507_v58, %v6522_v52  ;;  %v3811_v58 = vld [vmem:[#allocation15 + $0x8] sm:$0xff] }
 0x66c   : > { %v6881_v48 = vpop.permute.xlu1 %3258  ;;  %v2949_v33 = vpop.permute.xlu0 %2948 }
 0x66d   : > { %7399 = vst [vmem:[#allocation57_spill] sm:$0xff] %v6881_v48 }
 0x66e   : > { %3484 = vrot.lane.b32.xlu0 %v3458_v10, %s7390_s2  ;;  %3482 = vrot.lane.b32.xlu1 %v3457_v24, %s7390_s2 }
 0x670   : > { %v2951_v3 = vpop.permute.xlu1 %2950  ;;  %v2947_v28 = vpop.permute.xlu0 %2946 }
 0x671   : > { %v6892_v60 = vsel %vm822_vm14, %v2947_v28, %v2949_v33  ;;  %v6895_v22 = vsel %vm822_vm14, %v2949_v33, %v2951_v3  ;;  %v3810_v28 = vld [vmem:[#allocation15] sm:$0xff] }
 0x672   : > { %3480 = vrot.lane.b32.xlu0 %v3456_v11, %s7390_s2  ;;  %3162 = vrot.lane.b32.xlu1 %v6522_v52, %s5220_s23 }
 0x674   : > { %v3407_v43 = vpop.permute.xlu1 %3406  ;;  %v3405_v24 = vpop.permute.xlu0 %3404 }
 0x675   : > { %v6901_v10 = vsel %vm906_vm9, %v3405_v24, %v3407_v43 }
 0x676   : > { %3826 = vperm.xlu0 %4726, %v3812_v56   ;;  %3831 = vperm.xlu1 %4727, %v3813_v46  }
 0x678   : > { %v3131_v6 = vpop.permute.xlu1 %3130  ;;  %v3403_v48 = vpop.permute.xlu0 %3402 }
 0x679   : > { %v6904_v3 = vsel %vm906_vm9, %v3403_v48, %v3405_v24 }
 0x67a   : > { %3821 = vperm.xlu1 %4727, %v3811_v58   ;;  %3816 = vperm.xlu0 %4726, %v3810_v28  }
 0x67c   : > { %v3041_v33 = vpop.permute.xlu1 %3040  ;;  %v3129_v11 = vpop.permute.xlu0 %3128 }
 0x680   : > { %v3359_v4 = vpop.permute.xlu1 %3358  ;;  %v3127_v14 = vpop.permute.xlu0 %3126 }
 0x684   : > { %v3269_v36 = vpop.permute.xlu1 %3268  ;;  %v3039_v25 = vpop.permute.xlu0 %3038 }
 0x688   : > { %v6906_v62 = vpop.permute.xlu1 %2954  ;;  %v3037_v43 = vpop.permute.xlu0 %3036 }
 0x68c   : > { %v6908_v56 = vpop.permute.xlu1 %2952  ;;  %v3357_v46 = vpop.permute.xlu0 %3356 }
 0x68d   : > { %v6911_v32 = vsel %vm895_vm10, %v3357_v46, %v3359_v4 }
 0x68e   : > { %7400 = vst [vmem:[#allocation58_spill] sm:$0xff] %v6911_v32 }
 0x690   : > { %v6913_v30 = vpop.permute.xlu1 %3410  ;;  %v3355_v48 = vpop.permute.xlu0 %3354 }
 0x691   : > { %v6916_v24 = vsel %vm895_vm10, %v3355_v48, %v3357_v46 }
 0x694   : > { %v6918_v58 = vpop.permute.xlu1 %3408  ;;  %v3267_v28 = vpop.permute.xlu0 %3266 }
 0x695   : > { %v6921_v16 = vsel %vm881_vm13, %v3267_v28, %v3269_v36 }
 0x696   : > { %7401 = vst [vmem:[#allocation59_spill] sm:$0xff] %v6921_v16 }
 0x698   : > { %v3135_v44 = vpop.permute.xlu1 %3134  ;;  %v3265_v0 = vpop.permute.xlu0 %3264 }
 0x699   : > { %v6924_v26 = vsel %vm881_vm13, %v3265_v0, %v3267_v28  ;;  %2493 = vadd.xlane.f32.xlu0 %v6416_v20 }
 0x69c   : > { %v6927_v4 = vpop.permute.xlu1 %3182  ;;  %v2957_v32 = vpop.permute.xlu0 %2956 }
 0x69d   : > { %2496 = vadd.xlane.f32.xlu0 %v6420_v15  ;;  %v3142_v15 = vsel %vm853_vm8, %v3127_v14, %v3129_v11 }
 0x69e   : > { %2490 = vadd.xlane.f32.xlu1 %v6412_v31  ;;  %v3143_v31 = vsel %vm853_vm8, %v3129_v11, %v3131_v6 }
 0x6a0   : > { %v3133_v46 = vpop.permute.xlu1 %3132  ;;  %v6931_v48 = vpop.permute.xlu0 %3412 }
 0x6a1   : > { %2523 = vadd.xlane.f32.xlu0 %v6414_v5  ;;  %v3144_v0 = vsel %vm853_vm8, %v3133_v46, %v3135_v44  ;;  %v2898_v46 = vld [vmem:[%s7357_s22] ss:$4 sm:$0x3] }
 0x6a2   : > { %2499 = vadd.xlane.f32.xlu1 %v6424_v63  ;;  %v3139_v63 = vsel %vm853_vm8, %v6757_v40, %v6736_v50 }
 0x6a4   : > { %v3045_v36 = vpop.permute.xlu1 %3044  ;;  %v3137_v16 = vpop.permute.xlu0 %3136 }
 0x6a5   : > { %2529 = vadd.xlane.f32.xlu0 %v6422_v19  ;;  %v3145_v20 = vsel %vm853_vm8, %v3135_v44, %v3137_v16  ;;  %v3141_v19 = vsel %vm853_vm8, %v6814_v59, %v6845_v18  ;;  %v3138_v44 = vsel %vm853_vm8, %v6767_v1, %v6757_v40  ;;  %v3051_v40 = vsel %vm836_vm11, %v6833_v42, %v6855_v29 }
 0x6a6   : > { %2526 = vadd.xlane.f32.xlu1 %v6418_v34  ;;  %3624 = vmatprep.subr.mxu0 %v3145_v20  ;;  %v3140_v34 = vsel %vm853_vm8, %v6823_v47, %v6814_v59  ;;  %v3052_v47 = vsel %vm836_vm11, %v3037_v43, %v3039_v25  ;;  %v3050_v1 = vsel %vm836_vm11, %v6843_v23, %v6833_v42  ;;  %v2618_v42 = vld [vmem:[#allocation11] sm:$0xff]  ;;  %v2620_v20 = vld [vmem:[#allocation11 + $0x10] sm:$0xff] }
 0x6a7   : > { %3625 = vmatpush1.msra.mxu0 %v3144_v0  ;;  %v2965_v29 = vsel %vm822_vm14, %v6906_v62, %v2957_v32  ;;  %v2964_v23 = vsel %vm822_vm14, %v6908_v56, %v6906_v62  ;;  %v2961_v62 = vsel %vm822_vm14, %v6778_v21, %v6825_v37  ;;  %v2960_v32 = vsel %vm822_vm14, %v6787_v51, %v6778_v21 }
 0x6a8   : > { %v6941_v28 = vpop.permute.xlu1 %3180  ;;  %3626 = vmatprep.subr.mxu0 %v3143_v31  ;;  %v6943_v5 = vpop.permute.xlu0 %3252  ;;  %v2903_v37 = vrot.slane %v2898_v46, %v7384_v13  ;;  %v2958_v21 = vsel %vm822_vm14, %v6729_v49, %v6718_v53  ;;  %v2683_v49 = vld [vmem:[#allocation12 + $0x8] sm:$0xff] }
 0x6a9   : > { %3627 = vmatpush1.msra.mxu0 %v3142_v15 }
 0x6aa   : > { %2532 = vadd.xlane.f32.xlu1 %v6426_v61  ;;  %3628 = vmatprep.subr.mxu0 %v3141_v19  ;;  %v3053_v61 = vsel %vm836_vm11, %v3039_v25, %v3041_v33  ;;  %v3049_v25 = vsel %vm836_vm11, %v6780_v55, %v6746_v2  ;;  %v3048_v33 = vsel %vm836_vm11, %v6789_v35, %v6780_v55  ;;  %v2619_v35 = vld [vmem:[#allocation11 + $0x8] sm:$0xff] }
 0x6ab   : > { %3629 = vmatpush1.msra.mxu0 %v3140_v34  ;;  %v2916_v0 = vmul.f32 %v2903_v37, %v6695_v41  ;;  %v2914_v15 = vmul.f32 %v2903_v37, %v6648_v38  ;;  %v2912_v41 = vmul.f32 %v2903_v37, %v6571_v54  ;;  %v2910_v38 = vmul.f32 %v2903_v37, %v6522_v52  ;;  %v4108_v52 = vld [vmem:[#allocation17] sm:$0xff]  ;;  %v7410_v37 = vld [vmem:[#allocation49_spill] sm:$0xff] }
 0x6ac   : > { %v3043_v6 = vpop.permute.xlu1 %3042  ;;  %3630 = vmatprep.subr.mxu0 %v3139_v63  ;;  %v3047_v16 = vpop.permute.xlu0 %3046  ;;  %v2684_v63 = vld [vmem:[#allocation12 + $0x10] sm:$0xff] }
 0x6ad   : > { %v3054_v18 = vsel %vm836_vm11, %v3043_v6, %v3045_v36  ;;  %3631 = vmatpush1.msra.mxu0 %v3138_v44  ;;  %v3055_v59 = vsel %vm836_vm11, %v3045_v36, %v3047_v16  ;;  %v2685_v44 = vld [vmem:[#allocation12 + $0x18] sm:$0xff]  ;;  %v4109_v16 = vld [vmem:[#allocation17 + $0x8] sm:$0xff] }
 0x6ae   : > { %3632 = vmatprep.subr.mxu0 %v3055_v59  ;;  %v7403_v59 = vld [vmem:[#allocation32_spill] sm:$0xff] }
 0x6af   : > { %3633 = vmatpush1.msra.mxu0 %v3054_v18  ;;  %v7402_v18 = vld [vmem:[#allocation29_spill] sm:$0xff] }
 0x6b0   : > { %v6962_v14 = vpop.permute.xlu1 %3176  ;;  %3634 = vmatprep.subr.mxu0 %v3053_v61  ;;  %v6964_v50 = vpop.permute.xlu0 %3184 }
 0x6b1   : > { %3635 = vmatpush1.msra.mxu0 %v3052_v47  ;;  %v4110_v47 = vld [vmem:[#allocation17 + $0x10] sm:$0xff] }
 0x6b2   : > { %3636 = vmatprep.subr.mxu0 %v3051_v40 }
 0x6b3   : > { %3637 = vmatpush1.msra.mxu0 %v3050_v1 }
 0x6b4   : > { %v6978_v11 = vpop.permute.xlu1 %3494  ;;  %3638 = vmatprep.subr.mxu0 %v3049_v25  ;;  %v6980_v43 = vpop.permute.xlu0 %3178 }
 0x6b5   : > { %3639 = vmatpush1.msra.mxu0 %v3048_v33  ;;  %v4140_v33 = vld [vmem:[#allocation18] sm:$0xff] }
 0x6b6   : > { %3640 = vmatprep.subr.mxu0 %v2965_v29  ;;  %v7405_v29 = vld [vmem:[#allocation58_spill] sm:$0xff] }
 0x6b7   : > { %3641 = vmatpush1.msra.mxu0 %v2964_v23  ;;  %v4141_v23 = vld [vmem:[#allocation18 + $0x8] sm:$0xff] }
 0x6b8   : > { %v6987_v2 = vpop.permute.xlu1 %3174  ;;  %3642 = vmatprep.subr.mxu0 %v6895_v22  ;;  %v6990_v55 = vpop.permute.xlu0 %3496  ;;  %v2907_v22 = vrot.slane %v2898_v46, %v7382_v12  ;;  %v2621_v12 = vld [vmem:[#allocation11 + $0x18] sm:$0xff] }
 0x6b9   : > { %3643 = vmatpush1.msra.mxu0 %v6892_v60  ;;  %v2959_v60 = vsel %vm822_vm14, %v6718_v53, %v6716_v57  ;;  %v2682_v53 = vld [vmem:[#allocation12] sm:$0xff] }
 0x6ba   : > { %3644 = vmatprep.subr.mxu0 %v2961_v62  ;;  %v2917_v51 = vmul.f32 %v2907_v22, %v6687_v45  ;;  %v2915_v57 = vmul.f32 %v2907_v22, %v6642_v7  ;;  %v2913_v45 = vmul.f32 %v2907_v22, %v6563_v39  ;;  %v2911_v7 = vmul.f32 %v2907_v22, %v6512_v8  ;;  %v7408_v62 = vld [vmem:[#allocation53_spill] sm:$0xff] }
 0x6bb   : > { %2633 = vperm.xlu1 %4727, %v2619_v35   ;;  %2628 = vperm.xlu0 %4726, %v2618_v42   ;;  %v3421_v39 = vsel %vm906_vm9, %v6913_v30, %v6931_v48  ;;  %v3420_v8 = vsel %vm906_vm9, %v6918_v58, %v6913_v30  ;;  %v3417_v48 = vsel %vm906_vm9, %v6796_v9, %v6835_v27  ;;  %v7406_v35 = vld [vmem:[#allocation54_spill] sm:$0xff]  ;;  %v7407_v42 = vld [vmem:[#allocation52_spill] sm:$0xff] }
 0x6bc   : > { %3645 = vmatpush1.msra.mxu0 %v2960_v32  ;;  %v7003_v56 = vpop.permute.xlu1 %3170  ;;  %v7008_v36 = vpop.permute.xlu0 %3492  ;;  %v3416_v30 = vsel %vm906_vm9, %v6805_v17, %v6796_v9  ;;  %v4111_v17 = vld [vmem:[#allocation17 + $0x18] sm:$0xff]  ;;  %v3369_v46 = vsel %vm895_vm10, %v7407_v42, %v7406_v35  ;;  %v3368_v32 = vsel %vm895_vm10, %v7408_v62, %v7407_v42 }
 0x6bd   : > { %3646 = vmatprep.subr.mxu0 %v2959_v60  ;;  %v7409_v60 = vld [vmem:[#allocation47_spill] sm:$0xff] }
 0x6be   : > { %3647 = vmatpush1.msra.mxu0 %v2958_v21 }
 0x6bf   : > { %3648 = vmatprep.subr.mxu0 %v2917_v51  ;;  %2638 = vperm.xlu1 %4727, %v2620_v20   ;;  %v3367_v20 = vsel %vm895_vm10, %v7410_v37, %v7409_v60 }
 0x6c0   : > { %2643 = vperm.xlu0 %4726, %v2621_v12   ;;  %3649 = vmatpush1.msra.mxu0 %v2916_v0  ;;  %v7017_v31 = vpop.permute.xlu1 %3488  ;;  %v7019_v13 = vpop.permute.xlu0 %3172 }
 0x6c1   : > { %3650 = vmatprep.subr.mxu0 %v2915_v57 }
 0x6c2   : > { %3651 = vmatpush1.msra.mxu0 %v2914_v15 }
 0x6c3   : > { %3652 = vmatprep.subr.mxu0 %v2913_v45  ;;  %2692 = vperm.xlu1 %4727, %v2682_v53   ;;  %v7412_v53 = vld [vmem:[#allocation59_spill] sm:$0xff]  ;;  %v7413_v45 = vld [vmem:[#allocation56_spill] sm:$0xff] }
 0x6c4   : > { %2697 = vperm.xlu0 %4726, %v2683_v49   ;;  %3653 = vmatpush1.msra.mxu0 %v2912_v41  ;;  %v7025_v19 = vpop.permute.xlu1 %3168  ;;  %v7027_v34 = vpop.permute.xlu0 %3490  ;;  %v7414_v49 = vld [vmem:[#allocation55_spill] sm:$0xff] }
 0x6c5   : > { %3654 = vmatprep.subr.mxu0 %v2911_v7  ;;  %v3279_v41 = vsel %vm881_vm13, %v7414_v49, %v7413_v45  ;;  %v7415_v7 = vld [vmem:[#allocation57_spill] sm:$0xff] }
 0x6c6   : > { %3655 = vmatpush1.msra.mxu0 %v2910_v38  ;;  %v3278_v38 = vsel %vm881_vm13, %v7415_v7, %v7414_v49 }
 0x6c7   : > { %3656 = vmatprep.subr.mxu0 %v3421_v39  ;;  %2702 = vperm.xlu1 %4727, %v2684_v63   ;;  %v7417_v39 = vld [vmem:[#allocation51_spill] sm:$0xff] }
 0x6c8   : > { %2707 = vperm.xlu0 %4726, %v2685_v44   ;;  %3657 = vmatpush2.msra.mxu0 %v3420_v8  ;;  %v3363_v54 = vpop.permute.xlu1 %3362  ;;  %v7036_v6 = vpop.permute.xlu0 %3486  ;;  %v7416_v44 = vld [vmem:[#allocation48_spill] sm:$0xff] }
 0x6c9   : > { %3658 = vmatprep.subr.mxu0 %v6901_v10  ;;  %v3415_v10 = vsel %vm906_vm9, %v7403_v59, %v7402_v18  ;;  %v3277_v8 = vsel %vm881_vm13, %v7417_v39, %v7416_v44 }
 0x6ca   : > { %3659 = vmatpush2.msra.mxu0 %v6904_v3  ;;  %v7404_v3 = vld [vmem:[#allocation28_spill] sm:$0xff] }
 0x6cb   : > { %3660 = vmatprep.subr.mxu0 %v3417_v48  ;;  %4114 = vperm.xlu1 %4727, %v4108_v52   ;;  %v3414_v40 = vsel %vm906_vm9, %v7404_v3, %v7403_v59  ;;  %v3193_v48 = vsel %vm864_vm12, %v6927_v4, %v6964_v50  ;;  %v3191_v50 = vsel %vm864_vm12, %v6962_v14, %v6980_v43  ;;  %v3535_v3 = vld [vmem:[#allocation8 + $0x38] sm:$0xff] }
 0x6cc   : > { %4119 = vperm.xlu0 %4726, %v4109_v16   ;;  %3661 = vmatpush2.msra.mxu0 %v3416_v30  ;;  %v3361_v58 = vpop.permute.xlu1 %3360  ;;  %v3365_v61 = vpop.permute.xlu0 %3364  ;;  %v3192_v30 = vsel %vm864_vm12, %v6941_v28, %v6927_v4  ;;  %v3190_v4 = vsel %vm864_vm12, %v6987_v2, %v6962_v14  ;;  %v3507_v28 = vsel %vm920_vm6, %v7017_v31, %v7027_v34  ;;  %v3528_v34 = vld [vmem:[#allocation8] sm:$0xff] }
 0x6cd   : > { %v3372_v27 = vsel %vm895_vm10, %v3361_v58, %v3363_v54  ;;  %3662 = vmatprep.subr.mxu0 %v3415_v10  ;;  %v3373_v9 = vsel %vm895_vm10, %v3363_v54, %v3365_v61  ;;  %v3508_v58 = vsel %vm920_vm6, %v7008_v36, %v6978_v11  ;;  %v3189_v43 = vsel %vm864_vm12, %v7003_v56, %v7019_v13  ;;  %v3532_v61 = vld [vmem:[#allocation8 + $0x20] sm:$0xff] }
 0x6ce   : > { %3663 = vmatpush2.msra.mxu0 %v3414_v40  ;;  %v3188_v14 = vsel %vm864_vm12, %v7025_v19, %v7003_v56  ;;  %v7418_v56 = vmov 0.0   ;;  %v3531_v19 = vld [vmem:[#allocation8 + $0x18] sm:$0xff]  ;;  %v3534_v40 = vld [vmem:[#allocation8 + $0x30] sm:$0xff] }
 0x6cf   : > { %3664 = vmatprep.subr.mxu0 %v3373_v9  ;;  %4124 = vperm.xlu1 %4727, %v4110_v47   ;;  %v3533_v47 = vld [vmem:[#allocation8 + $0x28] sm:$0xff]  ;;  %v3538_v9 = vld [vmem:[#allocation8 + $0x50] sm:$0xff] }
 0x6d0   : > { %4129 = vperm.xlu0 %4726, %v4111_v17   ;;  %3665 = vmatpush2.msra.mxu0 %v3372_v27  ;;  %v3273_v1 = vpop.permute.xlu1 %3272  ;;  %v3275_v25 = vpop.permute.xlu0 %3274  ;;  %v3536_v27 = vld [vmem:[#allocation8 + $0x40] sm:$0xff]  ;;  %v3537_v17 = vld [vmem:[#allocation8 + $0x48] sm:$0xff] }
 0x6d1   : > { %3666 = vmatprep.subr.mxu0 %v7405_v29  ;;  %v3283_v0 = vsel %vm881_vm13, %v3273_v1, %v3275_v25 }
 0x6d2   : > { %3667 = vmatpush2.msra.mxu0 %v6916_v24  ;;  %v7411_v24 = vld [vmem:[#allocation50_spill] sm:$0xff] }
 0x6d3   : > { %3668 = vmatprep.subr.mxu0 %v3369_v46  ;;  %4146 = vperm.xlu1 %4727, %v4140_v33   ;;  %v3366_v51 = vsel %vm895_vm10, %v7411_v24, %v7410_v37 }
 0x6d4   : > { %4151 = vperm.xlu0 %4726, %v4141_v23   ;;  %3669 = vmatpush2.msra.mxu0 %v3368_v32  ;;  %v3271_v22 = vpop.permute.xlu1 %3270  ;;  %v3167_v21 = vpop.permute.xlu0 %3166 }
 0x6d5   : > { %v3282_v12 = vsel %vm881_vm13, %v3271_v22, %v3273_v1  ;;  %3670 = vmatprep.subr.mxu0 %v3367_v20  ;;  %v3539_v1 = vld [vmem:[#allocation8 + $0x58] sm:$0xff] }
 0x6d6   : > { %3671 = vmatpush2.msra.mxu0 %v3366_v51 }
 0x6d7   : > { %3672 = vmatprep.subr.mxu0 %v3283_v0 }
 0x6d8   : > { %3673 = vmatpush2.msra.mxu0 %v3282_v12  ;;  %v3165_v57 = vpop.permute.xlu1 %3164  ;;  %v3503_v15 = vpop.permute.xlu0 %3502 }
 0x6d9   : > { %3674 = vmatprep.subr.mxu0 %v7412_v53  ;;  %v3187_v36 = vsel %vm864_vm12, %v3165_v57, %v3167_v21 }
 0x6da   : > { %3675 = vmatpush2.msra.mxu0 %v6924_v26  ;;  %v3276_v26 = vsel %vm881_vm13, %v6943_v5, %v7417_v39  ;;  %v3509_v5 = vsel %vm920_vm6, %v6978_v11, %v6990_v55  ;;  %v3506_v11 = vsel %vm920_vm6, %v7036_v6, %v7017_v31  ;;  %v3530_v6 = vld [vmem:[#allocation8 + $0x10] sm:$0xff]  ;;  %v7421_v39 = vld [vmem:[#allocation40_spill] sm:$0xff] }
 0x6db   : > { %3676 = vmatprep.subr.mxu0 %v3279_v41  ;;  %v7419_v41 = vld [vmem:[#allocation39_spill] sm:$0xff] }
 0x6dc   : > { %3677 = vmatpush2.msra.mxu0 %v3278_v38  ;;  %v3501_v63 = vpop.permute.xlu1 %3500  ;;  %v3499_v54 = vpop.permute.xlu0 %3498 }
 0x6dd   : > { %3678 = vmatprep.subr.mxu0 %v3277_v8  ;;  %v3510_v52 = vsel %vm920_vm6, %v3499_v54, %v3501_v63  ;;  %v3511_v16 = vsel %vm920_vm6, %v3501_v63, %v3503_v15  ;;  %v7420_v63 = vld [vmem:[#allocation38_spill] sm:$0xff] }
 0x6de   : > { %3679 = vmatpush2.msra.mxu0 %v3276_v26  ;;  %3737 = vmatprep.subr.mxu1 %v3511_v16 }
 0x6df   : > { %3680 = vmatprep.subr.mxu0 %v3193_v48  ;;  %3738 = vmatpush1.msra.mxu1 %v3510_v52  ;;  %v7422_v52 = vld [vmem:[#allocation37_spill] sm:$0xff]  ;;  %v7423_v48 = vld [vmem:[#allocation36_spill] sm:$0xff] }
 0x6e0   : > { %3681 = vmatpush2.msra.mxu0 %v3192_v30  ;;  %v3483_v18 = vpop.permute.xlu1 %3482  ;;  %3739 = vmatprep.subr.mxu1 %v3509_v5  ;;  %v3485_v59 = vpop.permute.xlu0 %3484 }
 0x6e1   : > { %3682 = vmatprep.subr.mxu0 %v3191_v50  ;;  %3740 = vmatpush1.msra.mxu1 %v3508_v58  ;;  %v3505_v2 = vsel %vm920_vm6, %v3483_v18, %v3485_v59  ;;  %v7424_v58 = vld [vmem:[#allocation35_spill] sm:$0xff]  ;;  %v7425_v59 = vld [vmem:[#allocation34_spill] sm:$0xff] }
 0x6e2   : > { %3683 = vmatpush2.msra.mxu0 %v3190_v4  ;;  %3741 = vmatprep.subr.mxu1 %v3507_v28 }
 0x6e3   : > { %3684 = vmatprep.subr.mxu0 %v3189_v43  ;;  %3742 = vmatpush1.msra.mxu1 %v3506_v11  ;;  %v7426_v43 = vld [vmem:[#allocation33_spill] sm:$0xff] }
 0x6e4   : > { %3685 = vmatpush2.msra.mxu0 %v3188_v14  ;;  %v3163_v55 = vpop.permute.xlu1 %3162  ;;  %3743 = vmatprep.subr.mxu1 %v3505_v2  ;;  %v3481_v31 = vpop.permute.xlu0 %3480 }
 0x6e5   : > { %v3186_v10 = vsel %vm864_vm12, %v3163_v55, %v3165_v57  ;;  %3686 = vmatprep.subr.mxu0 %v3187_v36  ;;  %v3504_v13 = vsel %vm920_vm6, %v3481_v31, %v3483_v18 }
 0x6e6   : > { %3687 = vmatpush2.msra.mxu0 %v3186_v10  ;;  %3744 = vmatpush1.msra.mxu1 %v3504_v13  ;;  %v3842_v10 = vld [vmem:[#allocation20] sm:$0xff] }
 0x6e7   : > { %3689 = vmatmul.mubr.f32.vlgmr.msra.gmra.mxu0 %v3528_v34  ;;  %4540 = vmatmul.mubr.msk.f32.vlgmr.msra.gmra.mxu1 %vm791_vm3, %v3530_v6 }
 0x6e8   : > { %3694 = vmatprep.mubr.f32.mxu0 %v3532_v61  ;;  %3783 = vmatprep.mubr.f32.mxu1 %v7418_v56 }
 0x6eb   : > { %3695 = vmatmul.mubr.f32.gmra.mxu0 %v3531_v19  ;;  %4541 = vmatmul.mubr.msk.f32.gmra.mxu1 %vm791_vm3, %v3533_v47 }
 0x6ec   : > { %3700 = vmatprep.mubr.f32.mxu0 %v3535_v3  ;;  %3789 = vmatprep.mubr.f32.mxu1 %v7418_v56  ;;  %v3843_v3 = vld [vmem:[#allocation20 + $0x8] sm:$0xff] }
 0x6ef   : > { %3701 = vmatmul.mubr.f32.gmra.mxu0 %v3534_v40  ;;  %4542 = vmatmul.mubr.msk.f32.gmra.mxu1 %vm791_vm3, %v3536_v27 }
 0x6f0   : > { %3706 = vmatprep.mubr.f32.mxu0 %v3538_v9  ;;  %3795 = vmatprep.mubr.f32.mxu1 %v7418_v56 }
 0x6f1   : > { %v3832_v45 = vpop.permute.xlu1 %3831  ;;  %v3827_v54 = vpop.permute.xlu0 %3826 }
 0x6f3   : > { %3707 = vmatmul.mubr.f32.gmra.mxu0 %v3537_v17  ;;  %4543 = vmatmul.mubr.msk.f32.gmra.mxu1 %vm791_vm3, %v3539_v1  ;;  %v3844_v1 = vld [vmem:[#allocation20 + $0x10] sm:$0xff] }
 0x6f4   : > { %3922 = vmatprep.mubr.f32.mxu1 %v7418_v56 }
 0x6f5   : > { %v3822_v11 = vpop.permute.xlu1 %3821  ;;  %v3817_v36 = vpop.permute.xlu0 %3816 }
 0x7a7   : > { %v3690_v25 = vpop.f32.mrf.mxu0  ;;  %v3779_v33 = vpop.f32.mrf.mxu1 }
 0x7a8   : > { %v3780_v26 = vadd.f32 %v3779_v33, %v3690_v25  ;;  %v3845_v25 = vld [vmem:[#allocation20 + $0x18] sm:$0xff] }
 0x7a9   : > { %v3692_v29 = vpop.f32.mrf.mxu0  ;;  %v3781_v23 = vpop.f32.mrf.mxu1 }
 0x7aa   : > { %v3782_v38 = vadd.f32 %v3781_v23, %v3692_v29  ;;  %v3802_v14 = vadd.f32 %v3780_v26, %v7426_v43 }
 0x7ab   : > { %v3696_v35 = vpop.f32.mrf.mxu0  ;;  %v3785_v42 = vpop.f32.mrf.mxu1 }
 0x7ac   : > { %v3786_v49 = vadd.f32 %v3785_v42, %v3696_v35  ;;  %v3803_v4 = vadd.f32 %v3782_v38, %v7425_v59  ;;  %v7155_v6 = vadd.f32 %v3817_v36, %v3802_v14  ;;  %v4143_v38 = vld [vmem:[#allocation18 + $0x18] sm:$0xff] }
 0x7ad   : > { %v3698_v46 = vpop.f32.mrf.mxu0  ;;  %v3787_v62 = vpop.f32.mrf.mxu1 }
 0x7ae   : > { %v3788_v15 = vadd.f32 %v3787_v62, %v3698_v46  ;;  %v3804_v18 = vadd.f32 %v3786_v49, %v7424_v58  ;;  %v7153_v34 = vadd.f32 %v3817_v36, %v3803_v4  ;;  %v3947_v17 = vmul.f32 %v7155_v6, %v7155_v6 }
 0x7af   : > { %v3702_v32 = vpop.f32.mrf.mxu0  ;;  %v3791_v22 = vpop.f32.mrf.mxu1 }
 0x7b0   : > { %v3792_v12 = vadd.f32 %v3791_v22, %v3702_v32  ;;  %v3805_v30 = vadd.f32 %v3788_v15, %v7423_v48  ;;  %v7149_v31 = vadd.f32 %v3822_v11, %v3804_v18  ;;  %v3948_v9 = vmul.f32 %v7153_v34, %v7153_v34 }
 0x7b1   : > { %v3704_v60 = vpop.f32.mrf.mxu0  ;;  %v3793_v37 = vpop.f32.mrf.mxu1 }
 0x7b2   : > { %v3794_v24 = vadd.f32 %v3793_v37, %v3704_v60  ;;  %v3806_v16 = vadd.f32 %v3792_v12, %v7422_v52  ;;  %v7147_v55 = vadd.f32 %v3822_v11, %v3805_v30  ;;  %v3949_v27 = vmul.f32 %v7149_v31, %v7149_v31 }
 0x7b3   : > { %v3708_v20 = vpop.f32.mrf.mxu0  ;;  %v3797_v21 = vpop.f32.mrf.mxu1 }
 0x7b4   : > { %v3798_v51 = vadd.f32 %v3797_v21, %v3708_v20  ;;  %v3807_v44 = vadd.f32 %v3794_v24, %v7420_v63  ;;  %v7143_v2 = vadd.f32 %v3827_v54, %v3806_v16  ;;  %v3950_v40 = vmul.f32 %v7147_v55, %v7147_v55  ;;  %v2494_v63 = vpop.xlane.xlu0 %2493 }
 0x7b5   : > { %v3710_v0 = vpop.f32.mrf.mxu0  ;;  %v3799_v57 = vpop.f32.mrf.mxu1  ;;  %v2515_v4 = vmul.f32 0.00024414063, %v2494_v63 }
 0x7b6   : > { %v3800_v53 = vadd.f32 %v3799_v57, %v3710_v0  ;;  %v3808_v7 = vadd.f32 %v3798_v51, %v7419_v41  ;;  %v7140_v28 = vadd.f32 %v3827_v54, %v3807_v44  ;;  %v3951_v47 = vmul.f32 %v7143_v2, %v7143_v2  ;;  %v2491_v44 = vpop.xlane.xlu1 %2490 }
 0x7b7   : > { %v2514_v16 = vmul.f32 0.00024414063, %v2491_v44 }
 0x7b8   : > { %v3809_v8 = vadd.f32 %v3800_v53, %v7421_v39  ;;  %v7136_v50 = vadd.f32 %v3832_v45, %v3808_v7  ;;  %v3952_v19 = vmul.f32 %v7140_v28, %v7140_v28  ;;  %v4142_v7 = vld [vmem:[#allocation18 + $0x10] sm:$0xff]  ;;  %v2497_v39 = vpop.xlane.xlu0 %2496 }
 0x7b9   : > { %v2554_v58 = vmul.f32 %v2514_v16, %v2514_v16  ;;  %v2516_v59 = vmul.f32 0.00024414063, %v2497_v39  ;;  %v7432_v39 = vld [vmem:[#allocation31_spill] sm:$0xff] }
 0x7ba   : > { %v7133_v5 = vadd.f32 %v3832_v45, %v3809_v8  ;;  %v3953_v61 = vmul.f32 %v7136_v50, %v7136_v50  ;;  %v2500_v8 = vpop.xlane.xlu1 %2499 }
 0x7bc   : > { %3882 = vmatprep.subr.mxu1 %v7133_v5  ;;  %v3954_v13 = vmul.f32 %v7133_v5, %v7133_v5  ;;  %v2524_v54 = vpop.xlane.xlu0 %2523 }
 0x7bd   : > { %3883 = vmatpush1.msra.mxu1 %v7136_v50  ;;  %v2546_v18 = vmul.f32 0.00024414063, %v2524_v54 }
 0x7be   : > { %3884 = vmatprep.subr.mxu1 %v7140_v28  ;;  %v2527_v26 = vpop.xlane.xlu1 %2526 }
 0x7bf   : > { %3885 = vmatpush1.msra.mxu1 %v7143_v2  ;;  %v2562_v43 = vsub.f32 %v2546_v18, %v2554_v58  ;;  %v2547_v36 = vmul.f32 0.00024414063, %v2527_v26 }
 0x7c0   : > { %3886 = vmatprep.subr.mxu1 %v7147_v55  ;;  %v2530_v52 = vpop.xlane.xlu0 %2529 }
 0x7c1   : > { %3887 = vmatpush1.msra.mxu1 %v7149_v31  ;;  %v2548_v14 = vmul.f32 0.00024414063, %v2530_v52 }
 0x7c2   : > { %3888 = vmatprep.subr.mxu1 %v7153_v34  ;;  %v2533_v48 = vpop.xlane.xlu1 %2532 }
 0x7c3   : > { %3889 = vmatpush1.msra.mxu1 %v7155_v6 }
 0x7c4   : > { %4544 = vmatmul.mubr.msk.f32.vlgmr.msra.gmra.mxu1 %vm791_vm3, %v3842_v10  ;;  %3979 = vmatprep.subr.mxu1 %v3954_v13  ;;  %v2629_v30 = vpop.permute.xlu0 %2628  ;;  %v2556_v13 = vmul.f32 %v2516_v59, %v2516_v59 }
 0x7c5   : > { %3980 = vmatpush1.msra.mxu1 %v3953_v61  ;;  %3928 = vmatprep.mubr.f32.mxu1 %v7418_v56  ;;  %v2555_v61 = vmul.f32 %v2515_v4, %v2515_v4 }
 0x7c6   : > { %3981 = vmatprep.subr.mxu1 %v3952_v19  ;;  %v2634_v11 = vpop.permute.xlu1 %2633  ;;  %v2570_v19 = vadd.f32 1e-05, %v2562_v43 }
 0x7c7   : > { %3982 = vmatpush1.msra.mxu1 %v3951_v47  ;;  %v2564_v47 = vsub.f32 %v2548_v14, %v2556_v13  ;;  %v7433_v14 = vld [vmem:[#allocation42_spill] sm:$0xff] }
 0x7c8   : > { %4545 = vmatmul.mubr.msk.f32.gmra.mxu1 %vm791_vm3, %v3843_v3  ;;  %3983 = vmatprep.subr.mxu1 %v3950_v40  ;;  %4769 = vrsqrt.f32 %v2570_v19 }
 0x7c9   : > { %3984 = vmatpush1.msra.mxu1 %v3949_v27  ;;  %3934 = vmatprep.mubr.f32.mxu1 %v7418_v56  ;;  %v2517_v27 = vmul.f32 0.00024414063, %v2500_v8  ;;  %v2591_v8 = vsub.f32 %v7432_v39, %v2516_v59 }
 0x7ca   : > { %3985 = vmatprep.subr.mxu1 %v3948_v9  ;;  %v2639_v40 = vpop.permute.xlu1 %2638 }
 0x7cb   : > { %3986 = vmatpush1.msra.mxu1 %v3947_v17  ;;  %v2572_v17 = vadd.f32 1e-05, %v2564_v47 }
 0x7cc   : > { %4546 = vmatmul.mubr.msk.f32.gmra.mxu1 %vm791_vm3, %v3844_v1 }
 0x7cd   : > { %3940 = vmatprep.mubr.f32.mxu1 %v7418_v56  ;;  %4771 = vrsqrt.f32 %v2572_v17 }
 0x7d0   : > { %4547 = vmatmul.mubr.msk.f32.gmra.mxu1 %vm791_vm3, %v3845_v25 }
 0x7d1   : > { %4019 = vmatprep.mubr.f32.mxu1 %v7418_v56 }
 0x7d4   : > { %4548 = vmatmul.mubr.msk.f32.vlgmr.msra.gmra.mxu1 %vm791_vm3, %v3842_v10  ;;  %v7191_v10 = vpop.permute.xlu0 %2643 }
 0x7d5   : > { %4025 = vmatprep.mubr.f32.mxu1 %v7418_v56 }
 0x7d8   : > { %4549 = vmatmul.mubr.msk.f32.gmra.mxu1 %vm791_vm3, %v3843_v3  ;;  %v2563_v3 = vsub.f32 %v2547_v36, %v2555_v61  ;;  %v2698_v9 = vpop.permute.xlu0 %2697  ;;  %v2592_v36 = vsub.f32 %v7433_v14, %v2517_v27 }
 0x7d9   : > { %4031 = vmatprep.mubr.f32.mxu1 %v7418_v56 }
 0x7dc   : > { %4550 = vmatmul.mubr.msk.f32.gmra.mxu1 %vm791_vm3, %v3844_v1  ;;  %v2571_v1 = vadd.f32 1e-05, %v2563_v3 }
 0x7dd   : > { %4037 = vmatprep.mubr.f32.mxu1 %v7418_v56 }
 0x7de   : > { %4773 = vrsqrt.f32 %v2571_v1  ;;  %v7434_v1 = vld [vmem:[#allocation41_spill] sm:$0xff] }
 0x7e0   : > { %4551 = vmatmul.mubr.msk.f32.gmra.mxu1 %vm791_vm3, %v3845_v25  ;;  %v2549_v25 = vmul.f32 0.00024414063, %v2533_v48 }
 0x884   : > { %v3924_v33 = vpop.f32.mrf.mxu1 }
 0x886   : > { %v3926_v29 = vpop.f32.mrf.mxu1 }
 0x887   : > { %v4044_v23 = vadd.f32 %v3926_v29, %v3924_v33  ;;  %v2557_v33 = vmul.f32 %v2517_v27, %v2517_v27  ;;  %v2693_v29 = vpop.permute.xlu1 %2692 }
 0x888   : > { %v3930_v35 = vpop.f32.mrf.mxu1 }
 0x889   : > { %4045 = vadd.xlane.f32.xlu0 %v4044_v23  ;;  %v2565_v23 = vsub.f32 %v2549_v25, %v2557_v33  ;;  %v2593_v25 = vsub.f32 %v7434_v1, %v2517_v27 }
 0x88a   : > { %v3932_v42 = vpop.f32.mrf.mxu1 }
 0x88b   : > { %v4047_v46 = vadd.f32 %v3932_v42, %v3930_v35  ;;  %v7193_v35 = vpop.permute.xlu0 %2707  ;;  %v2573_v42 = vadd.f32 1e-05, %v2565_v23 }
 0x88c   : > { %v3936_v62 = vpop.f32.mrf.mxu1 }
 0x88d   : > { %4048 = vadd.xlane.f32.xlu1 %v4047_v46  ;;  %v2703_v46 = vpop.permute.xlu1 %2702  ;;  %4775 = vrsqrt.f32 %v2573_v42 }
 0x88e   : > { %v3938_v32 = vpop.f32.mrf.mxu1 }
 0x88f   : > { %v4050_v22 = vadd.f32 %v3938_v32, %v3936_v62  ;;  %v7195_v62 = vpop.permute.xlu0 %4119  ;;  %v4770_v32 = vpop.eup %4769 }
 0x890   : > { %v3942_v60 = vpop.f32.mrf.mxu1 }
 0x891   : > { %4051 = vadd.xlane.f32.xlu0 %v4050_v22  ;;  %v7427_v22 = vld [vmem:[#allocation46_spill] sm:$0xff] }
 0x892   : > { %v3944_v37 = vpop.f32.mrf.mxu1 }
 0x893   : > { %v4053_v20 = vadd.f32 %v3944_v37, %v3942_v60  ;;  %v2586_v60 = vsub.f32 %v7427_v22, %v2514_v16  ;;  %v7198_v37 = vpop.permute.xlu1 %4114 }
 0x894   : > { %v4021_v21 = vpop.f32.mrf.mxu1 }
 0x895   : > { %4054 = vadd.xlane.f32.xlu1 %v4053_v20  ;;  %v2602_v20 = vmul.f32 %v4770_v32, %v2586_v60 }
 0x896   : > { %v4023_v56 = vpop.f32.mrf.mxu1 }
 0x897   : > { %v4060_v24 = vadd.f32 %v4023_v56, %v4021_v21  ;;  %v4772_v21 = vpop.eup %4771  ;;  %v7428_v56 = vld [vmem:[#allocation45_spill] sm:$0xff]  ;;  %v7206_v44 = vpop.permute.xlu1 %4124 }
 0x898   : > { %v4027_v51 = vpop.f32.mrf.mxu1  ;;  %v2607_v18 = vmul.f32 %v4772_v21, %v2591_v8 }
 0x899   : > { %4061 = vadd.xlane.f32.xlu0 %v4060_v24  ;;  %v2587_v24 = vsub.f32 %v7428_v56, %v2514_v16 }
 0x89a   : > { %v4029_v12 = vpop.f32.mrf.mxu1 }
 0x89b   : > { %v4063_v0 = vadd.f32 %v4029_v12, %v4027_v51  ;;  %v7201_v51 = vpop.permute.xlu0 %4129  ;;  %v4774_v12 = vpop.eup %4773 }
 0x89c   : > { %v4033_v57 = vpop.f32.mrf.mxu1  ;;  %v4776_v43 = vpop.eup %4775 }
 0x89d   : > { %4064 = vadd.xlane.f32.xlu1 %v4063_v0  ;;  %v7429_v0 = vld [vmem:[#allocation30_spill] sm:$0xff]  ;;  %v7212_v19 = vpop.permute.xlu1 %4146  ;;  %v2608_v17 = vmul.f32 %v4776_v43, %v2592_v36 }
 0x89e   : > { %v4035_v15 = vpop.f32.mrf.mxu1 }
 0x89f   : > { %v4066_v53 = vadd.f32 %v4035_v15, %v4033_v57  ;;  %v2590_v57 = vsub.f32 %v7429_v0, %v2516_v59  ;;  %v7430_v15 = vld [vmem:[#allocation44_spill] sm:$0xff]  ;;  %v7209_v52 = vpop.permute.xlu0 %4151  ;;  %v2671_v59 = vmul.f32 %v2639_v40, %v2607_v18 }
 0x8a0   : > { %v4039_v45 = vpop.f32.mrf.mxu1 }
 0x8a1   : > { %4067 = vadd.xlane.f32.xlu0 %v4066_v53  ;;  %v2588_v53 = vsub.f32 %v7430_v15, %v2515_v4 }
 0x8a2   : > { %v4041_v49 = vpop.f32.mrf.mxu1 }
 0x8a3   : > { %v4069_v41 = vadd.f32 %v4041_v49, %v4039_v45  ;;  %v2603_v45 = vmul.f32 %v4770_v32, %v2587_v24  ;;  %v2666_v49 = vmul.f32 %v2629_v30, %v2602_v20  ;;  %v2604_v63 = vmul.f32 %v4774_v12, %v2588_v53 }
 0x8a5   : > { %4070 = vadd.xlane.f32.xlu1 %v4069_v41  ;;  %v2606_v41 = vmul.f32 %v4772_v21, %v2590_v57  ;;  %v2667_v54 = vmul.f32 %v2629_v30, %v2603_v45  ;;  %v2730_v48 = vadd.f32 %v2693_v29, %v2666_v49  ;;  %v2668_v58 = vmul.f32 %v2634_v11, %v2604_v63 }
 0x8a6   : > { %v2735_v21 = vadd.f32 %v2703_v46, %v2671_v59 }
 0x8a7   : > { %v2670_v16 = vmul.f32 %v2639_v40, %v2606_v41  ;;  %v2731_v61 = vadd.f32 %v2693_v29, %v2667_v54  ;;  %v4521_v47 = vmul.f32 -1.442695, %v2730_v48  ;;  %v2732_v30 = vadd.f32 %v2698_v9, %v2668_v58 }
 0x8a8   : > { %v2672_v29 = vmul.f32 %v7191_v10, %v2608_v17  ;;  %v4526_v15 = vmul.f32 -1.442695, %v2735_v21 }
 0x8a9   : > { %v2734_v3 = vadd.f32 %v2703_v46, %v2670_v16  ;;  %v4522_v23 = vmul.f32 -1.442695, %v2731_v61  ;;  %4777 = vpow2.f32 %v4521_v47  ;;  %v4523_v20 = vmul.f32 -1.442695, %v2732_v30 }
 0x8aa   : > { %v2736_v57 = vadd.f32 %v7193_v35, %v2672_v29 }
 0x8ab   : > { %v4525_v22 = vmul.f32 -1.442695, %v2734_v3  ;;  %4779 = vpow2.f32 %v4522_v23 }
 0x8ac   : > { %v4527_v63 = vmul.f32 -1.442695, %v2736_v57 }
 0x8ad   : > { %4781 = vpow2.f32 %v4525_v22 }
 0x8ae   : > { %4783 = vpow2.f32 %v4523_v20 }
 0x8b6   : > { %4156 = vperm.xlu1 %4727, %v4142_v7   ;;  %v7431_v7 = vld [vmem:[#allocation43_spill] sm:$0xff]  ;;  %v4778_v48 = vpop.eup %4777 }
 0x8b7   : > { %4161 = vperm.xlu0 %4726, %v4143_v38   ;;  %v2589_v38 = vsub.f32 %v7431_v7, %v2515_v4 }
 0x8b8   : > { %v4780_v14 = vpop.eup %4779 }
 0x8b9   : > { %v2605_v26 = vmul.f32 %v4774_v12, %v2589_v38  ;;  %v2771_v17 = vadd.f32 1.0, %v4780_v14 }
 0x8ba   : > { %v4782_v61 = vpop.eup %4781 }
 0x8bb   : > { %v2669_v13 = vmul.f32 %v2634_v11, %v2605_v26  ;;  %v2609_v11 = vmul.f32 %v4776_v43, %v2593_v25  ;;  %v4784_v47 = vpop.eup %4783  ;;  %v2774_v30 = vadd.f32 1.0, %v4782_v61 }
 0x8bc   : > { %v2772_v25 = vadd.f32 1.0, %v4784_v47  ;;  %v4841_v47 = vld [vmem:[#allocation3 + $0x30] sm:$0xff] }
 0x8bd   : > { %v2733_v33 = vadd.f32 %v2698_v9, %v2669_v13  ;;  %v2673_v0 = vmul.f32 %v7191_v10, %v2609_v11 }
 0x8bf   : > { %v4524_v56 = vmul.f32 -1.442695, %v2733_v33  ;;  %v2737_v38 = vadd.f32 %v7193_v35, %v2673_v0 }
 0x8c1   : > { %4785 = vpow2.f32 %v4524_v56  ;;  %v4528_v58 = vmul.f32 -1.442695, %v2737_v38 }
 0x8c2   : > { %4787 = vpow2.f32 %v4526_v15 }
 0x8ce   : > { %v4786_v59 = vpop.eup %4785 }
 0x8cf   : > { %v4788_v33 = vpop.eup %4787  ;;  %v2773_v22 = vadd.f32 1.0, %v4786_v59 }
 0x8d0   : > { %v2775_v20 = vadd.f32 1.0, %v4788_v33 }
 0x912   : > { %v4046_v4 = vpop.xlane.xlu0 %4045 }
 0x913   : > { %v7215_v60 = vmul.f32 0.00024414063, %v4046_v4  ;;  %v2770_v4 = vadd.f32 1.0, %v4778_v48 }
 0x915   : > { %v4076_v27 = vmul.f32 %v7215_v60, %v7215_v60  ;;  %v4092_v23 = vsub.f32 %v7155_v6, %v7215_v60 }
 0x916   : > { %v4049_v42 = vpop.xlane.xlu1 %4048 }
 0x917   : > { %v7218_v12 = vmul.f32 0.00024414063, %v4049_v42  ;;  %v4093_v42 = vsub.f32 %v7153_v34, %v7215_v60 }
 0x919   : > { %v4077_v41 = vmul.f32 %v7218_v12, %v7218_v12  ;;  %v4094_v56 = vsub.f32 %v7149_v31, %v7218_v12 }
 0x91a   : > { %v4052_v32 = vpop.xlane.xlu0 %4051 }
 0x91b   : > { %v7224_v45 = vmul.f32 0.00024414063, %v4052_v32 }
 0x91d   : > { %v4078_v26 = vmul.f32 %v7224_v45, %v7224_v45  ;;  %v4096_v31 = vsub.f32 %v7143_v2, %v7224_v45 }
 0x91e   : > { %v4055_v24 = vpop.xlane.xlu1 %4054 }
 0x91f   : > { %v7229_v8 = vmul.f32 0.00024414063, %v4055_v24  ;;  %v4095_v24 = vsub.f32 %v7147_v55, %v7218_v12  ;;  %v4097_v55 = vsub.f32 %v7140_v28, %v7224_v45 }
 0x921   : > { %v4079_v36 = vmul.f32 %v7229_v8, %v7229_v8  ;;  %v4098_v2 = vsub.f32 %v7136_v50, %v7229_v8  ;;  %v4099_v28 = vsub.f32 %v7133_v5, %v7229_v8 }
 0x922   : > { %v4062_v40 = vpop.xlane.xlu0 %4061 }
 0x923   : > { %v4072_v9 = vmul.f32 0.00024414063, %v4062_v40 }
 0x925   : > { %v4080_v53 = vsub.f32 %v4072_v9, %v4076_v27 }
 0x926   : > { %v4065_v46 = vpop.xlane.xlu1 %4064 }
 0x927   : > { %v4084_v49 = vadd.f32 1e-05, %v4080_v53  ;;  %v4073_v7 = vmul.f32 0.00024414063, %v4065_v46 }
 0x929   : > { %4789 = vrsqrt.f32 %v4084_v49  ;;  %v4081_v10 = vsub.f32 %v4073_v7, %v4077_v41 }
 0x92a   : > { %v4068_v39 = vpop.xlane.xlu0 %4067  ;;  %4791 = vpow2.f32 %v4527_v63 }
 0x92b   : > { %v4085_v54 = vadd.f32 1e-05, %v4081_v10  ;;  %v4074_v16 = vmul.f32 0.00024414063, %v4068_v39 }
 0x92d   : > { %4793 = vrsqrt.f32 %v4085_v54  ;;  %v4082_v18 = vsub.f32 %v4074_v16, %v4078_v26 }
 0x92e   : > { %v4071_v43 = vpop.xlane.xlu1 %4070  ;;  %4795 = vpow2.f32 %v4528_v58 }
 0x92f   : > { %v4086_v35 = vadd.f32 1e-05, %v4082_v18  ;;  %v4075_v13 = vmul.f32 0.00024414063, %v4071_v43 }
 0x931   : > { %4797 = vrsqrt.f32 %v4086_v35  ;;  %v4083_v3 = vsub.f32 %v4075_v13, %v4079_v36 }
 0x932   : > { %4799 = vrcp.f32 %v2770_v4  ;;  %v4157_v10 = vpop.permute.xlu1 %4156  ;;  %v4162_v8 = vpop.permute.xlu0 %4161 }
 0x933   : > { %v4087_v1 = vadd.f32 1e-05, %v4083_v3 }
 0x935   : > { %4801 = vrsqrt.f32 %v4087_v1 }
 0x936   : > { %v4790_v32 = vpop.eup %4789  ;;  %4803 = vrcp.f32 %v2771_v17 }
 0x937   : > { %4805 = vrcp.f32 %v2774_v30  ;;  %v4100_v11 = vmul.f32 %v4790_v32, %v4092_v23  ;;  %v4101_v29 = vmul.f32 %v4790_v32, %v4093_v42  ;;  %v4792_v21 = vpop.eup %4791  ;;  %v4842_v30 = vld [vmem:[#allocation3] sm:$0xff] }
 0x938   : > { %4807 = vrcp.f32 %v2772_v25  ;;  %v2776_v57 = vadd.f32 1.0, %v4792_v21  ;;  %v4844_v21 = vld [vmem:[#allocation3 + $0x10] sm:$0xff] }
 0x939   : > { %v4132_v6 = vmul.f32 %v7198_v37, %v4100_v11  ;;  %v4133_v34 = vmul.f32 %v7198_v37, %v4101_v29  ;;  %4809 = vrcp.f32 %v2773_v22  ;;  %v4843_v22 = vld [vmem:[#allocation3 + $0x18] sm:$0xff] }
 0x93a   : > { %v4794_v60 = vpop.eup %4793  ;;  %4811 = vrcp.f32 %v2775_v20 }
 0x93b   : > { %v4164_v40 = vadd.f32 %v7212_v19, %v4132_v6  ;;  %v4165_v27 = vadd.f32 %v7212_v19, %v4133_v34  ;;  %v4102_v9 = vmul.f32 %v4794_v60, %v4094_v56  ;;  %v4103_v0 = vmul.f32 %v4794_v60, %v4095_v24  ;;  %v4796_v15 = vpop.eup %4795 }
 0x93c   : > { %v2777_v7 = vadd.f32 1.0, %v4796_v15 }
 0x93d   : > { %4813 = vtanh.f32 %v4164_v40  ;;  %v4134_v37 = vmul.f32 %v7195_v62, %v4102_v9  ;;  %v4135_v12 = vmul.f32 %v7195_v62, %v4103_v0 }
 0x93e   : > { %v4798_v53 = vpop.eup %4797  ;;  %4815 = vtanh.f32 %v4165_v27 }
 0x93f   : > { %v4166_v19 = vadd.f32 %v7209_v52, %v4134_v37  ;;  %v4167_v46 = vadd.f32 %v7209_v52, %v4135_v12  ;;  %v4104_v49 = vmul.f32 %v4798_v53, %v4096_v31  ;;  %v4105_v41 = vmul.f32 %v4798_v53, %v4097_v55  ;;  %v4800_v38 = vpop.eup %4799  ;;  %v4846_v37 = vld [vmem:[#allocation3 + $0x20] sm:$0xff] }
 0x940   : > { %4817 = vrcp.f32 %v2776_v57  ;;  %v4845_v57 = vld [vmem:[#allocation3 + $0x8] sm:$0xff] }
 0x941   : > { %4819 = vtanh.f32 %v4166_v19  ;;  %v4136_v62 = vmul.f32 %v7206_v44, %v4104_v49  ;;  %v4137_v45 = vmul.f32 %v7206_v44, %v4105_v41  ;;  %v4180_v44 = vsub.f32 1.0, %v4800_v38 }
 0x942   : > { %v4802_v63 = vpop.eup %4801  ;;  %4821 = vtanh.f32 %v4167_v46 }
 0x943   : > { %v4804_v52 = vpop.eup %4803  ;;  %v4168_v39 = vadd.f32 %v4157_v10, %v4136_v62  ;;  %v4169_v54 = vadd.f32 %v4157_v10, %v4137_v45  ;;  %v4106_v26 = vmul.f32 %v4802_v63, %v4098_v2  ;;  %v4107_v16 = vmul.f32 %v4802_v63, %v4099_v28  ;;  %v4848_v28 = vld [vmem:[#allocation3 + $0x38] sm:$0xff] }
 0x944   : > { %v4806_v48 = vpop.eup %4805  ;;  %4823 = vrcp.f32 %v2777_v7  ;;  %v4181_v35 = vsub.f32 1.0, %v4804_v52  ;;  %v4188_v3 = vmul.f32 %v4841_v47, %v4180_v44  ;;  %v4847_v7 = vld [vmem:[#allocation3 + $0x28] sm:$0xff] }
 0x945   : > { %v4808_v50 = vpop.eup %4807  ;;  %4825 = vtanh.f32 %v4168_v39  ;;  %v4138_v58 = vmul.f32 %v7201_v51, %v4106_v26  ;;  %v4139_v5 = vmul.f32 %v7201_v51, %v4107_v16  ;;  %v4184_v29 = vsub.f32 1.0, %v4806_v48 }
 0x946   : > { %4827 = vtanh.f32 %v4169_v54  ;;  %v4810_v18 = vpop.eup %4809  ;;  %v4182_v4 = vsub.f32 1.0, %v4808_v50  ;;  %v4189_v51 = vmul.f32 %v4842_v30, %v4181_v35 }
 0x947   : > { %v4170_v43 = vadd.f32 %v4162_v8, %v4138_v58  ;;  %v4171_v14 = vadd.f32 %v4162_v8, %v4139_v5  ;;  %v4812_v36 = vpop.eup %4811  ;;  %v4183_v59 = vsub.f32 1.0, %v4810_v18  ;;  %v4192_v31 = vmul.f32 %v4845_v57, %v4184_v29 }
 0x948   : > { %v4190_v11 = vmul.f32 %v4843_v22, %v4182_v4  ;;  %v4185_v24 = vsub.f32 1.0, %v4812_v36 }
 0x949   : > { %4829 = vtanh.f32 %v4170_v43  ;;  %v4191_v56 = vmul.f32 %v4844_v21, %v4183_v59 }
 0x94a   : > { %v4814_v13 = vpop.eup %4813  ;;  %4831 = vtanh.f32 %v4171_v14  ;;  %v4193_v12 = vmul.f32 %v4846_v37, %v4185_v24 }
 0x94b   : > { %v4816_v61 = vpop.eup %4815  ;;  %v4196_v17 = vmul.f32 %v4814_v13, %v4800_v38 }
 0x94c   : > { %v4197_v1 = vmul.f32 %v4816_v61, %v4804_v52 }
 0x94d   : > { %v4818_v25 = vpop.eup %4817  ;;  %v4204_v33 = vadd.f32 %v4196_v17, %v4188_v3 }
 0x94e   : > { %v4820_v23 = vpop.eup %4819  ;;  %v4205_v42 = vadd.f32 %v4197_v1, %v4189_v51  ;;  %v4186_v0 = vsub.f32 1.0, %v4818_v25 }
 0x94f   : > { %v4822_v32 = vpop.eup %4821  ;;  %4212 = vst [vmem:[#allocation3 + $0x30] sm:$0xff] %v4204_v33  ;;  %4220 = vst [vmem:[%s5527_s8] sm:$0xff] %v4204_v33  ;;  %v4198_v20 = vmul.f32 %v4820_v23, %v4808_v50 }
 0x950   : > { %4213 = vst [vmem:[#allocation3] sm:$0xff] %v4205_v42  ;;  %4221 = vst [vmem:[%s5527_s8 + $0x8] sm:$0xff] %v4205_v42  ;;  %v4199_v6 = vmul.f32 %v4822_v32, %v4810_v18  ;;  %v4194_v2 = vmul.f32 %v4847_v7, %v4186_v0 }
 0x951   : > { %v4824_v34 = vpop.eup %4823  ;;  %v4206_v60 = vadd.f32 %v4198_v20, %v4190_v11 }
 0x952   : > { %v4826_v40 = vpop.eup %4825  ;;  %v4207_v27 = vadd.f32 %v4199_v6, %v4191_v56  ;;  %v4187_v55 = vsub.f32 1.0, %v4824_v34 }
 0x953   : > { %v4828_v9 = vpop.eup %4827  ;;  %4214 = vst [vmem:[#allocation3 + $0x18] sm:$0xff] %v4206_v60  ;;  %4222 = vst [vmem:[%s5527_s8 + $0x10] sm:$0xff] %v4206_v60  ;;  %v4200_v15 = vmul.f32 %v4826_v40, %v4806_v48 }
 0x954   : > { %4215 = vst [vmem:[#allocation3 + $0x10] sm:$0xff] %v4207_v27  ;;  %4223 = vst [vmem:[%s5527_s8 + $0x18] sm:$0xff] %v4207_v27  ;;  %v4201_v53 = vmul.f32 %v4828_v9, %v4812_v36  ;;  %v4195_v62 = vmul.f32 %v4848_v28, %v4187_v55 }
 0x955   : > { %v4208_v19 = vadd.f32 %v4200_v15, %v4192_v31 }
 0x956   : > { %v4830_v46 = vpop.eup %4829  ;;  %v4209_v49 = vadd.f32 %v4201_v53, %v4193_v12 }
 0x957   : > { %v4832_v41 = vpop.eup %4831  ;;  %4216 = vst [vmem:[#allocation3 + $0x8] sm:$0xff] %v4208_v19  ;;  %4224 = vst [vmem:[%s5527_s8 + $0x20] sm:$0xff] %v4208_v19  ;;  %v4202_v38 = vmul.f32 %v4830_v46, %v4818_v25 }
 0x958   : > { %4217 = vst [vmem:[#allocation3 + $0x20] sm:$0xff] %v4209_v49  ;;  %4225 = vst [vmem:[%s5527_s8 + $0x28] sm:$0xff] %v4209_v49  ;;  %v4203_v45 = vmul.f32 %v4832_v41, %v4824_v34 }
 0x959   : > { %v4210_v63 = vadd.f32 %v4202_v38, %v4194_v2 }
 0x95a   : > { %v4211_v10 = vadd.f32 %v4203_v45, %v4195_v62 }
 0x95b   : > { %4218 = vst [vmem:[#allocation3 + $0x28] sm:$0xff] %v4210_v63  ;;  %4226 = vst [vmem:[%s5527_s8 + $0x30] sm:$0xff] %v4210_v63 }
 0x95c   : > { %4219 = vst [vmem:[#allocation3 + $0x38] sm:$0xff] %v4211_v10  ;;  %4227 = vst [vmem:[%s5527_s8 + $0x38] sm:$0xff] %v4211_v10 }
 0x95d PF: > { %s7435_s3 = sld [smem:[#allocation27_spill]]  ;;  %s7436_s29 = smov %s5189_s15 }
 0x95e   : > { %s7437_s30 = smov %s5193_s16  ;;  %s7438_s15 = smov %s7441_s26 }
 0x95f   : > { %s7439_s16 = smov %s7445_s13 }
 0x963   : > { %s30_s17 = sadd.s32 1, %s7435_s3  }
 0x964   : > { %p27_p6 = scmp.ge.s32.totalorder %s30_s17, 18  }
 0x966   :  { %29 = sbr.rel (!%p27_p6) target bundleno = 17 (0x11), region = 159 }
 0x96b   :  { %4257 = vsyncpa [#allocation5], 1 }
 0x96c   :  { %4259 = vsyncpa [#allocation5 + $0x1], 1 }
 0x96d   :  { %4260 = vsyncpa [#allocation7], 1 }
 0x96e   :  { %4261 = vsyncpa [#allocation10], 1 }
 0x96f   :  { %4262 = vsyncpa [#allocation13], 1 }
 0x970   :  { %4263 = vsyncpa [#allocation16], 1 }
 0x971   :  { %4264 = vsyncpa [#allocation19], 1 }

</bundles_post_ra>
